<compile_context>
chip_gen: v7x
topology: tpu7x:2x2x1
jax: 0.10.0
libtpu: 0.0.40
codegen_flags: <defaults>
</compile_context>

<pallas_src>
import functools

import jax
import jax.numpy as jnp
from jax.experimental import pallas as pl
from jax.experimental.pallas import tpu as pltpu


def _logsigmoid(x):
    # numerically stable log(sigmoid(x)) = min(x, 0) - log1p(exp(-|x|))
    return jnp.minimum(x, 0.0) - jnp.log1p(jnp.exp(-jnp.abs(x)))


def _round_up(x, m):
    return ((x + m - 1) // m) * m


def triple2vec_kernel(pos_u_ref, pos_i1_ref, pos_i2_ref,
                      neg_u_ref, neg_i1_ref, neg_i2_ref,
                      user_tab_ref, item_tab_ref, out_ref, *,
                      n_rows, block_b, emb_dim, n_neg, u_pad, i_pad):
    """One batch block: in-kernel embedding gathers + per-row logsigmoid sum."""
    D, N = emb_dim, n_neg
    f32 = jnp.float32

    # lane iotas used for all one-hot builds (hoisted, reused 18x)
    u_iota = jax.lax.broadcasted_iota(jnp.int32, (block_b, u_pad), 1)
    i_iota = jax.lax.broadcasted_iota(jnp.int32, (block_b, i_pad), 1)

    def gather(idx_col, tab_ref, iota):
        """Row gather of the augmented [emb | bias | 0...] table via one-hot MXU matmul."""
        onehot = (idx_col == iota).astype(f32)                       # (Bm, rows_pad)
        ga = jnp.dot(onehot, tab_ref[...],
                     preferred_element_type=f32,
                     precision=jax.lax.Precision.HIGHEST)            # (Bm, tab_width)
        return ga[:, :D], ga[:, D:D + 1]                             # emb (Bm,D), bias (Bm,1)

    def rowdot(a, b):
        return jnp.sum(a * b, axis=1, keepdims=True)                 # (Bm, 1)

    emb_u,  b_u  = gather(pos_u_ref[...],  user_tab_ref, u_iota)
    emb_i1, b_i1 = gather(pos_i1_ref[...], item_tab_ref, i_iota)
    emb_i2, b_i2 = gather(pos_i2_ref[...], item_tab_ref, i_iota)

    cols = [
        rowdot(emb_u,  emb_i1 + emb_i2) + b_u,
        rowdot(emb_i1, emb_u + emb_i2) + b_i1,
        rowdot(emb_i2, emb_u + emb_i1) + b_i2,
    ]

    for n in range(N):
        e_nu, b_nu = gather(neg_u_ref[:, n:n + 1], user_tab_ref, u_iota)
        # INTENTIONAL (PyTorch bug reproduction): both item-negative branches
        # share the embedding gathered with neg_i_2 (gathered ONCE here); only
        # the biases differ (neg_i_1 vs neg_i_2), exactly as in the reference.
        e_ni, b_ni2 = gather(neg_i2_ref[:, n:n + 1], item_tab_ref, i_iota)
        _,    b_ni1 = gather(neg_i1_ref[:, n:n + 1], item_tab_ref, i_iota)
        cols.append(-(rowdot(e_nu, emb_u)  + b_nu))
        cols.append(-(rowdot(e_ni, emb_i1) + b_ni1))
        cols.append(-(rowdot(e_ni, emb_i2) + b_ni2))

    raw = jnp.concatenate(cols, axis=1)                              # (Bm, 3+3N)
    ls = _logsigmoid(raw)                                            # one dense EUP stream
    row_sum = jnp.sum(ls, axis=1, keepdims=True)                     # (Bm, 1)

    # zero out padded batch rows (index arrays were padded with valid index 0)
    row = (pl.program_id(0) * block_b
           + jax.lax.broadcasted_iota(jnp.int32, (block_b, 1), 0))
    out_ref[...] = jnp.where(row < n_rows, row_sum, 0.0)


def triple2vec_forward(params, pos_u, pos_i_1, pos_i_2, neg_u, neg_i_1, neg_i_2,
                       *, batch_size, block_b=1024):
    user_w = params["user_emb"].astype(jnp.float32)   # (U, D)
    item_w = params["item_emb"].astype(jnp.float32)   # (I, D)
    user_b = params["user_bias"].astype(jnp.float32)  # (U, 1)
    item_b = params["item_bias"].astype(jnp.float32)  # (I, 1)

    B = pos_u.shape[0]
    N = neg_u.shape[1]
    U, D = user_w.shape
    I = item_w.shape[0]

    # --- augmented, VMEM-resident tables: [embedding | bias | zero pad] ------
    u_pad = _round_up(U, 128)
    i_pad = _round_up(I, 128)
    tw = _round_up(D + 1, 128)
    # TODO(synk): tables that do not fit VMEM need a manual DMA row-gather path.
    assert (u_pad + i_pad) * tw * 4 <= (8 << 20), \
        "embedding tables too large for the VMEM-resident fused-gather path"

    user_aug = (jnp.zeros((u_pad, tw), jnp.float32)
                .at[:U, :D].set(user_w)
                .at[:U, D].set(user_b[:, 0]))
    item_aug = (jnp.zeros((i_pad, tw), jnp.float32)
                .at[:I, :D].set(item_w)
                .at[:I, D].set(item_b[:, 0]))

    # --- batch tiling --------------------------------------------------------
    # cap block_b so the (block_b, rows_pad) one-hot intermediates stay modest
    cap = max(8, (((2 << 20) // (4 * max(u_pad, i_pad))) // 8) * 8)
    block_b = max(8, (min(block_b, cap, _round_up(B, 8)) // 8) * 8)
    padded_B = _round_up(B, block_b)
    num_blocks = padded_B // block_b

    def prep_idx(a):
        a = a.astype(jnp.int32).reshape(B, -1)
        if padded_B != B:
            a = jnp.pad(a, ((0, padded_B - B), (0, 0)))   # pad with valid index 0
        return a

    pos_u_p, pos_i1_p, pos_i2_p = prep_idx(pos_u), prep_idx(pos_i_1), prep_idx(pos_i_2)
    neg_u_p, neg_i1_p, neg_i2_p = prep_idx(neg_u), prep_idx(neg_i_1), prep_idx(neg_i_2)

    kernel = functools.partial(
        triple2vec_kernel, n_rows=B, block_b=block_b, emb_dim=D, n_neg=N,
        u_pad=u_pad, i_pad=i_pad)

    row_sums = pl.pallas_call(
        kernel,
        out_shape=jax.ShapeDtypeStruct((padded_B, 1), jnp.float32),
        grid=(num_blocks,),
        in_specs=[
            pl.BlockSpec((block_b, 1), lambda i: (i, 0)),   # pos_u
            pl.BlockSpec((block_b, 1), lambda i: (i, 0)),   # pos_i_1
            pl.BlockSpec((block_b, 1), lambda i: (i, 0)),   # pos_i_2
            pl.BlockSpec((block_b, N), lambda i: (i, 0)),   # neg_u
            pl.BlockSpec((block_b, N), lambda i: (i, 0)),   # neg_i_1
            pl.BlockSpec((block_b, N), lambda i: (i, 0)),   # neg_i_2
            pl.BlockSpec((u_pad, tw), lambda i: (0, 0)),    # user table (resident)
            pl.BlockSpec((i_pad, tw), lambda i: (0, 0)),    # item table (resident)
        ],
        out_specs=pl.BlockSpec((block_b, 1), lambda i: (i, 0)),
        compiler_params=pltpu.CompilerParams(
            dimension_semantics=("parallel",)),
    )(pos_u_p, pos_i1_p, pos_i2_p, neg_u_p, neg_i1_p, neg_i2_p, user_aug, item_aug)

    # final reduction + scale done outside the kernel (per-block/per-row
    # partials -> no serial accumulator, both TCs usable on v7x)
    return -jnp.sum(row_sums) / (3.0 * batch_size)


def triple2vec_reference(params, pos_u, pos_i_1, pos_i_2, neg_u, neg_i_1, neg_i_2,
                         *, batch_size):
    """Pure-JAX reference mirroring the PyTorch forward exactly."""
    user_w, item_w = params["user_emb"], params["item_emb"]
    user_b, item_b = params["user_bias"], params["item_bias"]
    logsig = jax.nn.log_sigmoid

    emb_u = user_w[pos_u]
    emb_i1 = item_w[pos_i_1]
    emb_i2 = item_w[pos_i_2]
    emb_u_neg = user_w[neg_u]
    emb_i1_neg = item_w[neg_i_2]   # PyTorch uses neg_i_2 here (intentional)
    emb_i2_neg = item_w[neg_i_2]

    def branch(target, other_a, other_b, pos_bias, neg_emb, neg_bias):
        pos = jnp.sum(target * (other_a + other_b), axis=1) + pos_bias
        pos = logsig(pos)
        neg = jnp.einsum("bnd,bd->bn", neg_emb, target) + neg_bias
        neg = logsig(-neg)
        return -(jnp.sum(pos) + jnp.sum(neg))

    u = branch(emb_u, emb_i1, emb_i2, user_b[pos_u][:, 0],
               emb_u_neg, user_b[neg_u][..., 0])
    i1 = branch(emb_i1, emb_u, emb_i2, item_b[pos_i_1][:, 0],
                emb_i1_neg, item_b[neg_i_1][..., 0])
    i2 = branch(emb_i2, emb_u, emb_i1, item_b[pos_i_2][:, 0],
                emb_i2_neg, item_b[neg_i_2][..., 0])
    return (u + i1 + i2) / (3.0 * batch_size)


if __name__ == "__main__":
    n_users, n_items = 50, 60
    emb_dim = 32
    n_neg = 5
    batch_size = 8

    key = jax.random.PRNGKey(0)
    k_uw, k_iw, k1, k2, k3, k4, k5, k6 = jax.random.split(key, 8)

    initrange = 0.01
    params = {
        "user_emb": jax.random.uniform(k_uw, (n_users, emb_dim), jnp.float32,
                                       -initrange, initrange),
        "item_emb": jax.random.uniform(k_iw, (n_items, emb_dim), jnp.float32,
                                       -initrange, initrange),
        # init_emb fills biases with 0.0
        "user_bias": jnp.zeros((n_users, 1), jnp.float32),
        "item_bias": jnp.zeros((n_items, 1), jnp.float32),
    }

    pos_u = jax.random.randint(k1, (batch_size,), 0, n_users)
    pos_i_1 = jax.random.randint(k2, (batch_size,), 0, n_items)
    pos_i_2 = jax.random.randint(k3, (batch_size,), 0, n_items)
    neg_u = jax.random.randint(k4, (batch_size, n_neg), 0, n_users)
    neg_i_1 = jax.random.randint(k5, (batch_size, n_neg), 0, n_items)
    neg_i_2 = jax.random.randint(k6, (batch_size, n_neg), 0, n_items)

    loss = triple2vec_forward(params, pos_u, pos_i_1, pos_i_2,
                              neg_u, neg_i_1, neg_i_2, batch_size=batch_size)
    loss = jax.block_until_ready(loss)
    ref = triple2vec_reference(params, pos_u, pos_i_1, pos_i_2,
                               neg_u, neg_i_1, neg_i_2, batch_size=batch_size)
    assert jnp.allclose(loss, ref, atol=2e-5, rtol=2e-5), (loss, ref)

    # second check: ragged batch (exercises the padded-row mask path)
    b2 = 11
    pos_u2 = jax.random.randint(k1, (b2,), 0, n_users)
    pos_i_12 = jax.random.randint(k2, (b2,), 0, n_items)
    pos_i_22 = jax.random.randint(k3, (b2,), 0, n_items)
    neg_u2 = jax.random.randint(k4, (b2, n_neg), 0, n_users)
    neg_i_12 = jax.random.randint(k5, (b2, n_neg), 0, n_items)
    neg_i_22 = jax.random.randint(k6, (b2, n_neg), 0, n_items)
    loss2 = triple2vec_forward(params, pos_u2, pos_i_12, pos_i_22,
                               neg_u2, neg_i_12, neg_i_22, batch_size=b2)
    loss2 = jax.block_until_ready(loss2)
    ref2 = triple2vec_reference(params, pos_u2, pos_i_12, pos_i_22,
                                neg_u2, neg_i_12, neg_i_22, batch_size=b2)
    assert jnp.allclose(loss2, ref2, atol=2e-5, rtol=2e-5), (loss2, ref2)

    print("KERNEL_OK")
</pallas_src>

<mosaic_0001>
module attributes {stable_mosaic.version = 11 : i64} {
  func.func @triple2vec_kernel(%arg0: i32, %arg1: memref<8x1xi32, #tpu.memory_space<vmem>>, %arg2: memref<8x1xi32, #tpu.memory_space<vmem>>, %arg3: memref<8x1xi32, #tpu.memory_space<vmem>>, %arg4: memref<8x5xi32, #tpu.memory_space<vmem>>, %arg5: memref<8x5xi32, #tpu.memory_space<vmem>>, %arg6: memref<8x5xi32, #tpu.memory_space<vmem>>, %arg7: memref<128x128xf32, #tpu.memory_space<vmem>>, %arg8: memref<128x128xf32, #tpu.memory_space<vmem>>, %arg9: memref<8x1xf32, #tpu.memory_space<vmem>>) attributes {dimension_semantics = [#tpu.dimension_semantics<parallel>], iteration_bounds = array<i64: 1>, scalar_prefetch = 0 : i64, scratch_operands = 0 : i64, tpu.core_type = #tpu.core_type<tc>, window_params = [{transform_indices = @transform_0, window_bounds = array<i64: 8, 1>}, {transform_indices = @transform_1, window_bounds = array<i64: 8, 1>}, {transform_indices = @transform_2, window_bounds = array<i64: 8, 1>}, {transform_indices = @transform_3, window_bounds = array<i64: 8, 5>}, {transform_indices = @transform_4, window_bounds = array<i64: 8, 5>}, {transform_indices = @transform_5, window_bounds = array<i64: 8, 5>}, {pipeline_mode = #tpu.pipeline_mode<synchronous>, transform_indices = @transform_6, window_bounds = array<i64: 128, 128>}, {pipeline_mode = #tpu.pipeline_mode<synchronous>, transform_indices = @transform_7, window_bounds = array<i64: 128, 128>}, {transform_indices = @transform_8, window_bounds = array<i64: 8, 1>}]} {
    %0 = tpu.iota {dimensions = array<i32: 1>} : vector<8x128xi32>
    %1 = tpu.iota {dimensions = array<i32: 1>} : vector<8x128xi32>
    %c0 = arith.constant 0 : index
    %c0_0 = arith.constant 0 : index
    %2 = vector.load %arg1[%c0, %c0_0] : memref<8x1xi32, #tpu.memory_space<vmem>>, vector<8x1xi32>
    %3 = vector.broadcast %2 : vector<8x1xi32> to vector<8x128xi32>
    %4 = arith.cmpi eq, %3, %0 : vector<8x128xi32>
    %5 = arith.extui %4 : vector<8x128xi1> to vector<8x128xi32>
    %6 = arith.sitofp %5 : vector<8x128xi32> to vector<8x128xf32>
    %c0_1 = arith.constant 0 : index
    %c0_2 = arith.constant 0 : index
    %7 = vector.load %arg7[%c0_1, %c0_2] : memref<128x128xf32, #tpu.memory_space<vmem>>, vector<128x128xf32>
    %cst = arith.constant dense<0.000000e+00> : vector<8x128xf32>
    %8 = tpu.matmul %6, %7, %cst {dimension_numbers = #tpu.dot_dimension_numbers<[1], [0], [0], [1], [0, 0, 1, 1], [], []>, precision = #tpu.contract_precision<fp32>} : vector<8x128xf32>, vector<128x128xf32>, vector<8x128xf32> -> vector<8x128xf32>
    %9 = vector.extract_strided_slice %8 {offsets = [0, 0], sizes = [8, 32], strides = [1, 1]} : vector<8x128xf32> to vector<8x32xf32>
    %10 = vector.extract_strided_slice %8 {offsets = [0, 32], sizes = [8, 1], strides = [1, 1]} : vector<8x128xf32> to vector<8x1xf32>
    %c0_3 = arith.constant 0 : index
    %c0_4 = arith.constant 0 : index
    %11 = vector.load %arg2[%c0_3, %c0_4] : memref<8x1xi32, #tpu.memory_space<vmem>>, vector<8x1xi32>
    %12 = vector.broadcast %11 : vector<8x1xi32> to vector<8x128xi32>
    %13 = arith.cmpi eq, %12, %1 : vector<8x128xi32>
    %14 = arith.extui %13 : vector<8x128xi1> to vector<8x128xi32>
    %15 = arith.sitofp %14 : vector<8x128xi32> to vector<8x128xf32>
    %c0_5 = arith.constant 0 : index
    %c0_6 = arith.constant 0 : index
    %16 = vector.load %arg8[%c0_5, %c0_6] : memref<128x128xf32, #tpu.memory_space<vmem>>, vector<128x128xf32>
    %cst_7 = arith.constant dense<0.000000e+00> : vector<8x128xf32>
    %17 = tpu.matmul %15, %16, %cst_7 {dimension_numbers = #tpu.dot_dimension_numbers<[1], [0], [0], [1], [0, 0, 1, 1], [], []>, precision = #tpu.contract_precision<fp32>} : vector<8x128xf32>, vector<128x128xf32>, vector<8x128xf32> -> vector<8x128xf32>
    %18 = vector.extract_strided_slice %17 {offsets = [0, 0], sizes = [8, 32], strides = [1, 1]} : vector<8x128xf32> to vector<8x32xf32>
    %19 = vector.extract_strided_slice %17 {offsets = [0, 32], sizes = [8, 1], strides = [1, 1]} : vector<8x128xf32> to vector<8x1xf32>
    %c0_8 = arith.constant 0 : index
    %c0_9 = arith.constant 0 : index
    %20 = vector.load %arg3[%c0_8, %c0_9] : memref<8x1xi32, #tpu.memory_space<vmem>>, vector<8x1xi32>
    %21 = vector.broadcast %20 : vector<8x1xi32> to vector<8x128xi32>
    %22 = arith.cmpi eq, %21, %1 : vector<8x128xi32>
    %23 = arith.extui %22 : vector<8x128xi1> to vector<8x128xi32>
    %24 = arith.sitofp %23 : vector<8x128xi32> to vector<8x128xf32>
    %c0_10 = arith.constant 0 : index
    %c0_11 = arith.constant 0 : index
    %25 = vector.load %arg8[%c0_10, %c0_11] : memref<128x128xf32, #tpu.memory_space<vmem>>, vector<128x128xf32>
    %cst_12 = arith.constant dense<0.000000e+00> : vector<8x128xf32>
    %26 = tpu.matmul %24, %25, %cst_12 {dimension_numbers = #tpu.dot_dimension_numbers<[1], [0], [0], [1], [0, 0, 1, 1], [], []>, precision = #tpu.contract_precision<fp32>} : vector<8x128xf32>, vector<128x128xf32>, vector<8x128xf32> -> vector<8x128xf32>
    %27 = vector.extract_strided_slice %26 {offsets = [0, 0], sizes = [8, 32], strides = [1, 1]} : vector<8x128xf32> to vector<8x32xf32>
    %28 = vector.extract_strided_slice %26 {offsets = [0, 32], sizes = [8, 1], strides = [1, 1]} : vector<8x128xf32> to vector<8x1xf32>
    %29 = arith.addf %18, %27 : vector<8x32xf32>
    %30 = arith.mulf %9, %29 : vector<8x32xf32>
    %cst_13 = arith.constant dense<0.000000e+00> : vector<8xf32>
    %31 = vector.multi_reduction <add>, %30, %cst_13 [1] : vector<8x32xf32> to vector<8xf32>
    %32 = vector.shape_cast %31 : vector<8xf32> to vector<8x1xf32>
    %33 = arith.addf %32, %10 : vector<8x1xf32>
    %34 = arith.addf %9, %27 : vector<8x32xf32>
    %35 = arith.mulf %18, %34 : vector<8x32xf32>
    %cst_14 = arith.constant dense<0.000000e+00> : vector<8xf32>
    %36 = vector.multi_reduction <add>, %35, %cst_14 [1] : vector<8x32xf32> to vector<8xf32>
    %37 = vector.shape_cast %36 : vector<8xf32> to vector<8x1xf32>
    %38 = arith.addf %37, %19 : vector<8x1xf32>
    %39 = arith.addf %9, %18 : vector<8x32xf32>
    %40 = arith.mulf %27, %39 : vector<8x32xf32>
    %cst_15 = arith.constant dense<0.000000e+00> : vector<8xf32>
    %41 = vector.multi_reduction <add>, %40, %cst_15 [1] : vector<8x32xf32> to vector<8xf32>
    %42 = vector.shape_cast %41 : vector<8xf32> to vector<8x1xf32>
    %43 = arith.addf %42, %28 : vector<8x1xf32>
    %c0_16 = arith.constant 0 : index
    %c0_17 = arith.constant 0 : index
    %44 = vector.load %arg4[%c0_16, %c0_17] : memref<8x5xi32, #tpu.memory_space<vmem>>, vector<8x1xi32>
    %45 = vector.broadcast %44 : vector<8x1xi32> to vector<8x128xi32>
    %46 = arith.cmpi eq, %45, %0 : vector<8x128xi32>
    %47 = arith.extui %46 : vector<8x128xi1> to vector<8x128xi32>
    %48 = arith.sitofp %47 : vector<8x128xi32> to vector<8x128xf32>
    %c0_18 = arith.constant 0 : index
    %c0_19 = arith.constant 0 : index
    %49 = vector.load %arg7[%c0_18, %c0_19] : memref<128x128xf32, #tpu.memory_space<vmem>>, vector<128x128xf32>
    %cst_20 = arith.constant dense<0.000000e+00> : vector<8x128xf32>
    %50 = tpu.matmul %48, %49, %cst_20 {dimension_numbers = #tpu.dot_dimension_numbers<[1], [0], [0], [1], [0, 0, 1, 1], [], []>, precision = #tpu.contract_precision<fp32>} : vector<8x128xf32>, vector<128x128xf32>, vector<8x128xf32> -> vector<8x128xf32>
    %51 = vector.extract_strided_slice %50 {offsets = [0, 0], sizes = [8, 32], strides = [1, 1]} : vector<8x128xf32> to vector<8x32xf32>
    %52 = vector.extract_strided_slice %50 {offsets = [0, 32], sizes = [8, 1], strides = [1, 1]} : vector<8x128xf32> to vector<8x1xf32>
    %c0_21 = arith.constant 0 : index
    %c0_22 = arith.constant 0 : index
    %53 = vector.load %arg6[%c0_21, %c0_22] : memref<8x5xi32, #tpu.memory_space<vmem>>, vector<8x1xi32>
    %54 = vector.broadcast %53 : vector<8x1xi32> to vector<8x128xi32>
    %55 = arith.cmpi eq, %54, %1 : vector<8x128xi32>
    %56 = arith.extui %55 : vector<8x128xi1> to vector<8x128xi32>
    %57 = arith.sitofp %56 : vector<8x128xi32> to vector<8x128xf32>
    %c0_23 = arith.constant 0 : index
    %c0_24 = arith.constant 0 : index
    %58 = vector.load %arg8[%c0_23, %c0_24] : memref<128x128xf32, #tpu.memory_space<vmem>>, vector<128x128xf32>
    %cst_25 = arith.constant dense<0.000000e+00> : vector<8x128xf32>
    %59 = tpu.matmul %57, %58, %cst_25 {dimension_numbers = #tpu.dot_dimension_numbers<[1], [0], [0], [1], [0, 0, 1, 1], [], []>, precision = #tpu.contract_precision<fp32>} : vector<8x128xf32>, vector<128x128xf32>, vector<8x128xf32> -> vector<8x128xf32>
    %60 = vector.extract_strided_slice %59 {offsets = [0, 0], sizes = [8, 32], strides = [1, 1]} : vector<8x128xf32> to vector<8x32xf32>
    %61 = vector.extract_strided_slice %59 {offsets = [0, 32], sizes = [8, 1], strides = [1, 1]} : vector<8x128xf32> to vector<8x1xf32>
    %c0_26 = arith.constant 0 : index
    %c0_27 = arith.constant 0 : index
    %62 = vector.load %arg5[%c0_26, %c0_27] : memref<8x5xi32, #tpu.memory_space<vmem>>, vector<8x1xi32>
    %63 = vector.broadcast %62 : vector<8x1xi32> to vector<8x128xi32>
    %64 = arith.cmpi eq, %63, %1 : vector<8x128xi32>
    %65 = arith.extui %64 : vector<8x128xi1> to vector<8x128xi32>
    %66 = arith.sitofp %65 : vector<8x128xi32> to vector<8x128xf32>
    %c0_28 = arith.constant 0 : index
    %c0_29 = arith.constant 0 : index
    %67 = vector.load %arg8[%c0_28, %c0_29] : memref<128x128xf32, #tpu.memory_space<vmem>>, vector<128x128xf32>
    %cst_30 = arith.constant dense<0.000000e+00> : vector<8x128xf32>
    %68 = tpu.matmul %66, %67, %cst_30 {dimension_numbers = #tpu.dot_dimension_numbers<[1], [0], [0], [1], [0, 0, 1, 1], [], []>, precision = #tpu.contract_precision<fp32>} : vector<8x128xf32>, vector<128x128xf32>, vector<8x128xf32> -> vector<8x128xf32>
    %69 = vector.extract_strided_slice %68 {offsets = [0, 32], sizes = [8, 1], strides = [1, 1]} : vector<8x128xf32> to vector<8x1xf32>
    %70 = arith.mulf %51, %9 : vector<8x32xf32>
    %cst_31 = arith.constant dense<0.000000e+00> : vector<8xf32>
    %71 = vector.multi_reduction <add>, %70, %cst_31 [1] : vector<8x32xf32> to vector<8xf32>
    %72 = vector.shape_cast %71 : vector<8xf32> to vector<8x1xf32>
    %73 = arith.addf %72, %52 : vector<8x1xf32>
    %cst_32 = arith.constant 0.000000e+00 : f32
    %74 = vector.broadcast %cst_32 : f32 to vector<8x1xf32>
    %75 = arith.subf %74, %73 : vector<8x1xf32>
    %76 = arith.mulf %60, %18 : vector<8x32xf32>
    %cst_33 = arith.constant dense<0.000000e+00> : vector<8xf32>
    %77 = vector.multi_reduction <add>, %76, %cst_33 [1] : vector<8x32xf32> to vector<8xf32>
    %78 = vector.shape_cast %77 : vector<8xf32> to vector<8x1xf32>
    %79 = arith.addf %78, %69 : vector<8x1xf32>
    %cst_34 = arith.constant 0.000000e+00 : f32
    %80 = vector.broadcast %cst_34 : f32 to vector<8x1xf32>
    %81 = arith.subf %80, %79 : vector<8x1xf32>
    %82 = arith.mulf %60, %27 : vector<8x32xf32>
    %cst_35 = arith.constant dense<0.000000e+00> : vector<8xf32>
    %83 = vector.multi_reduction <add>, %82, %cst_35 [1] : vector<8x32xf32> to vector<8xf32>
    %84 = vector.shape_cast %83 : vector<8xf32> to vector<8x1xf32>
    %85 = arith.addf %84, %61 : vector<8x1xf32>
    %cst_36 = arith.constant 0.000000e+00 : f32
    %86 = vector.broadcast %cst_36 : f32 to vector<8x1xf32>
    %87 = arith.subf %86, %85 : vector<8x1xf32>
    %c0_37 = arith.constant 0 : index
    %c1 = arith.constant 1 : index
    %88 = vector.load %arg4[%c0_37, %c1] : memref<8x5xi32, #tpu.memory_space<vmem>>, vector<8x1xi32>
    %89 = vector.broadcast %88 : vector<8x1xi32> to vector<8x128xi32>
    %90 = arith.cmpi eq, %89, %0 : vector<8x128xi32>
    %91 = arith.extui %90 : vector<8x128xi1> to vector<8x128xi32>
    %92 = arith.sitofp %91 : vector<8x128xi32> to vector<8x128xf32>
    %c0_38 = arith.constant 0 : index
    %c0_39 = arith.constant 0 : index
    %93 = vector.load %arg7[%c0_38, %c0_39] : memref<128x128xf32, #tpu.memory_space<vmem>>, vector<128x128xf32>
    %cst_40 = arith.constant dense<0.000000e+00> : vector<8x128xf32>
    %94 = tpu.matmul %92, %93, %cst_40 {dimension_numbers = #tpu.dot_dimension_numbers<[1], [0], [0], [1], [0, 0, 1, 1], [], []>, precision = #tpu.contract_precision<fp32>} : vector<8x128xf32>, vector<128x128xf32>, vector<8x128xf32> -> vector<8x128xf32>
    %95 = vector.extract_strided_slice %94 {offsets = [0, 0], sizes = [8, 32], strides = [1, 1]} : vector<8x128xf32> to vector<8x32xf32>
    %96 = vector.extract_strided_slice %94 {offsets = [0, 32], sizes = [8, 1], strides = [1, 1]} : vector<8x128xf32> to vector<8x1xf32>
    %c0_41 = arith.constant 0 : index
    %c1_42 = arith.constant 1 : index
    %97 = vector.load %arg6[%c0_41, %c1_42] : memref<8x5xi32, #tpu.memory_space<vmem>>, vector<8x1xi32>
    %98 = vector.broadcast %97 : vector<8x1xi32> to vector<8x128xi32>
    %99 = arith.cmpi eq, %98, %1 : vector<8x128xi32>
    %100 = arith.extui %99 : vector<8x128xi1> to vector<8x128xi32>
    %101 = arith.sitofp %100 : vector<8x128xi32> to vector<8x128xf32>
    %c0_43 = arith.constant 0 : index
    %c0_44 = arith.constant 0 : index
    %102 = vector.load %arg8[%c0_43, %c0_44] : memref<128x128xf32, #tpu.memory_space<vmem>>, vector<128x128xf32>
    %cst_45 = arith.constant dense<0.000000e+00> : vector<8x128xf32>
    %103 = tpu.matmul %101, %102, %cst_45 {dimension_numbers = #tpu.dot_dimension_numbers<[1], [0], [0], [1], [0, 0, 1, 1], [], []>, precision = #tpu.contract_precision<fp32>} : vector<8x128xf32>, vector<128x128xf32>, vector<8x128xf32> -> vector<8x128xf32>
    %104 = vector.extract_strided_slice %103 {offsets = [0, 0], sizes = [8, 32], strides = [1, 1]} : vector<8x128xf32> to vector<8x32xf32>
    %105 = vector.extract_strided_slice %103 {offsets = [0, 32], sizes = [8, 1], strides = [1, 1]} : vector<8x128xf32> to vector<8x1xf32>
    %c0_46 = arith.constant 0 : index
    %c1_47 = arith.constant 1 : index
    %106 = vector.load %arg5[%c0_46, %c1_47] : memref<8x5xi32, #tpu.memory_space<vmem>>, vector<8x1xi32>
    %107 = vector.broadcast %106 : vector<8x1xi32> to vector<8x128xi32>
    %108 = arith.cmpi eq, %107, %1 : vector<8x128xi32>
    %109 = arith.extui %108 : vector<8x128xi1> to vector<8x128xi32>
    %110 = arith.sitofp %109 : vector<8x128xi32> to vector<8x128xf32>
    %c0_48 = arith.constant 0 : index
    %c0_49 = arith.constant 0 : index
    %111 = vector.load %arg8[%c0_48, %c0_49] : memref<128x128xf32, #tpu.memory_space<vmem>>, vector<128x128xf32>
    %cst_50 = arith.constant dense<0.000000e+00> : vector<8x128xf32>
    %112 = tpu.matmul %110, %111, %cst_50 {dimension_numbers = #tpu.dot_dimension_numbers<[1], [0], [0], [1], [0, 0, 1, 1], [], []>, precision = #tpu.contract_precision<fp32>} : vector<8x128xf32>, vector<128x128xf32>, vector<8x128xf32> -> vector<8x128xf32>
    %113 = vector.extract_strided_slice %112 {offsets = [0, 32], sizes = [8, 1], strides = [1, 1]} : vector<8x128xf32> to vector<8x1xf32>
    %114 = arith.mulf %95, %9 : vector<8x32xf32>
    %cst_51 = arith.constant dense<0.000000e+00> : vector<8xf32>
    %115 = vector.multi_reduction <add>, %114, %cst_51 [1] : vector<8x32xf32> to vector<8xf32>
    %116 = vector.shape_cast %115 : vector<8xf32> to vector<8x1xf32>
    %117 = arith.addf %116, %96 : vector<8x1xf32>
    %cst_52 = arith.constant 0.000000e+00 : f32
    %118 = vector.broadcast %cst_52 : f32 to vector<8x1xf32>
    %119 = arith.subf %118, %117 : vector<8x1xf32>
    %120 = arith.mulf %104, %18 : vector<8x32xf32>
    %cst_53 = arith.constant dense<0.000000e+00> : vector<8xf32>
    %121 = vector.multi_reduction <add>, %120, %cst_53 [1] : vector<8x32xf32> to vector<8xf32>
    %122 = vector.shape_cast %121 : vector<8xf32> to vector<8x1xf32>
    %123 = arith.addf %122, %113 : vector<8x1xf32>
    %cst_54 = arith.constant 0.000000e+00 : f32
    %124 = vector.broadcast %cst_54 : f32 to vector<8x1xf32>
    %125 = arith.subf %124, %123 : vector<8x1xf32>
    %126 = arith.mulf %104, %27 : vector<8x32xf32>
    %cst_55 = arith.constant dense<0.000000e+00> : vector<8xf32>
    %127 = vector.multi_reduction <add>, %126, %cst_55 [1] : vector<8x32xf32> to vector<8xf32>
    %128 = vector.shape_cast %127 : vector<8xf32> to vector<8x1xf32>
    %129 = arith.addf %128, %105 : vector<8x1xf32>
    %cst_56 = arith.constant 0.000000e+00 : f32
    %130 = vector.broadcast %cst_56 : f32 to vector<8x1xf32>
    %131 = arith.subf %130, %129 : vector<8x1xf32>
    %c0_57 = arith.constant 0 : index
    %c2 = arith.constant 2 : index
    %132 = vector.load %arg4[%c0_57, %c2] : memref<8x5xi32, #tpu.memory_space<vmem>>, vector<8x1xi32>
    %133 = vector.broadcast %132 : vector<8x1xi32> to vector<8x128xi32>
    %134 = arith.cmpi eq, %133, %0 : vector<8x128xi32>
    %135 = arith.extui %134 : vector<8x128xi1> to vector<8x128xi32>
    %136 = arith.sitofp %135 : vector<8x128xi32> to vector<8x128xf32>
    %c0_58 = arith.constant 0 : index
    %c0_59 = arith.constant 0 : index
    %137 = vector.load %arg7[%c0_58, %c0_59] : memref<128x128xf32, #tpu.memory_space<vmem>>, vector<128x128xf32>
    %cst_60 = arith.constant dense<0.000000e+00> : vector<8x128xf32>
    %138 = tpu.matmul %136, %137, %cst_60 {dimension_numbers = #tpu.dot_dimension_numbers<[1], [0], [0], [1], [0, 0, 1, 1], [], []>, precision = #tpu.contract_precision<fp32>} : vector<8x128xf32>, vector<128x128xf32>, vector<8x128xf32> -> vector<8x128xf32>
    %139 = vector.extract_strided_slice %138 {offsets = [0, 0], sizes = [8, 32], strides = [1, 1]} : vector<8x128xf32> to vector<8x32xf32>
    %140 = vector.extract_strided_slice %138 {offsets = [0, 32], sizes = [8, 1], strides = [1, 1]} : vector<8x128xf32> to vector<8x1xf32>
    %c0_61 = arith.constant 0 : index
    %c2_62 = arith.constant 2 : index
    %141 = vector.load %arg6[%c0_61, %c2_62] : memref<8x5xi32, #tpu.memory_space<vmem>>, vector<8x1xi32>
    %142 = vector.broadcast %141 : vector<8x1xi32> to vector<8x128xi32>
    %143 = arith.cmpi eq, %142, %1 : vector<8x128xi32>
    %144 = arith.extui %143 : vector<8x128xi1> to vector<8x128xi32>
    %145 = arith.sitofp %144 : vector<8x128xi32> to vector<8x128xf32>
    %c0_63 = arith.constant 0 : index
    %c0_64 = arith.constant 0 : index
    %146 = vector.load %arg8[%c0_63, %c0_64] : memref<128x128xf32, #tpu.memory_space<vmem>>, vector<128x128xf32>
    %cst_65 = arith.constant dense<0.000000e+00> : vector<8x128xf32>
    %147 = tpu.matmul %145, %146, %cst_65 {dimension_numbers = #tpu.dot_dimension_numbers<[1], [0], [0], [1], [0, 0, 1, 1], [], []>, precision = #tpu.contract_precision<fp32>} : vector<8x128xf32>, vector<128x128xf32>, vector<8x128xf32> -> vector<8x128xf32>
    %148 = vector.extract_strided_slice %147 {offsets = [0, 0], sizes = [8, 32], strides = [1, 1]} : vector<8x128xf32> to vector<8x32xf32>
    %149 = vector.extract_strided_slice %147 {offsets = [0, 32], sizes = [8, 1], strides = [1, 1]} : vector<8x128xf32> to vector<8x1xf32>
    %c0_66 = arith.constant 0 : index
    %c2_67 = arith.constant 2 : index
    %150 = vector.load %arg5[%c0_66, %c2_67] : memref<8x5xi32, #tpu.memory_space<vmem>>, vector<8x1xi32>
    %151 = vector.broadcast %150 : vector<8x1xi32> to vector<8x128xi32>
    %152 = arith.cmpi eq, %151, %1 : vector<8x128xi32>
    %153 = arith.extui %152 : vector<8x128xi1> to vector<8x128xi32>
    %154 = arith.sitofp %153 : vector<8x128xi32> to vector<8x128xf32>
    %c0_68 = arith.constant 0 : index
    %c0_69 = arith.constant 0 : index
    %155 = vector.load %arg8[%c0_68, %c0_69] : memref<128x128xf32, #tpu.memory_space<vmem>>, vector<128x128xf32>
    %cst_70 = arith.constant dense<0.000000e+00> : vector<8x128xf32>
    %156 = tpu.matmul %154, %155, %cst_70 {dimension_numbers = #tpu.dot_dimension_numbers<[1], [0], [0], [1], [0, 0, 1, 1], [], []>, precision = #tpu.contract_precision<fp32>} : vector<8x128xf32>, vector<128x128xf32>, vector<8x128xf32> -> vector<8x128xf32>
    %157 = vector.extract_strided_slice %156 {offsets = [0, 32], sizes = [8, 1], strides = [1, 1]} : vector<8x128xf32> to vector<8x1xf32>
    %158 = arith.mulf %139, %9 : vector<8x32xf32>
    %cst_71 = arith.constant dense<0.000000e+00> : vector<8xf32>
    %159 = vector.multi_reduction <add>, %158, %cst_71 [1] : vector<8x32xf32> to vector<8xf32>
    %160 = vector.shape_cast %159 : vector<8xf32> to vector<8x1xf32>
    %161 = arith.addf %160, %140 : vector<8x1xf32>
    %cst_72 = arith.constant 0.000000e+00 : f32
    %162 = vector.broadcast %cst_72 : f32 to vector<8x1xf32>
    %163 = arith.subf %162, %161 : vector<8x1xf32>
    %164 = arith.mulf %148, %18 : vector<8x32xf32>
    %cst_73 = arith.constant dense<0.000000e+00> : vector<8xf32>
    %165 = vector.multi_reduction <add>, %164, %cst_73 [1] : vector<8x32xf32> to vector<8xf32>
    %166 = vector.shape_cast %165 : vector<8xf32> to vector<8x1xf32>
    %167 = arith.addf %166, %157 : vector<8x1xf32>
    %cst_74 = arith.constant 0.000000e+00 : f32
    %168 = vector.broadcast %cst_74 : f32 to vector<8x1xf32>
    %169 = arith.subf %168, %167 : vector<8x1xf32>
    %170 = arith.mulf %148, %27 : vector<8x32xf32>
    %cst_75 = arith.constant dense<0.000000e+00> : vector<8xf32>
    %171 = vector.multi_reduction <add>, %170, %cst_75 [1] : vector<8x32xf32> to vector<8xf32>
    %172 = vector.shape_cast %171 : vector<8xf32> to vector<8x1xf32>
    %173 = arith.addf %172, %149 : vector<8x1xf32>
    %cst_76 = arith.constant 0.000000e+00 : f32
    %174 = vector.broadcast %cst_76 : f32 to vector<8x1xf32>
    %175 = arith.subf %174, %173 : vector<8x1xf32>
    %c0_77 = arith.constant 0 : index
    %c3 = arith.constant 3 : index
    %176 = vector.load %arg4[%c0_77, %c3] : memref<8x5xi32, #tpu.memory_space<vmem>>, vector<8x1xi32>
    %177 = vector.broadcast %176 : vector<8x1xi32> to vector<8x128xi32>
    %178 = arith.cmpi eq, %177, %0 : vector<8x128xi32>
    %179 = arith.extui %178 : vector<8x128xi1> to vector<8x128xi32>
    %180 = arith.sitofp %179 : vector<8x128xi32> to vector<8x128xf32>
    %c0_78 = arith.constant 0 : index
    %c0_79 = arith.constant 0 : index
    %181 = vector.load %arg7[%c0_78, %c0_79] : memref<128x128xf32, #tpu.memory_space<vmem>>, vector<128x128xf32>
    %cst_80 = arith.constant dense<0.000000e+00> : vector<8x128xf32>
    %182 = tpu.matmul %180, %181, %cst_80 {dimension_numbers = #tpu.dot_dimension_numbers<[1], [0], [0], [1], [0, 0, 1, 1], [], []>, precision = #tpu.contract_precision<fp32>} : vector<8x128xf32>, vector<128x128xf32>, vector<8x128xf32> -> vector<8x128xf32>
    %183 = vector.extract_strided_slice %182 {offsets = [0, 0], sizes = [8, 32], strides = [1, 1]} : vector<8x128xf32> to vector<8x32xf32>
    %184 = vector.extract_strided_slice %182 {offsets = [0, 32], sizes = [8, 1], strides = [1, 1]} : vector<8x128xf32> to vector<8x1xf32>
    %c0_81 = arith.constant 0 : index
    %c3_82 = arith.constant 3 : index
    %185 = vector.load %arg6[%c0_81, %c3_82] : memref<8x5xi32, #tpu.memory_space<vmem>>, vector<8x1xi32>
    %186 = vector.broadcast %185 : vector<8x1xi32> to vector<8x128xi32>
    %187 = arith.cmpi eq, %186, %1 : vector<8x128xi32>
    %188 = arith.extui %187 : vector<8x128xi1> to vector<8x128xi32>
    %189 = arith.sitofp %188 : vector<8x128xi32> to vector<8x128xf32>
    %c0_83 = arith.constant 0 : index
    %c0_84 = arith.constant 0 : index
    %190 = vector.load %arg8[%c0_83, %c0_84] : memref<128x128xf32, #tpu.memory_space<vmem>>, vector<128x128xf32>
    %cst_85 = arith.constant dense<0.000000e+00> : vector<8x128xf32>
    %191 = tpu.matmul %189, %190, %cst_85 {dimension_numbers = #tpu.dot_dimension_numbers<[1], [0], [0], [1], [0, 0, 1, 1], [], []>, precision = #tpu.contract_precision<fp32>} : vector<8x128xf32>, vector<128x128xf32>, vector<8x128xf32> -> vector<8x128xf32>
    %192 = vector.extract_strided_slice %191 {offsets = [0, 0], sizes = [8, 32], strides = [1, 1]} : vector<8x128xf32> to vector<8x32xf32>
    %193 = vector.extract_strided_slice %191 {offsets = [0, 32], sizes = [8, 1], strides = [1, 1]} : vector<8x128xf32> to vector<8x1xf32>
    %c0_86 = arith.constant 0 : index
    %c3_87 = arith.constant 3 : index
    %194 = vector.load %arg5[%c0_86, %c3_87] : memref<8x5xi32, #tpu.memory_space<vmem>>, vector<8x1xi32>
    %195 = vector.broadcast %194 : vector<8x1xi32> to vector<8x128xi32>
    %196 = arith.cmpi eq, %195, %1 : vector<8x128xi32>
    %197 = arith.extui %196 : vector<8x128xi1> to vector<8x128xi32>
    %198 = arith.sitofp %197 : vector<8x128xi32> to vector<8x128xf32>
    %c0_88 = arith.constant 0 : index
    %c0_89 = arith.constant 0 : index
    %199 = vector.load %arg8[%c0_88, %c0_89] : memref<128x128xf32, #tpu.memory_space<vmem>>, vector<128x128xf32>
    %cst_90 = arith.constant dense<0.000000e+00> : vector<8x128xf32>
    %200 = tpu.matmul %198, %199, %cst_90 {dimension_numbers = #tpu.dot_dimension_numbers<[1], [0], [0], [1], [0, 0, 1, 1], [], []>, precision = #tpu.contract_precision<fp32>} : vector<8x128xf32>, vector<128x128xf32>, vector<8x128xf32> -> vector<8x128xf32>
    %201 = vector.extract_strided_slice %200 {offsets = [0, 32], sizes = [8, 1], strides = [1, 1]} : vector<8x128xf32> to vector<8x1xf32>
    %202 = arith.mulf %183, %9 : vector<8x32xf32>
    %cst_91 = arith.constant dense<0.000000e+00> : vector<8xf32>
    %203 = vector.multi_reduction <add>, %202, %cst_91 [1] : vector<8x32xf32> to vector<8xf32>
    %204 = vector.shape_cast %203 : vector<8xf32> to vector<8x1xf32>
    %205 = arith.addf %204, %184 : vector<8x1xf32>
    %cst_92 = arith.constant 0.000000e+00 : f32
    %206 = vector.broadcast %cst_92 : f32 to vector<8x1xf32>
    %207 = arith.subf %206, %205 : vector<8x1xf32>
    %208 = arith.mulf %192, %18 : vector<8x32xf32>
    %cst_93 = arith.constant dense<0.000000e+00> : vector<8xf32>
    %209 = vector.multi_reduction <add>, %208, %cst_93 [1] : vector<8x32xf32> to vector<8xf32>
    %210 = vector.shape_cast %209 : vector<8xf32> to vector<8x1xf32>
    %211 = arith.addf %210, %201 : vector<8x1xf32>
    %cst_94 = arith.constant 0.000000e+00 : f32
    %212 = vector.broadcast %cst_94 : f32 to vector<8x1xf32>
    %213 = arith.subf %212, %211 : vector<8x1xf32>
    %214 = arith.mulf %192, %27 : vector<8x32xf32>
    %cst_95 = arith.constant dense<0.000000e+00> : vector<8xf32>
    %215 = vector.multi_reduction <add>, %214, %cst_95 [1] : vector<8x32xf32> to vector<8xf32>
    %216 = vector.shape_cast %215 : vector<8xf32> to vector<8x1xf32>
    %217 = arith.addf %216, %193 : vector<8x1xf32>
    %cst_96 = arith.constant 0.000000e+00 : f32
    %218 = vector.broadcast %cst_96 : f32 to vector<8x1xf32>
    %219 = arith.subf %218, %217 : vector<8x1xf32>
    %c0_97 = arith.constant 0 : index
    %c4 = arith.constant 4 : index
    %220 = vector.load %arg4[%c0_97, %c4] : memref<8x5xi32, #tpu.memory_space<vmem>>, vector<8x1xi32>
    %221 = vector.broadcast %220 : vector<8x1xi32> to vector<8x128xi32>
    %222 = arith.cmpi eq, %221, %0 : vector<8x128xi32>
    %223 = arith.extui %222 : vector<8x128xi1> to vector<8x128xi32>
    %224 = arith.sitofp %223 : vector<8x128xi32> to vector<8x128xf32>
    %c0_98 = arith.constant 0 : index
    %c0_99 = arith.constant 0 : index
    %225 = vector.load %arg7[%c0_98, %c0_99] : memref<128x128xf32, #tpu.memory_space<vmem>>, vector<128x128xf32>
    %cst_100 = arith.constant dense<0.000000e+00> : vector<8x128xf32>
    %226 = tpu.matmul %224, %225, %cst_100 {dimension_numbers = #tpu.dot_dimension_numbers<[1], [0], [0], [1], [0, 0, 1, 1], [], []>, precision = #tpu.contract_precision<fp32>} : vector<8x128xf32>, vector<128x128xf32>, vector<8x128xf32> -> vector<8x128xf32>
    %227 = vector.extract_strided_slice %226 {offsets = [0, 0], sizes = [8, 32], strides = [1, 1]} : vector<8x128xf32> to vector<8x32xf32>
    %228 = vector.extract_strided_slice %226 {offsets = [0, 32], sizes = [8, 1], strides = [1, 1]} : vector<8x128xf32> to vector<8x1xf32>
    %c0_101 = arith.constant 0 : index
    %c4_102 = arith.constant 4 : index
    %229 = vector.load %arg6[%c0_101, %c4_102] : memref<8x5xi32, #tpu.memory_space<vmem>>, vector<8x1xi32>
    %230 = vector.broadcast %229 : vector<8x1xi32> to vector<8x128xi32>
    %231 = arith.cmpi eq, %230, %1 : vector<8x128xi32>
    %232 = arith.extui %231 : vector<8x128xi1> to vector<8x128xi32>
    %233 = arith.sitofp %232 : vector<8x128xi32> to vector<8x128xf32>
    %c0_103 = arith.constant 0 : index
    %c0_104 = arith.constant 0 : index
    %234 = vector.load %arg8[%c0_103, %c0_104] : memref<128x128xf32, #tpu.memory_space<vmem>>, vector<128x128xf32>
    %cst_105 = arith.constant dense<0.000000e+00> : vector<8x128xf32>
    %235 = tpu.matmul %233, %234, %cst_105 {dimension_numbers = #tpu.dot_dimension_numbers<[1], [0], [0], [1], [0, 0, 1, 1], [], []>, precision = #tpu.contract_precision<fp32>} : vector<8x128xf32>, vector<128x128xf32>, vector<8x128xf32> -> vector<8x128xf32>
    %236 = vector.extract_strided_slice %235 {offsets = [0, 0], sizes = [8, 32], strides = [1, 1]} : vector<8x128xf32> to vector<8x32xf32>
    %237 = vector.extract_strided_slice %235 {offsets = [0, 32], sizes = [8, 1], strides = [1, 1]} : vector<8x128xf32> to vector<8x1xf32>
    %c0_106 = arith.constant 0 : index
    %c4_107 = arith.constant 4 : index
    %238 = vector.load %arg5[%c0_106, %c4_107] : memref<8x5xi32, #tpu.memory_space<vmem>>, vector<8x1xi32>
    %239 = vector.broadcast %238 : vector<8x1xi32> to vector<8x128xi32>
    %240 = arith.cmpi eq, %239, %1 : vector<8x128xi32>
    %241 = arith.extui %240 : vector<8x128xi1> to vector<8x128xi32>
    %242 = arith.sitofp %241 : vector<8x128xi32> to vector<8x128xf32>
    %c0_108 = arith.constant 0 : index
    %c0_109 = arith.constant 0 : index
    %243 = vector.load %arg8[%c0_108, %c0_109] : memref<128x128xf32, #tpu.memory_space<vmem>>, vector<128x128xf32>
    %cst_110 = arith.constant dense<0.000000e+00> : vector<8x128xf32>
    %244 = tpu.matmul %242, %243, %cst_110 {dimension_numbers = #tpu.dot_dimension_numbers<[1], [0], [0], [1], [0, 0, 1, 1], [], []>, precision = #tpu.contract_precision<fp32>} : vector<8x128xf32>, vector<128x128xf32>, vector<8x128xf32> -> vector<8x128xf32>
    %245 = vector.extract_strided_slice %244 {offsets = [0, 32], sizes = [8, 1], strides = [1, 1]} : vector<8x128xf32> to vector<8x1xf32>
    %246 = arith.mulf %227, %9 : vector<8x32xf32>
    %cst_111 = arith.constant dense<0.000000e+00> : vector<8xf32>
    %247 = vector.multi_reduction <add>, %246, %cst_111 [1] : vector<8x32xf32> to vector<8xf32>
    %248 = vector.shape_cast %247 : vector<8xf32> to vector<8x1xf32>
    %249 = arith.addf %248, %228 : vector<8x1xf32>
    %cst_112 = arith.constant 0.000000e+00 : f32
    %250 = vector.broadcast %cst_112 : f32 to vector<8x1xf32>
    %251 = arith.subf %250, %249 : vector<8x1xf32>
    %252 = arith.mulf %236, %18 : vector<8x32xf32>
    %cst_113 = arith.constant dense<0.000000e+00> : vector<8xf32>
    %253 = vector.multi_reduction <add>, %252, %cst_113 [1] : vector<8x32xf32> to vector<8xf32>
    %254 = vector.shape_cast %253 : vector<8xf32> to vector<8x1xf32>
    %255 = arith.addf %254, %245 : vector<8x1xf32>
    %cst_114 = arith.constant 0.000000e+00 : f32
    %256 = vector.broadcast %cst_114 : f32 to vector<8x1xf32>
    %257 = arith.subf %256, %255 : vector<8x1xf32>
    %258 = arith.mulf %236, %27 : vector<8x32xf32>
    %cst_115 = arith.constant dense<0.000000e+00> : vector<8xf32>
    %259 = vector.multi_reduction <add>, %258, %cst_115 [1] : vector<8x32xf32> to vector<8xf32>
    %260 = vector.shape_cast %259 : vector<8xf32> to vector<8x1xf32>
    %261 = arith.addf %260, %237 : vector<8x1xf32>
    %cst_116 = arith.constant 0.000000e+00 : f32
    %262 = vector.broadcast %cst_116 : f32 to vector<8x1xf32>
    %263 = arith.subf %262, %261 : vector<8x1xf32>
    %264 = tpu.concatenate %33, %38, %43, %75, %81, %87, %119, %125, %131, %163, %169, %175, %207, %213, %219, %251 in 1 : vector<8x1xf32>, vector<8x1xf32>, vector<8x1xf32>, vector<8x1xf32>, vector<8x1xf32>, vector<8x1xf32>, vector<8x1xf32>, vector<8x1xf32>, vector<8x1xf32>, vector<8x1xf32>, vector<8x1xf32>, vector<8x1xf32>, vector<8x1xf32>, vector<8x1xf32>, vector<8x1xf32>, vector<8x1xf32> -> vector<8x16xf32>
    %265 = tpu.concatenate %257, %263 in 1 : vector<8x1xf32>, vector<8x1xf32> -> vector<8x2xf32>
    %266 = tpu.concatenate %264, %265 in 1 : vector<8x16xf32>, vector<8x2xf32> -> vector<8x18xf32>
    %cst_117 = arith.constant 0.000000e+00 : f32
    %267 = vector.broadcast %cst_117 : f32 to vector<8x18xf32>
    %268 = arith.minimumf %266, %267 : vector<8x18xf32>
    %269 = math.absf %266 : vector<8x18xf32>
    %cst_118 = arith.constant 0.000000e+00 : f32
    %270 = vector.broadcast %cst_118 : f32 to vector<8x18xf32>
    %271 = arith.subf %270, %269 : vector<8x18xf32>
    %272 = math.exp %271 : vector<8x18xf32>
    %273 = math.log1p %272 : vector<8x18xf32>
    %274 = arith.subf %268, %273 : vector<8x18xf32>
    %cst_119 = arith.constant dense<0.000000e+00> : vector<8xf32>
    %275 = vector.multi_reduction <add>, %274, %cst_119 [1] : vector<8x18xf32> to vector<8xf32>
    %276 = vector.shape_cast %275 : vector<8xf32> to vector<8x1xf32>
    %c8_i32 = arith.constant 8 : i32
    %277 = arith.muli %arg0, %c8_i32 : i32
    %278 = tpu.iota {dimensions = array<i32: 0>} : vector<8x1xi32>
    %279 = vector.broadcast %277 : i32 to vector<8x1xi32>
    %280 = arith.addi %279, %278 : vector<8x1xi32>
    %c8_i32_120 = arith.constant 8 : i32
    %281 = vector.broadcast %c8_i32_120 : i32 to vector<8x1xi32>
    %282 = arith.cmpi slt, %280, %281 : vector<8x1xi32>
    %cst_121 = arith.constant 0.000000e+00 : f32
    %283 = vector.broadcast %cst_121 : f32 to vector<8x1xf32>
    %284 = arith.select %282, %276, %283 : vector<8x1xi1>, vector<8x1xf32>
    %c0_122 = arith.constant 0 : index
    %c0_123 = arith.constant 0 : index
    %285 = vector.load %arg9[%c0_122, %c0_123] : memref<8x1xf32, #tpu.memory_space<vmem>>, vector<8x1xf32>
    tpu.vector_store %arg9[%c0_122, %c0_123], %284 {strides = array<i32>} : memref<8x1xf32, #tpu.memory_space<vmem>>, vector<8x1xf32>,
    return
  }
  func.func @transform_0(%arg0: i32) -> (i32, i32) {
    %c0_i32 = arith.constant 0 : i32
    %c0_i32_0 = arith.constant 0 : i32
    return %arg0, %c0_i32 : i32, i32
  }
  func.func @transform_1(%arg0: i32) -> (i32, i32) {
    %c0_i32 = arith.constant 0 : i32
    %c0_i32_0 = arith.constant 0 : i32
    return %arg0, %c0_i32 : i32, i32
  }
  func.func @transform_2(%arg0: i32) -> (i32, i32) {
    %c0_i32 = arith.constant 0 : i32
    %c0_i32_0 = arith.constant 0 : i32
    return %arg0, %c0_i32 : i32, i32
  }
  func.func @transform_3(%arg0: i32) -> (i32, i32) {
    %c0_i32 = arith.constant 0 : i32
    %c0_i32_0 = arith.constant 0 : i32
    return %arg0, %c0_i32 : i32, i32
  }
  func.func @transform_4(%arg0: i32) -> (i32, i32) {
    %c0_i32 = arith.constant 0 : i32
    %c0_i32_0 = arith.constant 0 : i32
    return %arg0, %c0_i32 : i32, i32
  }
  func.func @transform_5(%arg0: i32) -> (i32, i32) {
    %c0_i32 = arith.constant 0 : i32
    %c0_i32_0 = arith.constant 0 : i32
    return %arg0, %c0_i32 : i32, i32
  }
  func.func @transform_6(%arg0: i32) -> (i32, i32) {
    %c0_i32 = arith.constant 0 : i32
    %c0_i32_0 = arith.constant 0 : i32
    %c0_i32_1 = arith.constant 0 : i32
    return %c0_i32, %c0_i32_0 : i32, i32
  }
  func.func @transform_7(%arg0: i32) -> (i32, i32) {
    %c0_i32 = arith.constant 0 : i32
    %c0_i32_0 = arith.constant 0 : i32
    %c0_i32_1 = arith.constant 0 : i32
    return %c0_i32, %c0_i32_0 : i32, i32
  }
  func.func @transform_8(%arg0: i32) -> (i32, i32) {
    %c0_i32 = arith.constant 0 : i32
    %c0_i32_0 = arith.constant 0 : i32
    return %arg0, %c0_i32 : i32, i32
  }
}

</mosaic_0001>

<bundles_post_ra>
// kernel: tpu_custom_call.1
= control target key start
LH: loop header
LB: loop body
LE: loop exit
PB: predicated region body
PF: predicated region fallthrough
CT: control target
= control target key end

     0   :  { %13 = vsyncpa [#allocation3], 0  ;;  %s23942_s0 = inlined_call_operand.vmem [shape: s32[8,1], index: 0, kind: input, shape index: {}]   ;;  %s23943_s1 = inlined_call_operand.vmem [shape: s32[8,1], index: 1, kind: input, shape index: {}]   ;;  %s23944_s2 = inlined_call_operand.vmem [shape: s32[8,1], index: 2, kind: input, shape index: {}]   ;;  %s23945_s3 = inlined_call_operand.vmem [shape: s32[8,5], index: 3, kind: input, shape index: {}]   ;;  %s23946_s4 = inlined_call_operand.vmem [shape: s32[8,5], index: 4, kind: input, shape index: {}]   ;;  %s23947_s5 = inlined_call_operand.vmem [shape: s32[8,5], index: 5, kind: input, shape index: {}]   ;;  %s23948_s6 = inlined_call_operand.hbm [shape: f32[128,128], index: 6, kind: input, shape index: {}]   ;;  %s23949_s7 = inlined_call_operand.hbm [shape: f32[128,128], index: 7, kind: input, shape index: {}]   ;;  %s23950_s8 = inlined_call_operand.vmem [shape: f32[8,1], index: 8, kind: output, shape index: {}]  }
   0x1   :  { %14 = vsyncpa [#allocation5], 0  ;;  %s20502_s27 = smov [#allocation2]   ;;  %s20454_s9 = scalar_lea.hbm %s23948_s6, 2048 }
   0x2   :  { %s32_s28 = sshll.u32 %s20502_s27, 4  ;;  %p20455_p0 = scmp.ne.s32.totalorder %s23948_s6, %s20454_s9  ;;  %s33_s28 = int_to_ptr.vmem [resolvable:$true] %s32_s28 }
   0x3   :  { %p20458_p1 = scmp.lt.u32.totalorder %s20454_s9, %s23948_s6 }
   0x5   :  { %p20460_p2 = pnand %p20458_p1, %p20455_p0 }
   0x7   :  { %20463 = shalt.err (!%p20460_p2)
}
   0x8   :  { %s20464_s14 = scalar_lea.vmem %s33_s28, 2048  ;;  %p20469_p4 = scmp.lt.s32.totalorder %s33_s28, %s33_s28 }
   0x9   :  { %p20465_p3 = scmp.ne.s32.totalorder %s33_s28, %s20464_s14  ;;  %p20470_p5 = scmp.lt.s32.totalorder %s20464_s14, %s20464_s14 }
   0xb   :  { %p20471_p6 = por %p20470_p5, %p20469_p4 }
   0xd   :  { %p20472_p7 = pnand %p20471_p6, %p20465_p3 }
   0xf   :  { %20475 = shalt.err (!%p20472_p7)
}
  0x10   :  { %s20503_s15 = smov 128   ;;  %s20504_s16 = smov 8  }
  0x11   :  { %38 = dma.hbm_to_vmem [thread:$0]  %s23948_s6, 2048, %s33_s28, [#allocation3], %s20503_s15, %s20503_s15, %s20504_s16  }
  0x12   :  { %s20505_s19 = smov [#allocation4]   ;;  %s20476_s23 = scalar_lea.hbm %s23949_s7, 2048 }
  0x13   :  { %s44_s20 = sshll.u32 %s20505_s19, 4  ;;  %p20477_p8 = scmp.ne.s32.totalorder %s23949_s7, %s20476_s23  ;;  %s45_s20 = int_to_ptr.vmem [resolvable:$true] %s44_s20 }
  0x14   :  { %p20480_p9 = scmp.lt.u32.totalorder %s20476_s23, %s23949_s7 }
  0x16   :  { %p20482_p10 = pnand %p20480_p9, %p20477_p8 }
  0x18   :  { %20485 = shalt.err (!%p20482_p10)
}
  0x19   :  { %s20486_s29 = scalar_lea.vmem %s45_s20, 2048  ;;  %p20491_p12 = scmp.lt.s32.totalorder %s45_s20, %s45_s20 }
  0x1a   :  { %p20487_p11 = scmp.ne.s32.totalorder %s45_s20, %s20486_s29  ;;  %p20492_p13 = scmp.lt.s32.totalorder %s20486_s29, %s20486_s29 }
  0x1c   :  { %p20493_p0 = por %p20492_p13, %p20491_p12 }
  0x1e   :  { %p20494_p1 = pnand %p20493_p0, %p20487_p11 }
  0x20   :  { %20497 = shalt.err (!%p20494_p1)
}
  0x21   :  { %50 = dma.hbm_to_vmem [thread:$0]  %s23949_s7, 2048, %s45_s20, [#allocation5], %s20503_s15, %s20503_s15, %s20504_s16  }
  0x22   :  { %20498 = dma.done.wait [#allocation3], 2048  }
  0x23   :  { %20499 = vsyncadd [#allocation3], 4294965248 }
  0x24   :  { %20500 = dma.done.wait [#allocation5], 2048  }
  0x25   :  { %20501 = vsyncadd [#allocation5], 4294965248  ;;  %v20506_v0 = vmov 0   ;;  %v23981_v1 = vmov 0.0|0.0   ;;  %v59_v2 = vld [vmem:[%s23942_s0] sm:$0xff]  ;;  %v20609_v4 = vld [vmem:[#allocation2] sm:$0xff] }
  0x26   :  { %20434 = vset.pattern.permute.xlu0 %v20506_v0  ;;  %17682 = vmatprep.subr.bf16.mxu0 %v23981_v1  ;;  %v723_v3 = vld [vmem:[%s23943_s1] sm:$0xff]  ;;  %v20611_v5 = vld [vmem:[#allocation2 + $0x8] sm:$0xff]  ;;  %v83_v7 = vand.u32 4294901760, %v20609_v4  ;;  %v20617_v9 = vld [vmem:[#allocation2 + $0x18] sm:$0xff]  ;;  %vm20508_vm0 = vmmov 0   ;;  %s20517_s27 = smov 98  }
  0x27   :  { %17826 = vmatprep.subr.bf16.mxu1 %v23981_v1  ;;  %20435 = vset.pattern.permute.xlu1 %v20506_v0  ;;  %v20613_v6 = vld [vmem:[#allocation2 + $0x10] sm:$0xff]  ;;  %v86_v8 = vand.u32 4294901760, %v20611_v5  ;;  %v20620_v11 = vld [vmem:[#allocation4] sm:$0xff]  ;;  %v20622_v12 = vld [vmem:[#allocation4 + $0x8] sm:$0xff]  ;;  %v92_v13 = vand.u32 4294901760, %v20617_v9  ;;  %s20518_s29 = smov 99  }
  0x28   :  { %61 = vperm.xlu0 %20434, %v59_v2   ;;  %v89_v10 = vand.u32 4294901760, %v20613_v6  ;;  %v747_v14 = vand.u32 4294901760, %v20620_v11  ;;  %v750_v15 = vand.u32 4294901760, %v20622_v12  ;;  %v20627_v16 = vld [vmem:[#allocation2 + $0x20] sm:$0xff]  ;;  %v20629_v17 = vld [vmem:[#allocation2 + $0x28] sm:$0xff]  ;;  %v20631_v18 = vld [vmem:[#allocation4 + $0x10] sm:$0xff] }
  0x29   :  { %v2702_v19 = vld [vmem:[%s23947_s5] sm:$0xff]  ;;  %v20640_v20 = vpack.c.bf16 %v86_v8, %v83_v7  ;;  %v95_v21 = vand.u32 4294901760, %v20627_v16  ;;  %v98_v22 = vand.u32 4294901760, %v20629_v17  ;;  %v20644_v23 = vld [vmem:[#allocation4 + $0x18] sm:$0xff]  ;;  %v753_v24 = vand.u32 4294901760, %v20631_v18  ;;  %v20665_v31 = vld [vmem:[#allocation4 + $0x20] sm:$0xff] }
  0x2a   :  { %v20647_v25 = vld [vmem:[#allocation2 + $0x30] sm:$0xff]  ;;  %v20649_v26 = vld [vmem:[#allocation2 + $0x38] sm:$0xff]  ;;  %v20655_v27 = vpack.c.bf16 %v92_v13, %v89_v10  ;;  %v20661_v28 = vpack.c.bf16 %v750_v15, %v747_v14  ;;  %v23963_v29 = vand.u32 4294901760, %v20644_v23  ;;  %v20667_v32 = vld [vmem:[#allocation4 + $0x28] sm:$0xff]  ;;  %v23956_v36 = vand.u32 4294901760, %v20665_v31  ;;  %s20519_s6 = smov 100  }
  0x2b   :  { %v23962_v30 = vand.u32 4294901760, %v20647_v25  ;;  %v20669_v33 = vld [vmem:[#allocation2 + $0x40] sm:$0xff]  ;;  %17684 = vmatpush3.bf16.msra.mxu0 %v20640_v20  ;;  %v20676_v34 = vpack.c.bf16 %v98_v22, %v95_v21  ;;  %v23957_v35 = vand.u32 4294901760, %v20649_v26  ;;  %v23955_v37 = vand.u32 4294901760, %v20667_v32  ;;  %v20681_v38 = vld [vmem:[#allocation2 + $0x48] sm:$0xff]  ;;  %v20683_v39 = vld [vmem:[#allocation4 + $0x30] sm:$0xff] }
  0x2c   :  { %725 = vperm.xlu0 %20434, %v723_v3   ;;  %v20685_v40 = vld [vmem:[#allocation4 + $0x38] sm:$0xff]  ;;  %17685 = vmatprep.subr.bf16.mxu0 %v23981_v1  ;;  %v20693_v41 = vpack.c.bf16 %v23963_v29, %v753_v24  ;;  %v23954_v42 = vand.u32 4294901760, %v20669_v33  ;;  %v23951_v43 = vand.u32 4294901760, %v20681_v38  ;;  %v23953_v44 = vand.u32 4294901760, %v20683_v39  ;;  %v20698_v45 = vld [vmem:[#allocation2 + $0x50] sm:$0xff]  ;;  %v20702_v47 = vld [vmem:[#allocation4 + $0x40] sm:$0xff] }
  0x2d   :  { %17828 = vmatpush3.bf16.msra.mxu1 %v20661_v28  ;;  %v20700_v46 = vld [vmem:[#allocation2 + $0x58] sm:$0xff]  ;;  %v20709_v48 = vpack.c.bf16 %v23957_v35, %v23962_v30  ;;  %v20715_v49 = vpack.c.bf16 %v23955_v37, %v23956_v36  ;;  %v23952_v50 = vand.u32 4294901760, %v20685_v40  ;;  %v23959_v51 = vand.u32 4294901760, %v20698_v45  ;;  %v20719_v52 = vld [vmem:[#allocation4 + $0x48] sm:$0xff]  ;;  %v20721_v53 = vld [vmem:[#allocation2 + $0x60] sm:$0xff]  ;;  %s20520_s28 = smov 101  }
  0x2e   :  { %24133 = vst [vmem:[#allocation8_spill] sm:$0xff] %v20693_v41  ;;  %17829 = vmatprep.subr.bf16.mxu1 %v23981_v1  ;;  %v20723_v54 = vld [vmem:[#allocation2 + $0x68] sm:$0xff]  ;;  %v20729_v55 = vpack.c.bf16 %v23951_v43, %v23954_v42  ;;  %v23958_v56 = vand.u32 4294901760, %v20700_v46  ;;  %v23961_v57 = vand.u32 4294901760, %v20702_v47  ;;  %v23960_v58 = vand.u32 4294901760, %v20719_v52  ;;  %v20734_v59 = vld [vmem:[#allocation4 + $0x50] sm:$0xff] }
  0x2f   :  { %24134 = vst [vmem:[#allocation9_spill] sm:$0xff] %v20709_v48  ;;  %24135 = vst [vmem:[#allocation10_spill] sm:$0xff] %v20715_v49  ;;  %v20736_v60 = vld [vmem:[#allocation4 + $0x58] sm:$0xff]  ;;  %v20738_v61 = vld [vmem:[#allocation2 + $0x70] sm:$0xff]  ;;  %17687 = vmatpush3.bf16.msra.mxu0 %v20655_v27  ;;  %v20745_v62 = vpack.c.bf16 %v23952_v50, %v23953_v44  ;;  %v23965_v63 = vand.u32 4294901760, %v20721_v53  ;;  %v23964_v0 = vand.u32 4294901760, %v20723_v54  ;;  %v20795_v29 = vsub.f32 %v20609_v4, %v83_v7 }
  0x30   :  { %2704 = vperm.xlu0 %20434, %v2702_v19   ;;  %24136 = vst [vmem:[#allocation11_spill] sm:$0xff] %v20729_v55  ;;  %v23978_v2 = vand.u32 4294901760, %v20734_v59  ;;  %v20750_v3 = vld [vmem:[#allocation2 + $0x78] sm:$0xff]  ;;  %v20752_v19 = vld [vmem:[#allocation4 + $0x60] sm:$0xff]  ;;  %v20754_v43 = vld [vmem:[#allocation4 + $0x68] sm:$0xff]  ;;  %17688 = vmatprep.subr.bf16.mxu0 %v23981_v1  ;;  %v20762_v50 = vpack.c.bf16 %v23958_v56, %v23959_v51  ;;  %v20768_v44 = vpack.c.bf16 %v23960_v58, %v23961_v57  ;;  %v23966_v42 = vand.u32 4294901760, %v20736_v60 }
  0x31   :  { %24137 = vst [vmem:[#allocation12_spill] sm:$0xff] %v20745_v62  ;;  %17831 = vmatpush3.bf16.msra.mxu1 %v20693_v41  ;;  %v23970_v37 = vand.u32 4294901760, %v20738_v61  ;;  %v20772_v36 = vld [vmem:[#allocation4 + $0x70] sm:$0xff]  ;;  %v20774_v35 = vld [vmem:[#allocation4 + $0x78] sm:$0xff]  ;;  %v20781_v56 = vpack.c.bf16 %v23964_v0, %v23965_v63  ;;  %v23967_v51 = vand.u32 4294901760, %v20750_v3  ;;  %v23969_v58 = vand.u32 4294901760, %v20752_v19 }
  0x32   :  { %24138 = vst [vmem:[#allocation13_spill] sm:$0xff] %v20762_v50  ;;  %24139 = vst [vmem:[#allocation14_spill] sm:$0xff] %v20768_v44  ;;  %17832 = vmatprep.subr.bf16.mxu1 %v23981_v1  ;;  %v23968_v57 = vand.u32 4294901760, %v20754_v43  ;;  %v20790_v30 = vpack.c.bf16 %v23966_v42, %v23978_v2  ;;  %v20800_v0 = vsub.f32 %v20611_v5, %v86_v8  ;;  %v23971_v4 = vmov 0.0   ;;  %s20521_s30 = smov 102   ;;  %s20522_s9 = smov 103  }
  0x33   :  { %24140 = vst [vmem:[#allocation15_spill] sm:$0xff] %v20781_v56  ;;  %24142 = vst [vmem:[#allocation17_spill] sm:$0xff] %v20795_v29  ;;  %17690 = vmatpush3.bf16.msra.mxu0 %v20676_v34  ;;  %v20807_v63 = vpack.c.bf16 %v23967_v51, %v23970_v37  ;;  %13934 = vmatprep.mubr.msk.f32.mxu0 %vm20508_vm0, %v23971_v4  ;;  %v23976_v5 = vand.u32 4294901760, %v20772_v36  ;;  %v23973_v7 = vand.u32 4294901760, %v20774_v35  ;;  %v23975_v8 = vand.u32 4294901760, %v20795_v29  ;;  %s20523_s10 = smov 104  }
  0x34   :  { %24141 = vst [vmem:[#allocation16_spill] sm:$0xff] %v20790_v30  ;;  %24143 = vst [vmem:[#allocation18_spill] sm:$0xff] %v20800_v0  ;;  %v20813_v42 = vpack.c.bf16 %v23968_v57, %v23969_v58  ;;  %17691 = vmatprep.subr.bf16.mxu0 %v23981_v1  ;;  %v23974_v51 = vand.u32 4294901760, %v20800_v0  ;;  %v20826_v57 = vsub.f32 %v20613_v6, %v89_v10  ;;  %14144 = vmatprep.mubr.msk.f32.mxu1 %vm20508_vm0, %v23971_v4  ;;  %s20524_s11 = smov 105   ;;  %s20525_s0 = smov 106  }
  0x35   :  { %24144 = vst [vmem:[#allocation19_spill] sm:$0xff] %v20807_v63  ;;  %17834 = vmatpush3.bf16.msra.mxu1 %v20715_v49  ;;  %v20831_v58 = vsub.f32 %v20617_v9, %v92_v13  ;;  %v20838_v37 = vpack.c.bf16 %v23973_v7, %v23976_v5  ;;  %v20845_v6 = vsub.f32 %v20620_v11, %v747_v14  ;;  %s20526_s1 = smov 107   ;;  %s20527_s7 = smov 108  }
  0x36   :  { %24145 = vst [vmem:[#allocation20_spill] sm:$0xff] %v20813_v42  ;;  %17835 = vmatprep.subr.bf16.mxu1 %v23981_v1  ;;  %v20850_v9 = vsub.f32 %v20622_v12, %v750_v15  ;;  %v177_v10 = vsub.f32 %v20795_v29, %v23975_v8  ;;  %v184_v13 = vsub.f32 %v20800_v0, %v23974_v51  ;;  %v23977_v4 = vand.u32 4294901760, %v20826_v57  ;;  %s20528_s12 = smov 109   ;;  %s20529_s13 = smov 110  }
  0x37   :  { %24146 = vst [vmem:[#allocation21_spill] sm:$0xff] %v20838_v37  ;;  %v23979_v7 = vand.u32 4294901760, %v20831_v58  ;;  %17693 = vmatpush3.bf16.msra.mxu0 %v20709_v48  ;;  %v23980_v11 = vand.u32 4294901760, %v20845_v6  ;;  %v20866_v12 = vsub.f32 %v20627_v16, %v95_v21  ;;  %v20871_v15 = vsub.f32 %v20629_v17, %v98_v22  ;;  %s20530_s14 = smov 111  }
  0x38   :  { %v23983_v14 = vand.u32 4294901760, %v20850_v9  ;;  %17694 = vmatprep.subr.bf16.mxu0 %v23981_v1  ;;  %v178_v51 = vand.u32 4294901760, %v177_v10  ;;  %v185_v8 = vand.u32 4294901760, %v184_v13  ;;  %v191_v5 = vsub.f32 %v20826_v57, %v23977_v4 }
  0x39   :  { %24147 = vst [vmem:[#allocation22_spill] sm:$0xff] %v20871_v15  ;;  %17837 = vmatpush3.bf16.msra.mxu1 %v20745_v62  ;;  %v198_v16 = vsub.f32 %v20831_v58, %v23979_v7  ;;  %v841_v17 = vsub.f32 %v20845_v6, %v23980_v11  ;;  %v23985_v22 = vand.u32 4294901760, %v20866_v12  ;;  %v23984_v10 = vand.u32 4294901760, %v20871_v15 }
  0x3a   :  { %17838 = vmatprep.subr.bf16.mxu1 %v23981_v1  ;;  %v848_v21 = vsub.f32 %v20850_v9, %v23983_v14  ;;  %v20890_v13 = vpack.c.bf16 %v185_v8, %v178_v51  ;;  %v192_v4 = vand.u32 4294901760, %v191_v5  ;;  %v20895_v7 = vsub.f32 %v20631_v18, %v753_v24 }
  0x3b   :  { %v199_v2 = vand.u32 4294901760, %v198_v16  ;;  %17696 = vmatpush3.bf16.msra.mxu0 %v20729_v55  ;;  %v842_v11 = vand.u32 4294901760, %v841_v17  ;;  %v205_v14 = vsub.f32 %v20866_v12, %v23985_v22  ;;  %v212_v51 = vsub.f32 %v20871_v15, %v23984_v10 }
  0x3c   :  { %v849_v1 = vand.u32 4294901760, %v848_v21  ;;  %v24148_v8 = vmov 0.0|0.0   ;;  %v23988_v18 = vand.u32 4294901760, %v20895_v7  ;;  %v24149_v24 = vand.u32 4294901760, %v20644_v23 }
  0x3d   :  { %17697 = vmatprep.subr.bf16.mxu0 %v24148_v8  ;;  %17840 = vmatpush3.bf16.msra.mxu1 %v20768_v44  ;;  %v20906_v5 = vpack.c.bf16 %v199_v2, %v192_v4  ;;  %v24150_v17 = vand.u32 4294901760, %v20647_v25  ;;  %v206_v22 = vand.u32 4294901760, %v205_v14  ;;  %v213_v44 = vand.u32 4294901760, %v212_v51 }
  0x3e   :  { %v20912_v16 = vsub.f32 %v20644_v23, %v24149_v24  ;;  %17841 = vmatprep.subr.bf16.mxu1 %v24148_v8  ;;  %v20920_v10 = vpack.c.bf16 %v849_v1, %v842_v11  ;;  %v24151_v2 = vand.u32 4294901760, %v20649_v26  ;;  %v855_v23 = vsub.f32 %v20895_v7, %v23988_v18 }
  0x3f   :  { %v20917_v21 = vsub.f32 %v20647_v25, %v24150_v17  ;;  %v24152_v17 = vand.u32 4294901760, %v20665_v31  ;;  %17699 = vmatpush3.bf16.msra.mxu0 %v20762_v50  ;;  %v20938_v11 = vpack.c.bf16 %v213_v44, %v206_v22  ;;  %v24153_v14 = vand.u32 4294901760, %v20667_v32 }
  0x40   :  { %v20925_v4 = vsub.f32 %v20649_v26, %v24151_v2  ;;  %v23989_v24 = vand.u32 4294901760, %v20912_v16  ;;  %v24154_v2 = vand.u32 4294901760, %v20669_v33  ;;  %17700 = vmatprep.subr.bf16.mxu0 %v24148_v8  ;;  %v24156_v50 = vand.u32 4294901760, %v20683_v39 }
  0x41   :  { %v23992_v25 = vand.u32 4294901760, %v20917_v21  ;;  %v20935_v1 = vsub.f32 %v20665_v31, %v24152_v17  ;;  %v20944_v51 = vsub.f32 %v20667_v32, %v24153_v14  ;;  %17843 = vmatpush3.bf16.msra.mxu1 %v20790_v30  ;;  %v856_v31 = vand.u32 4294901760, %v855_v23 }
  0x42   :  { %v23997_v26 = vand.u32 4294901760, %v20925_v4  ;;  %v20949_v18 = vsub.f32 %v20669_v33, %v24154_v2  ;;  %v862_v44 = vsub.f32 %v20912_v16, %v23989_v24  ;;  %17844 = vmatprep.subr.bf16.mxu1 %v24148_v8  ;;  %v24155_v14 = vand.u32 4294901760, %v20681_v38 }
  0x43   :  { %v219_v22 = vsub.f32 %v20917_v21, %v23992_v25  ;;  %v23998_v32 = vand.u32 4294901760, %v20935_v1  ;;  %v23999_v17 = vand.u32 4294901760, %v20944_v51  ;;  %v20977_v62 = vsub.f32 %v20683_v39, %v24156_v50  ;;  %17702 = vmatpush3.bf16.msra.mxu0 %v20781_v56 }
  0x44   :  { %v226_v33 = vsub.f32 %v20925_v4, %v23997_v26  ;;  %v20969_v2 = vsub.f32 %v20681_v38, %v24155_v14  ;;  %v863_v24 = vand.u32 4294901760, %v862_v44  ;;  %v24157_v38 = vand.u32 4294901760, %v20949_v18  ;;  %17703 = vmatprep.subr.bf16.mxu0 %v24148_v8 }
  0x45   :  { %v220_v30 = vand.u32 4294901760, %v219_v22  ;;  %v869_v25 = vsub.f32 %v20935_v1, %v23998_v32  ;;  %v876_v23 = vsub.f32 %v20944_v51, %v23999_v17  ;;  %17846 = vmatpush3.bf16.msra.mxu1 %v20813_v42  ;;  %v24004_v50 = vand.u32 4294901760, %v20977_v62 }
  0x46   :  { %v227_v26 = vand.u32 4294901760, %v226_v33  ;;  %v233_v44 = vsub.f32 %v20949_v18, %v24157_v38  ;;  %v20989_v14 = vpack.c.bf16 %v863_v24, %v856_v31  ;;  %v24158_v33 = vand.u32 4294901760, %v20685_v40  ;;  %17847 = vmatprep.subr.bf16.mxu1 %v24148_v8 }
  0x47   :  { %v870_v39 = vand.u32 4294901760, %v869_v25  ;;  %v877_v38 = vand.u32 4294901760, %v876_v23  ;;  %v24160_v56 = vand.u32 4294901760, %v20969_v2  ;;  %v883_v24 = vsub.f32 %v20977_v62, %v24004_v50  ;;  %17705 = vmatpush3.bf16.msra.mxu0 %v20807_v63 }
  0x48   :  { %v20995_v32 = vsub.f32 %v20685_v40, %v24158_v33  ;;  %v20998_v17 = vpack.c.bf16 %v227_v26, %v220_v30  ;;  %v234_v22 = vand.u32 4294901760, %v233_v44  ;;  %v24161_v31 = vand.u32 4294901760, %v20698_v45  ;;  %17706 = vmatprep.subr.bf16.mxu0 %v24148_v8 }
  0x49   :  { %v240_v42 = vsub.f32 %v20969_v2, %v24160_v56  ;;  %v24162_v30 = vand.u32 4294901760, %v20700_v46  ;;  %v21018_v23 = vpack.c.bf16 %v877_v38, %v870_v39  ;;  %v24164_v44 = vand.u32 4294901760, %v20702_v47  ;;  %17849 = vmatpush3.bf16.msra.mxu1 %v20838_v37 }
  0x4a   :  { %24159 = vst [vmem:[#allocation23_spill] sm:$0xff] %v20995_v32  ;;  %v24005_v25 = vand.u32 4294901760, %v20995_v32  ;;  %v21010_v40 = vsub.f32 %v20698_v45, %v24161_v31  ;;  %v24166_v50 = vand.u32 4294901760, %v20719_v52  ;;  %17850 = vmatprep.subr.bf16.mxu1 %v24148_v8  ;;  %v24168_v31 = vand.u32 4294901760, %v20721_v53 }
  0x4b   :  { %v21015_v26 = vsub.f32 %v20700_v46, %v24162_v30  ;;  %v241_v56 = vand.u32 4294901760, %v240_v42  ;;  %v21023_v33 = vsub.f32 %v20702_v47, %v24164_v44  ;;  %v884_v46 = vand.u32 4294901760, %v883_v24 }
  0x4c   :  { %v21028_v45 = vsub.f32 %v20719_v52, %v24166_v50  ;;  %v890_v39 = vsub.f32 %v20995_v32, %v24005_v25  ;;  %v24006_v42 = vand.u32 4294901760, %v21010_v40  ;;  %v21045_v24 = vsub.f32 %v20721_v53, %v24168_v31 }
  0x4d   :  { %24163 = vst [vmem:[#allocation24_spill] sm:$0xff] %v21015_v26  ;;  %24165 = vst [vmem:[#allocation25_spill] sm:$0xff] %v21023_v33  ;;  %v24009_v38 = vand.u32 4294901760, %v21015_v26  ;;  %v21038_v47 = vpack.c.bf16 %v241_v56, %v234_v22  ;;  %v24016_v52 = vand.u32 4294901760, %v21023_v33  ;;  %v24170_v22 = vand.u32 4294901760, %v20723_v54 }
  0x4e   :  { %24167 = vst [vmem:[#allocation26_spill] sm:$0xff] %v21028_v45  ;;  %24169 = vst [vmem:[#allocation27_spill] sm:$0xff] %v21045_v24  ;;  %v891_v30 = vand.u32 4294901760, %v890_v39  ;;  %v247_v44 = vsub.f32 %v21010_v40, %v24006_v42  ;;  %v24172_v53 = vand.u32 4294901760, %v21028_v45  ;;  %v24023_v31 = vand.u32 4294901760, %v21045_v24 }
  0x4f   :  { %v254_v25 = vsub.f32 %v21015_v26, %v24009_v38  ;;  %v21056_v56 = vsub.f32 %v20723_v54, %v24170_v22  ;;  %v897_v50 = vsub.f32 %v21023_v33, %v24016_v52  ;;  %v24173_v42 = vand.u32 4294901760, %v20734_v59 }
  0x50   :  { %v904_v39 = vsub.f32 %v21028_v45, %v24172_v53  ;;  %v21070_v38 = vpack.c.bf16 %v891_v30, %v884_v46  ;;  %v248_v63 = vand.u32 4294901760, %v247_v44  ;;  %v261_v52 = vsub.f32 %v21045_v24, %v24023_v31 }
  0x51   :  { %24171 = vst [vmem:[#allocation28_spill] sm:$0xff] %v21056_v56  ;;  %v21068_v37 = vsub.f32 %v20734_v59, %v24173_v42  ;;  %v255_v54 = vand.u32 4294901760, %v254_v25  ;;  %v24019_v22 = vand.u32 4294901760, %v21056_v56  ;;  %v898_v55 = vand.u32 4294901760, %v897_v50 }
  0x52   :  { %v905_v49 = vand.u32 4294901760, %v904_v39  ;;  %v24176_v46 = vand.u32 4294901760, %v20736_v60  ;;  %v24178_v42 = vand.u32 4294901760, %v20738_v61  ;;  %v262_v44 = vand.u32 4294901760, %v261_v52 }
  0x53   :  { %24174 = vst [vmem:[#allocation29_spill] sm:$0xff] %v21068_v37  ;;  %v24020_v53 = vand.u32 4294901760, %v21068_v37  ;;  %v21077_v48 = vpack.c.bf16 %v255_v54, %v248_v63  ;;  %v268_v59 = vsub.f32 %v21056_v56, %v24019_v22  ;;  %v24180_v39 = vand.u32 4294901760, %v20750_v3 }
  0x54   :  { %v21085_v25 = vsub.f32 %v20736_v60, %v24176_v46  ;;  %v21090_v50 = vsub.f32 %v20738_v61, %v24178_v42  ;;  %v21092_v30 = vpack.c.bf16 %v905_v49, %v898_v55  ;;  %v24182_v61 = vand.u32 4294901760, %v20752_v19 }
  0x55   :  { %24175 = vst [vmem:[#allocation30_spill] sm:$0xff] %v21077_v48  ;;  %v911_v63 = vsub.f32 %v21068_v37, %v24020_v53  ;;  %v21100_v54 = vsub.f32 %v20750_v3, %v24180_v39  ;;  %v269_v22 = vand.u32 4294901760, %v268_v59  ;;  %v24184_v42 = vand.u32 4294901760, %v20754_v43 }
  0x56   :  { %24177 = vst [vmem:[#allocation31_spill] sm:$0xff] %v21085_v25  ;;  %24179 = vst [vmem:[#allocation32_spill] sm:$0xff] %v21090_v50  ;;  %v24021_v60 = vand.u32 4294901760, %v21085_v25  ;;  %v24022_v46 = vand.u32 4294901760, %v21090_v50  ;;  %v21107_v49 = vsub.f32 %v20752_v19, %v24182_v61  ;;  %v24190_v31 = vand.u32 4294901760, %v20774_v35 }
  0x57   :  { %24181 = vst [vmem:[#allocation33_spill] sm:$0xff] %v21100_v54  ;;  %v912_v55 = vand.u32 4294901760, %v911_v63  ;;  %v24024_v52 = vand.u32 4294901760, %v21100_v54  ;;  %v21113_v53 = vsub.f32 %v20754_v43, %v24184_v42  ;;  %v21115_v3 = vpack.c.bf16 %v269_v22, %v262_v44 }
  0x58   :  { %24183 = vst [vmem:[#allocation34_spill] sm:$0xff] %v21107_v49  ;;  %v918_v59 = vsub.f32 %v21085_v25, %v24021_v60  ;;  %v275_v39 = vsub.f32 %v21090_v50, %v24022_v46  ;;  %v24029_v19 = vand.u32 4294901760, %v21107_v49  ;;  %v21130_v43 = vpack.c.bf16 %v20800_v0, %v20795_v29 }
  0x59   :  { %24185 = vst [vmem:[#allocation35_spill] sm:$0xff] %v21113_v53  ;;  %24186 = vst [vmem:[#allocation36_spill] sm:$0xff] %v21115_v3  ;;  %v282_v63 = vsub.f32 %v21100_v54, %v24024_v52  ;;  %v24188_v22 = vand.u32 4294901760, %v20772_v36  ;;  %v21143_v52 = vsub.f32 %v20774_v35, %v24190_v31  ;;  %v24192_v0 = vand.u32 4294901760, %v21113_v53 }
  0x5a   :  { %24187 = vst [vmem:[#allocation37_spill] sm:$0xff] %v21130_v43  ;;  %v919_v42 = vand.u32 4294901760, %v918_v59  ;;  %v276_v60 = vand.u32 4294901760, %v275_v39  ;;  %v925_v46 = vsub.f32 %v21107_v49, %v24029_v19  ;;  %v21158_v35 = vpack.c.bf16 %v20850_v9, %v20845_v6 }
  0x5b   :  { %v21135_v44 = vsub.f32 %v20772_v36, %v24188_v22  ;;  %24191 = vst [vmem:[#allocation39_spill] sm:$0xff] %v21143_v52  ;;  %v283_v61 = vand.u32 4294901760, %v282_v63  ;;  %v932_v29 = vsub.f32 %v21113_v53, %v24192_v0  ;;  %v21151_v36 = vpack.c.bf16 %v20831_v58, %v20826_v57 }
  0x5c   :  { %v21153_v59 = vpack.c.bf16 %v919_v42, %v912_v55  ;;  %v926_v39 = vand.u32 4294901760, %v925_v46  ;;  %v24031_v22 = vand.u32 4294901760, %v21143_v52  ;;  %v21167_v19 = vpack.c.bf16 %v20871_v15, %v20866_v12 }
  0x5d   :  { %24189 = vst [vmem:[#allocation38_spill] sm:$0xff] %v21135_v44  ;;  %v24030_v41 = vand.u32 4294901760, %v21135_v44  ;;  %24193 = vst [vmem:[#allocation40_spill] sm:$0xff] %v21151_v36  ;;  %v21160_v31 = vpack.c.bf16 %v283_v61, %v276_v60  ;;  %v933_v63 = vand.u32 4294901760, %v932_v29  ;;  %v21174_v55 = vpack.c.bf16 %v20912_v16, %v20895_v7  ;;  %v1387_v61 = vld [vmem:[%s23944_s2] sm:$0xff]  ;;  %s20531_s2 = smov 16  }
  0x5e   :  { %24195 = vst [vmem:[#allocation42_spill] sm:$0xff] %v21167_v19  ;;  %v946_v46 = vsub.f32 %v21143_v52, %v24031_v22  ;;  %1389 = vperm.xlu1 %20435, %v1387_v61   ;;  %v21187_v22 = vpack.c.bf16 %v20944_v51, %v20935_v1  ;;  %v21221_v61 = vpack.c.bf16 %v21056_v56, %v21045_v24 }
  0x5f   :  { %24194 = vst [vmem:[#allocation41_spill] sm:$0xff] %v21160_v31  ;;  %v939_v0 = vsub.f32 %v21135_v44, %v24030_v41  ;;  %v21176_v42 = vpack.c.bf16 %v933_v63, %v926_v39  ;;  %v21183_v41 = vpack.c.bf16 %v20925_v4, %v20917_v21  ;;  %v21194_v39 = vld [vmem:[%s23945_s3] sm:$0xff]  ;;  %v21198_v63 = vpack.c.bf16 %v20969_v2, %v20949_v18 }
  0x60   :  { %v947_v29 = vand.u32 4294901760, %v946_v46  ;;  %24197 = vst [vmem:[#allocation44_spill] sm:$0xff] %v21187_v22  ;;  %24198 = vst [vmem:[#allocation45_spill] sm:$0xff] %v21194_v39  ;;  %v21208_v46 = vld [vmem:[%s23946_s4] sm:$0xff] }
  0x61   :  { %v940_v60 = vand.u32 4294901760, %v939_v0  ;;  %24196 = vst [vmem:[#allocation43_spill] sm:$0xff] %v21183_v41  ;;  %24199 = vst [vmem:[#allocation46_spill] sm:$0xff] %v21198_v63  ;;  %v21203_v0 = vpack.c.bf16 %v20995_v32, %v20977_v62  ;;  %v21229_v32 = vpack.c.bf16 %v21100_v54, %v21090_v50 }
  0x62   :  { %2056 = vperm.xlu1 %20435, %v21194_v39   ;;  %24201 = vst [vmem:[#allocation48_spill] sm:$0xff] %v21208_v46  ;;  %24204 = vst [vmem:[#allocation51_spill] sm:$0xff] %v21221_v61  ;;  %v21225_v39 = vpack.c.bf16 %v21085_v25, %v21068_v37  ;;  %v24209_v25 = vmov 0.0  }
  0x63   :  { %v21189_v15 = vpack.c.bf16 %v947_v29, %v940_v60  ;;  %24200 = vst [vmem:[#allocation47_spill] sm:$0xff] %v21203_v0  ;;  %v21212_v60 = vpack.c.bf16 %v21015_v26, %v21010_v40  ;;  %v21217_v29 = vpack.c.bf16 %v21028_v45, %v21023_v33  ;;  %24206 = vst [vmem:[#allocation53_spill] sm:$0xff] %v21229_v32  ;;  %v57_v45 = vlaneseq }
  0x64   :  { %24205 = vst [vmem:[#allocation52_spill] sm:$0xff] %v21225_v39  ;;  %v21233_v26 = vpack.c.bf16 %v21113_v53, %v21107_v49 }
  0x65   :  { %24202 = vst [vmem:[#allocation49_spill] sm:$0xff] %v21212_v60  ;;  %24203 = vst [vmem:[#allocation50_spill] sm:$0xff] %v21217_v29  ;;  %v21239_v33 = vand.u32 127, %v57_v45 }
  0x66   :  { %3352 = vperm.xlu1 %20435, %v21208_v46   ;;  %24207 = vst [vmem:[#allocation54_spill] sm:$0xff] %v21233_v26  ;;  %v21237_v46 = vpack.c.bf16 %v21143_v52, %v21135_v44 }
  0x68   :  { %24208 = vst [vmem:[#allocation55_spill] sm:$0xff] %v21237_v46 }
  0xa7   :  { %v21241_v56 = vpop.permute.xlu0 %61 }
  0xa8   :  { %vm63_vm1 = vcmp.eq.s32.totalorder %v21241_v56, %v21239_v33 }
  0xa9   :  { %v11994_v54 = vsel %vm63_vm1, 1.0, %v24209_v25 }
  0xaa   :  { %v21249_v50 = vsub.f32 %v11994_v54, %v11994_v54 }
  0xab   :  { %v21251_v53 = vpop.permute.xlu0 %725 }
  0xac   :  { %vm727_vm2 = vcmp.eq.s32.totalorder %v21251_v53, %v21239_v33  ;;  %v24052_v45 = vand.u32 4294901760, %v21249_v50 }
  0xad   :  { %v11998_v52 = vsel %vm727_vm2, 1.0, %v24209_v25 }
  0xae   :  { %v21260_v44 = vsub.f32 %v11998_v52, %v11998_v52  ;;  %v166_v49 = vsub.f32 %v21249_v50, %v24052_v45  ;;  %v24215_v45 = vld [vmem:[#allocation13_spill] sm:$0xff] }
  0xb0   :  { %v167_v54 = vand.u32 4294901760, %v166_v49  ;;  %v24051_v37 = vand.u32 4294901760, %v21260_v44  ;;  %v24210_v49 = vld [vmem:[#allocation8_spill] sm:$0xff] }
  0xb2   :  { %13935 = vmatmul.mubr.f32.vlgmr.msra.gmra.mrb[0].mxu0 %v167_v54  ;;  %v830_v24 = vsub.f32 %v21260_v44, %v24051_v37  ;;  %v24211_v54 = vld [vmem:[#allocation9_spill] sm:$0xff]  ;;  %v24214_v37 = vld [vmem:[#allocation12_spill] sm:$0xff] }
  0xb3   :  { %17708 = vmatpush3.bf16.msra.mxu0 %v20890_v13  ;;  %13969 = vmatprep.mubr.msk.f32.mxu0 %vm20508_vm0, %v24209_v25 }
  0xb4   :  { %17709 = vmatprep.subr.bf16.mxu0 %v24148_v8  ;;  %v831_v52 = vand.u32 4294901760, %v830_v24  ;;  %v24049_v24 = vmov 1.0  }
  0xb6   :  { %14145 = vmatmul.mubr.f32.vlgmr.msra.gmra.mrb[0].mxu1 %v831_v52  ;;  %v24212_v52 = vld [vmem:[#allocation10_spill] sm:$0xff] }
  0xb7   :  { %17711 = vmatpush3.bf16.msra.mxu0 %v20906_v5  ;;  %17852 = vmatpush3.bf16.msra.mxu1 %v20920_v10 }
  0xb8   :  { %17712 = vmatprep.subr.bf16.mxu0 %v24148_v8  ;;  %17853 = vmatprep.subr.bf16.mxu1 %v24148_v8 }
  0xb9   :  { %14179 = vmatprep.mubr.msk.f32.mxu1 %vm20508_vm0, %v24209_v25 }
  0xbb   :  { %17714 = vmatpush3.bf16.msra.mxu0 %v20938_v11  ;;  %17855 = vmatpush3.bf16.msra.mxu1 %v20989_v14 }
  0xbc   :  { %17715 = vmatprep.subr.bf16.mxu0 %v24148_v8  ;;  %17856 = vmatprep.subr.bf16.mxu1 %v24148_v8 }
  0xbf   :  { %17717 = vmatpush3.bf16.msra.mxu0 %v20998_v17  ;;  %17858 = vmatpush3.bf16.msra.mxu1 %v21018_v23 }
  0xc0   :  { %17718 = vmatprep.subr.bf16.mxu0 %v24148_v8  ;;  %17859 = vmatprep.subr.bf16.mxu1 %v24148_v8 }
  0xc3   :  { %17720 = vmatpush3.bf16.msra.mxu0 %v21038_v47  ;;  %17861 = vmatpush3.bf16.msra.mxu1 %v21070_v38 }
  0xc4   :  { %17721 = vmatprep.subr.bf16.mxu0 %v24148_v8  ;;  %17862 = vmatprep.subr.bf16.mxu1 %v24148_v8 }
  0xc7   :  { %17723 = vmatpush3.bf16.msra.mxu0 %v21077_v48  ;;  %17864 = vmatpush3.bf16.msra.mxu1 %v21092_v30 }
  0xc8   :  { %17724 = vmatprep.subr.bf16.mxu0 %v24148_v8  ;;  %17865 = vmatprep.subr.bf16.mxu1 %v24148_v8 }
  0xcb   :  { %17726 = vmatpush3.bf16.msra.mxu0 %v21115_v3  ;;  %17867 = vmatpush3.bf16.msra.mxu1 %v21153_v59 }
  0xcc   :  { %17727 = vmatprep.subr.bf16.mxu0 %v24148_v8  ;;  %17868 = vmatprep.subr.bf16.mxu1 %v24148_v8 }
  0xcf   :  { %17729 = vmatpush3.bf16.msra.mxu0 %v21160_v31  ;;  %17870 = vmatpush3.bf16.msra.mxu1 %v21176_v42 }
  0xd0   :  { %17730 = vmatprep.subr.bf16.mxu0 %v24148_v8  ;;  %17871 = vmatprep.subr.bf16.mxu1 %v24148_v8 }
  0xd2   :  { %13970 = vmatmul.mubr.msk.f32.vlgmr.msra.gmra.mrb[0].mxu0 %vm63_vm1, %v24049_v24 }
  0xd3   :  { %17732 = vmatpush3.bf16.msra.mxu0 %v21130_v43  ;;  %17873 = vmatpush3.bf16.msra.mxu1 %v21189_v15  ;;  %v24229_v43 = vand.u32 4294901760, %v20831_v58  ;;  %v24235_v58 = vld [vmem:[#allocation22_spill] sm:$0xff] }
  0xd4   :  { %17733 = vmatprep.subr.bf16.mxu0 %v24148_v8  ;;  %17874 = vmatprep.subr.bf16.mxu1 %v24148_v8 }
  0xd5   :  { %14004 = vmatprep.mubr.msk.f32.mxu0 %vm20508_vm0, %v24209_v25 }
  0xd6   :  { %14180 = vmatmul.mubr.msk.f32.vlgmr.msra.gmra.mrb[0].mxu1 %vm727_vm2, %v24049_v24  ;;  %v24213_v24 = vld [vmem:[#allocation11_spill] sm:$0xff] }
  0xd7   :  { %17735 = vmatpush3.bf16.msra.mxu0 %v21151_v36  ;;  %17876 = vmatpush3.bf16.msra.mxu1 %v21158_v35  ;;  %v24227_v36 = vld [vmem:[#allocation21_spill] sm:$0xff] }
  0xd8   :  { %17736 = vmatprep.subr.bf16.mxu0 %v24148_v8  ;;  %17877 = vmatprep.subr.bf16.mxu1 %v24148_v8 }
  0xd9   :  { %14214 = vmatprep.mubr.msk.f32.mxu1 %vm20508_vm0, %v24209_v25 }
  0xdb   :  { %17738 = vmatpush3.bf16.msra.mxu0 %v21167_v19  ;;  %17879 = vmatpush3.bf16.msra.mxu1 %v21174_v55 }
  0xdc   :  { %17739 = vmatprep.subr.bf16.mxu0 %v24148_v8  ;;  %17880 = vmatprep.subr.bf16.mxu1 %v24148_v8 }
  0xdd   :  { %v21587_v56 = vpop.permute.xlu1 %1389 }
  0xde   :  { %vm1391_vm3 = vcmp.eq.s32.totalorder %v21587_v56, %v21239_v33  ;;  %v21867_v56 = vpop.permute.xlu0 %2704 }
  0xdf   :  { %17741 = vmatpush3.bf16.msra.mxu0 %v21183_v41  ;;  %17882 = vmatpush3.bf16.msra.mxu1 %v21187_v22  ;;  %v24223_v41 = vld [vmem:[#allocation18_spill] sm:$0xff]  ;;  %v24228_v22 = vand.u32 4294901760, %v20826_v57  ;;  %v24234_v57 = vand.u32 4294901760, %v20866_v12  ;;  %v24240_v12 = vand.u32 4294901760, %v20917_v21  ;;  %v24245_v21 = vand.u32 4294901760, %v20949_v18 }
  0xe0   :  { %17742 = vmatprep.subr.bf16.mxu0 %v24148_v8  ;;  %17883 = vmatprep.subr.bf16.mxu1 %v24148_v8  ;;  %v24251_v18 = vand.u32 4294901760, %v21010_v40  ;;  %v12002_v53 = vsel %vm1391_vm3, 1.0, %v24209_v25  ;;  %vm2706_vm5 = vcmp.eq.s32.totalorder %v21867_v56, %v21239_v33 }
  0xe3   :  { %17744 = vmatpush3.bf16.msra.mxu0 %v21198_v63  ;;  %17885 = vmatpush3.bf16.msra.mxu1 %v21203_v0  ;;  %v24221_v63 = vld [vmem:[#allocation17_spill] sm:$0xff]  ;;  %v24226_v0 = vand.u32 4294901760, %v21249_v50 }
  0xe4   :  { %17745 = vmatprep.subr.bf16.mxu0 %v24148_v8  ;;  %17886 = vmatprep.subr.bf16.mxu1 %v24148_v8 }
  0xe7   :  { %17747 = vmatpush3.bf16.msra.mxu0 %v21212_v60  ;;  %17888 = vmatpush3.bf16.msra.mxu1 %v21217_v29  ;;  %v24219_v60 = vld [vmem:[#allocation19_spill] sm:$0xff]  ;;  %v24224_v29 = vand.u32 4294901760, %v24223_v41  ;;  %v24231_v41 = vand.u32 4294901760, %v20845_v6  ;;  %v24236_v6 = vand.u32 4294901760, %v24235_v58 }
  0xe8   :  { %17748 = vmatprep.subr.bf16.mxu0 %v24148_v8  ;;  %17889 = vmatprep.subr.bf16.mxu1 %v24148_v8 }
  0xeb   :  { %17750 = vmatpush3.bf16.msra.mxu0 %v21221_v61  ;;  %17891 = vmatpush3.bf16.msra.mxu1 %v21225_v39  ;;  %v24217_v61 = vld [vmem:[#allocation15_spill] sm:$0xff]  ;;  %v24222_v39 = vand.u32 4294901760, %v24221_v63  ;;  %v21399_v63 = vpack.c.bf16 %v24229_v43, %v24228_v22  ;;  %v24238_v43 = vand.u32 4294901760, %v20895_v7  ;;  %v24239_v22 = vand.u32 4294901760, %v20912_v16 }
  0xec   :  { %17751 = vmatprep.subr.bf16.mxu0 %v24148_v8  ;;  %17892 = vmatprep.subr.bf16.mxu1 %v24148_v8  ;;  %v24243_v16 = vand.u32 4294901760, %v20935_v1  ;;  %v24248_v1 = vand.u32 4294901760, %v20977_v62 }
  0xed   :  { %v21387_v19 = vpack.c.bf16 %v24224_v29, %v24222_v39  ;;  %24230 = vst [vmem:[#allocation9_spill] sm:$0xff] %v21399_v63  ;;  %v24232_v39 = vand.u32 4294901760, %v20850_v9  ;;  %v21419_v9 = vpack.c.bf16 %v24236_v6, %v24234_v57  ;;  %v24249_v57 = vld [vmem:[#allocation23_spill] sm:$0xff]  ;;  %v24252_v6 = vld [vmem:[#allocation24_spill] sm:$0xff] }
  0xef   :  { %17753 = vmatpush3.bf16.msra.mxu0 %v21229_v32  ;;  %17894 = vmatpush3.bf16.msra.mxu1 %v21233_v26  ;;  %v24216_v32 = vld [vmem:[#allocation14_spill] sm:$0xff]  ;;  %v24220_v26 = vld [vmem:[#allocation20_spill] sm:$0xff]  ;;  %24225 = vst [vmem:[#allocation8_spill] sm:$0xff] %v21387_v19  ;;  %v21405_v29 = vpack.c.bf16 %v24232_v39, %v24231_v41  ;;  %24237 = vst [vmem:[#allocation10_spill] sm:$0xff] %v21419_v9  ;;  %v24244_v41 = vand.u32 4294901760, %v20944_v51  ;;  %v24250_v51 = vand.u32 4294901760, %v24249_v57 }
  0xf0   :  { %17754 = vmatprep.subr.bf16.mxu0 %v24148_v8  ;;  %17895 = vmatprep.subr.bf16.mxu1 %v24148_v8  ;;  %v24265_v57 = vld [vmem:[#allocation29_spill] sm:$0xff] }
  0xf1   :  { %v21443_v39 = vpack.c.bf16 %v24244_v41, %v24243_v16  ;;  %v21459_v58 = vpack.c.bf16 %v24250_v51, %v24248_v1  ;;  %v24260_v41 = vld [vmem:[#allocation27_spill] sm:$0xff]  ;;  %v24266_v51 = vand.u32 4294901760, %v24265_v57 }
  0xf2   :  { %14005 = vmatmul.mubr.f32.vlgmr.msra.gmra.mrb[0].mxu0 %v21249_v50  ;;  %v24233_v50 = vand.u32 4294901760, %v21260_v44  ;;  %v24261_v40 = vand.u32 4294901760, %v24260_v41 }
  0xf3   :  { %17756 = vmatpush3.bf16.msra.mxu0 %v20640_v20  ;;  %17897 = vmatpush3.bf16.msra.mxu1 %v21237_v46  ;;  %v24218_v46 = vld [vmem:[#allocation16_spill] sm:$0xff] }
  0xf4   :  { %17757 = vmatprep.subr.bf16.mxu0 %v24148_v8  ;;  %17898 = vmatprep.subr.bf16.mxu1 %v24148_v8 }
  0xf5   :  { %14039 = vmatprep.mubr.msk.f32.mxu0 %vm20508_vm0, %v24209_v25 }
  0xf6   :  { %14215 = vmatmul.mubr.f32.vlgmr.msra.gmra.mrb[0].mxu1 %v21260_v44  ;;  %v24241_v44 = vand.u32 4294901760, %v20925_v4  ;;  %v24246_v4 = vand.u32 4294901760, %v20969_v2  ;;  %v24253_v2 = vand.u32 4294901760, %v24252_v6 }
  0xf7   :  { %17759 = vmatpush3.bf16.msra.mxu0 %v20655_v27  ;;  %17900 = vmatpush3.bf16.msra.mxu1 %v20661_v28 }
  0xf8   :  { %17760 = vmatprep.subr.bf16.mxu0 %v24148_v8  ;;  %17901 = vmatprep.subr.bf16.mxu1 %v24148_v8  ;;  %v21437_v7 = vpack.c.bf16 %v24241_v44, %v24240_v12  ;;  %v24257_v12 = vld [vmem:[#allocation26_spill] sm:$0xff] }
  0xf9   :  { %14249 = vmatprep.mubr.msk.f32.mxu1 %vm20508_vm0, %v24209_v25  ;;  %v24258_v44 = vand.u32 4294901760, %v24257_v12  ;;  %v24272_v12 = vld [vmem:[#allocation33_spill] sm:$0xff] }
  0xfa   :  { %24242 = vst [vmem:[#allocation11_spill] sm:$0xff] %v21437_v7 }
  0xfb   :  { %17762 = vmatpush3.bf16.msra.mxu0 %v20676_v34  ;;  %17903 = vmatpush3.bf16.msra.mxu1 %v24210_v49 }
  0xfc   :  { %17763 = vmatprep.subr.bf16.mxu0 %v24148_v8  ;;  %17904 = vmatprep.subr.bf16.mxu1 %v24148_v8 }
  0xff   :  { %17765 = vmatpush3.bf16.msra.mxu0 %v24211_v54  ;;  %17906 = vmatpush3.bf16.msra.mxu1 %v24212_v52 }
 0x100   :  { %17766 = vmatprep.subr.bf16.mxu0 %v24148_v8  ;;  %17907 = vmatprep.subr.bf16.mxu1 %v24148_v8 }
 0x103   :  { %17768 = vmatpush3.bf16.msra.mxu0 %v24213_v24  ;;  %17909 = vmatpush3.bf16.msra.mxu1 %v24214_v37 }
 0x104   :  { %17769 = vmatprep.subr.bf16.mxu0 %v24148_v8  ;;  %17910 = vmatprep.subr.bf16.mxu1 %v24148_v8 }
 0x107   :  { %17771 = vmatpush3.bf16.msra.mxu0 %v24215_v45  ;;  %17912 = vmatpush3.bf16.msra.mxu1 %v24216_v32 }
 0x108   :  { %17772 = vmatprep.subr.bf16.mxu0 %v24148_v8  ;;  %17913 = vmatprep.subr.bf16.mxu1 %v24148_v8 }
 0x10b   :  { %17774 = vmatpush3.bf16.msra.mxu0 %v24217_v61  ;;  %17915 = vmatpush3.bf16.msra.mxu1 %v24218_v46 }
 0x10c   :  { %17775 = vmatprep.subr.bf16.mxu0 %v24148_v8  ;;  %17916 = vmatprep.subr.bf16.mxu1 %v24148_v8 }
 0x10f   :  { %17777 = vmatpush3.bf16.msra.mxu0 %v24219_v60  ;;  %17918 = vmatpush3.bf16.msra.mxu1 %v24220_v26 }
 0x110   :  { %17778 = vmatprep.subr.bf16.mxu0 %v24148_v8  ;;  %17919 = vmatprep.subr.bf16.mxu1 %v24148_v8 }
 0x112   :  { %14040 = vmatmul.mubr.f32.vlgmr.msra.gmra.mrb[0].mxu0 %v24226_v0  ;;  %v21425_v0 = vpack.c.bf16 %v24239_v22, %v24238_v43  ;;  %v21469_v43 = vpack.c.bf16 %v24253_v2, %v24251_v18  ;;  %v24255_v22 = vld [vmem:[#allocation25_spill] sm:$0xff]  ;;  %v24267_v18 = vld [vmem:[#allocation31_spill] sm:$0xff] }
 0x113   :  { %17780 = vmatpush3.bf16.msra.mxu0 %v21387_v19  ;;  %17921 = vmatpush3.bf16.msra.mxu1 %v24227_v36  ;;  %v24256_v62 = vand.u32 4294901760, %v24255_v22  ;;  %v24268_v6 = vand.u32 4294901760, %v24267_v18  ;;  %v24270_v22 = vld [vmem:[#allocation32_spill] sm:$0xff]  ;;  %v24280_v18 = vld [vmem:[#allocation38_spill] sm:$0xff] }
 0x114   :  { %17781 = vmatprep.subr.bf16.mxu0 %v24148_v8  ;;  %17922 = vmatprep.subr.bf16.mxu1 %v24148_v8  ;;  %24254 = vst [vmem:[#allocation13_spill] sm:$0xff] %v21469_v43 }
 0x115   :  { %14074 = vmatprep.mubr.msk.f32.mxu0 %vm20508_vm0, %v24209_v25  ;;  %v21475_v16 = vpack.c.bf16 %v24258_v44, %v24256_v62  ;;  %v21491_v2 = vpack.c.bf16 %v24268_v6, %v24266_v51  ;;  %v24271_v62 = vand.u32 4294901760, %v24270_v22  ;;  %v24273_v44 = vand.u32 4294901760, %v24272_v12  ;;  %v24282_v22 = vld [vmem:[#allocation39_spill] sm:$0xff] }
 0x116   :  { %14250 = vmatmul.mubr.f32.vlgmr.msra.gmra.mrb[0].mxu1 %v24233_v50  ;;  %v21453_v50 = vpack.c.bf16 %v24246_v4, %v24245_v21  ;;  %v24262_v21 = vld [vmem:[#allocation28_spill] sm:$0xff]  ;;  %v24281_v6 = vand.u32 4294901760, %v24280_v18  ;;  %v24283_v12 = vand.u32 4294901760, %v24282_v22 }
 0x117   :  { %17783 = vmatpush3.bf16.msra.mxu0 %v21399_v63  ;;  %17924 = vmatpush3.bf16.msra.mxu1 %v21405_v29  ;;  %24259 = vst [vmem:[#allocation14_spill] sm:$0xff] %v21475_v16  ;;  %v24263_v4 = vand.u32 4294901760, %v24262_v21  ;;  %24269 = vst [vmem:[#allocation16_spill] sm:$0xff] %v21491_v2  ;;  %v21501_v41 = vpack.c.bf16 %v24273_v44, %v24271_v62  ;;  %v24285_v44 = vmov 1.0  }
 0x118   :  { %17784 = vmatprep.subr.bf16.mxu0 %v24148_v8  ;;  %17925 = vmatprep.subr.bf16.mxu1 %v24148_v8  ;;  %24247 = vst [vmem:[#allocation12_spill] sm:$0xff] %v21453_v50  ;;  %v21517_v62 = vpack.c.bf16 %v24283_v12, %v24281_v6 }
 0x119   :  { %14284 = vmatprep.mubr.msk.f32.mxu1 %vm20508_vm0, %v24209_v25  ;;  %v21485_v1 = vpack.c.bf16 %v24263_v4, %v24261_v40  ;;  %24274 = vst [vmem:[#allocation19_spill] sm:$0xff] %v21501_v41  ;;  %v24275_v40 = vld [vmem:[#allocation34_spill] sm:$0xff]  ;;  %v24277_v4 = vld [vmem:[#allocation35_spill] sm:$0xff] }
 0x11a   :  { %v24276_v21 = vand.u32 4294901760, %v24275_v40  ;;  %v24278_v57 = vand.u32 4294901760, %v24277_v4  ;;  %24284 = vst [vmem:[#allocation17_spill] sm:$0xff] %v21517_v62  ;;  %v21601_v40 = vpop.permute.xlu1 %2056 }
 0x11b   :  { %17786 = vmatpush3.bf16.msra.mxu0 %v21419_v9  ;;  %17927 = vmatpush3.bf16.msra.mxu1 %v21425_v0  ;;  %24264 = vst [vmem:[#allocation15_spill] sm:$0xff] %v21485_v1  ;;  %vm2058_vm4 = vcmp.eq.s32.totalorder %v21601_v40, %v21239_v33 }
 0x11c   :  { %17787 = vmatprep.subr.bf16.mxu0 %v24148_v8  ;;  %17928 = vmatprep.subr.bf16.mxu1 %v24148_v8  ;;  %v21507_v51 = vpack.c.bf16 %v24278_v57, %v24276_v21  ;;  %v21603_v21 = vsub.f32 %v12002_v53, %v12002_v53  ;;  %v12006_v4 = vsel %vm2058_vm4, 1.0, %v24209_v25 }
 0x11d   :  { %v21618_v18 = vsub.f32 %v12006_v4, %v12006_v4 }
 0x11e   :  { %24279 = vst [vmem:[#allocation20_spill] sm:$0xff] %v21507_v51  ;;  %v24082_v57 = vand.u32 4294901760, %v21603_v21  ;;  %v21875_v40 = vpop.permute.xlu1 %3352 }
 0x11f   :  { %17789 = vmatpush3.bf16.msra.mxu0 %v21437_v7  ;;  %17930 = vmatpush3.bf16.msra.mxu1 %v21443_v39  ;;  %v24081_v22 = vand.u32 4294901760, %v21618_v18  ;;  %vm3354_vm6 = vcmp.eq.s32.totalorder %v21875_v40, %v21239_v33 }
 0x120   :  { %17790 = vmatprep.subr.bf16.mxu0 %v24148_v8  ;;  %17931 = vmatprep.subr.bf16.mxu1 %v24148_v8  ;;  %v1478_v6 = vsub.f32 %v21603_v21, %v24082_v57  ;;  %v24291_v57 = vld [vmem:[#allocation50_spill] sm:$0xff] }
 0x121   :  { %v2145_v53 = vsub.f32 %v21618_v18, %v24081_v22  ;;  %v24290_v22 = vld [vmem:[#allocation42_spill] sm:$0xff] }
 0x122   :  { %v1479_v12 = vand.u32 4294901760, %v1478_v6  ;;  %v24286_v6 = vld [vmem:[#allocation37_spill] sm:$0xff] }
 0x123   :  { %17792 = vmatpush3.bf16.msra.mxu0 %v21453_v50  ;;  %17933 = vmatpush3.bf16.msra.mxu1 %v21459_v58  ;;  %v2146_v4 = vand.u32 4294901760, %v2145_v53  ;;  %v24288_v53 = vld [vmem:[#allocation40_spill] sm:$0xff] }
 0x124   :  { %17793 = vmatprep.subr.bf16.mxu0 %v24148_v8  ;;  %17934 = vmatprep.subr.bf16.mxu1 %v24148_v8 }
 0x127   :  { %17795 = vmatpush3.bf16.msra.mxu0 %v21469_v43  ;;  %17936 = vmatpush3.bf16.msra.mxu1 %v21475_v16 }
 0x128   :  { %17796 = vmatprep.subr.bf16.mxu0 %v24148_v8  ;;  %17937 = vmatprep.subr.bf16.mxu1 %v24148_v8 }
 0x12b   :  { %17798 = vmatpush3.bf16.msra.mxu0 %v21485_v1  ;;  %17939 = vmatpush3.bf16.msra.mxu1 %v21491_v2 }
 0x12c   :  { %17799 = vmatprep.subr.bf16.mxu0 %v24148_v8  ;;  %17940 = vmatprep.subr.bf16.mxu1 %v24148_v8 }
 0x12f   :  { %17801 = vmatpush3.bf16.msra.mxu0 %v21501_v41  ;;  %17942 = vmatpush3.bf16.msra.mxu1 %v21507_v51 }
 0x130   :  { %17802 = vmatprep.subr.bf16.mxu0 %v24148_v8  ;;  %17943 = vmatprep.subr.bf16.mxu1 %v24148_v8 }
 0x132   :  { %14075 = vmatmul.mubr.msk.f32.vlgmr.msra.gmra.mrb[0].mxu0 %vm63_vm1, %v24285_v44 }
 0x133   :  { %17804 = vmatpush3.bf16.msra.mxu0 %v20640_v20  ;;  %17945 = vmatpush3.bf16.msra.mxu1 %v21517_v62 }
 0x134   :  { %17805 = vmatprep.subr.bf16.mxu0 %v24148_v8  ;;  %17946 = vmatprep.subr.bf16.mxu1 %v24148_v8 }
 0x135   :  { %14109 = vmatprep.mubr.msk.f32.mxu0 %vm20508_vm0, %v24209_v25 }
 0x136   :  { %14285 = vmatmul.mubr.msk.f32.vlgmr.msra.gmra.mrb[0].mxu1 %vm727_vm2, %v24285_v44 }
 0x137   :  { %17807 = vmatpush3.bf16.msra.mxu0 %v20655_v27  ;;  %17948 = vmatpush3.bf16.msra.mxu1 %v20661_v28 }
 0x138   :  { %17808 = vmatprep.subr.bf16.mxu0 %v24148_v8  ;;  %17949 = vmatprep.subr.bf16.mxu1 %v24148_v8 }
 0x139   :  { %14319 = vmatprep.mubr.msk.f32.mxu1 %vm20508_vm0, %v24209_v25 }
 0x13b   :  { %17810 = vmatpush3.bf16.msra.mxu0 %v20676_v34  ;;  %17951 = vmatpush3.bf16.msra.mxu1 %v24210_v49 }
 0x13c   :  { %17811 = vmatprep.subr.bf16.mxu0 %v24148_v8  ;;  %17952 = vmatprep.subr.bf16.mxu1 %v24148_v8 }
 0x13f   :  { %17813 = vmatpush3.bf16.msra.mxu0 %v24211_v54  ;;  %17954 = vmatpush3.bf16.msra.mxu1 %v24212_v52 }
 0x140   :  { %17814 = vmatprep.subr.bf16.mxu0 %v24148_v8  ;;  %17955 = vmatprep.subr.bf16.mxu1 %v24148_v8 }
 0x143   :  { %17816 = vmatpush3.bf16.msra.mxu0 %v24213_v24  ;;  %17957 = vmatpush3.bf16.msra.mxu1 %v24214_v37 }
 0x144   :  { %17817 = vmatprep.subr.bf16.mxu0 %v24148_v8  ;;  %17958 = vmatprep.subr.bf16.mxu1 %v24148_v8 }
 0x147   :  { %17819 = vmatpush3.bf16.msra.mxu0 %v24215_v45  ;;  %17960 = vmatpush3.bf16.msra.mxu1 %v24216_v32 }
 0x148   :  { %17820 = vmatprep.subr.bf16.mxu0 %v24148_v8  ;;  %17961 = vmatprep.subr.bf16.mxu1 %v24148_v8 }
 0x14b   :  { %17822 = vmatpush3.bf16.msra.mxu0 %v24217_v61  ;;  %17963 = vmatpush3.bf16.msra.mxu1 %v24218_v46 }
 0x14c   :  { %17823 = vmatprep.subr.bf16.mxu0 %v24148_v8  ;;  %17964 = vmatprep.subr.bf16.mxu1 %v24148_v8 }
 0x14f   :  { %17825 = vmatpush3.bf16.msra.mxu0 %v24219_v60  ;;  %17966 = vmatpush3.bf16.msra.mxu1 %v24220_v26 }
 0x150   :  { %17967 = vmatprep.subr.bf16.mxu1 %v24148_v8  ;;  %17970 = vmatprep.subr.bf16.mxu0 %v24148_v8 }
 0x152   :  { %14110 = vmatmul.mubr.msk.f32.vlgmr.msra.gmra.mrb[0].mxu0 %vm63_vm1, %v24285_v44 }
 0x153   :  { %17969 = vmatpush3.bf16.msra.mxu1 %v24227_v36  ;;  %17972 = vmatpush3.bf16.msra.mxu0 %v20661_v28 }
 0x154   :  { %17973 = vmatprep.subr.bf16.mxu0 %v24148_v8  ;;  %18114 = vmatprep.subr.bf16.mxu1 %v24148_v8 }
 0x155   :  { %14354 = vmatprep.mubr.msk.f32.mxu0 %vm20508_vm0, %v24209_v25 }
 0x156   :  { %14320 = vmatmul.mubr.msk.f32.vlgmr.msra.gmra.mrb[0].mxu1 %vm727_vm2, %v24285_v44 }
 0x157   :  { %17975 = vmatpush3.bf16.msra.mxu0 %v24210_v49  ;;  %18116 = vmatpush3.bf16.msra.mxu1 %v20640_v20 }
 0x158   :  { %17976 = vmatprep.subr.bf16.mxu0 %v24148_v8  ;;  %18117 = vmatprep.subr.bf16.mxu1 %v24148_v8 }
 0x159   :  { %14564 = vmatprep.mubr.msk.f32.mxu1 %vm20508_vm0, %v24209_v25 }
 0x15b   :  { %17978 = vmatpush3.bf16.msra.mxu0 %v24212_v52  ;;  %18119 = vmatpush3.bf16.msra.mxu1 %v20655_v27 }
 0x15c   :  { %17979 = vmatprep.subr.bf16.mxu0 %v24148_v8  ;;  %18120 = vmatprep.subr.bf16.mxu1 %v24148_v8 }
 0x15f   :  { %17981 = vmatpush3.bf16.msra.mxu0 %v24214_v37  ;;  %18122 = vmatpush3.bf16.msra.mxu1 %v20676_v34 }
 0x160   :  { %17982 = vmatprep.subr.bf16.mxu0 %v24148_v8  ;;  %18123 = vmatprep.subr.bf16.mxu1 %v24148_v8 }
 0x163   :  { %17984 = vmatpush3.bf16.msra.mxu0 %v24216_v32  ;;  %18125 = vmatpush3.bf16.msra.mxu1 %v24211_v54 }
 0x164   :  { %17985 = vmatprep.subr.bf16.mxu0 %v24148_v8  ;;  %18126 = vmatprep.subr.bf16.mxu1 %v24148_v8 }
 0x167   :  { %17987 = vmatpush3.bf16.msra.mxu0 %v24218_v46  ;;  %18128 = vmatpush3.bf16.msra.mxu1 %v24213_v24 }
 0x168   :  { %17988 = vmatprep.subr.bf16.mxu0 %v24148_v8  ;;  %18129 = vmatprep.subr.bf16.mxu1 %v24148_v8 }
 0x16b   :  { %17990 = vmatpush3.bf16.msra.mxu0 %v24220_v26  ;;  %18131 = vmatpush3.bf16.msra.mxu1 %v24215_v45 }
 0x16c   :  { %17991 = vmatprep.subr.bf16.mxu0 %v24148_v8  ;;  %18132 = vmatprep.subr.bf16.mxu1 %v24148_v8 }
 0x16f   :  { %17993 = vmatpush3.bf16.msra.mxu0 %v24227_v36  ;;  %18134 = vmatpush3.bf16.msra.mxu1 %v24217_v61 }
 0x170   :  { %17994 = vmatprep.subr.bf16.mxu0 %v24148_v8  ;;  %18135 = vmatprep.subr.bf16.mxu1 %v24148_v8 }
 0x172   :  { %14355 = vmatmul.mubr.f32.vlgmr.msra.gmra.mrb[2].mxu0 %v1479_v12  ;;  %v24287_v12 = vld [vmem:[#allocation44_spill] sm:$0xff] }
 0x173   :  { %17996 = vmatpush3.bf16.msra.mxu0 %v20920_v10  ;;  %18137 = vmatpush3.bf16.msra.mxu1 %v24219_v60 }
 0x174   :  { %17997 = vmatprep.subr.bf16.mxu0 %v24148_v8  ;;  %18138 = vmatprep.subr.bf16.mxu1 %v24148_v8 }
 0x175   :  { %14389 = vmatprep.mubr.msk.f32.mxu0 %vm20508_vm0, %v24209_v25 }
 0x176   :  { %14565 = vmatmul.mubr.f32.vlgmr.msra.gmra.mrb[2].mxu1 %v2146_v4  ;;  %v24289_v4 = vld [vmem:[#allocation47_spill] sm:$0xff] }
 0x177   :  { %17999 = vmatpush3.bf16.msra.mxu0 %v20989_v14  ;;  %18140 = vmatpush3.bf16.msra.mxu1 %v20890_v13 }
 0x178   :  { %18000 = vmatprep.subr.bf16.mxu0 %v24148_v8  ;;  %18141 = vmatprep.subr.bf16.mxu1 %v24148_v8 }
 0x179   :  { %14599 = vmatprep.mubr.msk.f32.mxu1 %vm20508_vm0, %v24209_v25 }
 0x17b   :  { %18002 = vmatpush3.bf16.msra.mxu0 %v21018_v23  ;;  %18143 = vmatpush3.bf16.msra.mxu1 %v20906_v5 }
 0x17c   :  { %18003 = vmatprep.subr.bf16.mxu0 %v24148_v8  ;;  %18144 = vmatprep.subr.bf16.mxu1 %v24148_v8 }
 0x17f   :  { %18005 = vmatpush3.bf16.msra.mxu0 %v21070_v38  ;;  %18146 = vmatpush3.bf16.msra.mxu1 %v20938_v11 }
 0x180   :  { %18006 = vmatprep.subr.bf16.mxu0 %v24148_v8  ;;  %18147 = vmatprep.subr.bf16.mxu1 %v24148_v8 }
 0x183   :  { %18008 = vmatpush3.bf16.msra.mxu0 %v21092_v30  ;;  %18149 = vmatpush3.bf16.msra.mxu1 %v20998_v17 }
 0x184   :  { %18009 = vmatprep.subr.bf16.mxu0 %v24148_v8  ;;  %18150 = vmatprep.subr.bf16.mxu1 %v24148_v8 }
 0x187   :  { %18011 = vmatpush3.bf16.msra.mxu0 %v21153_v59  ;;  %18152 = vmatpush3.bf16.msra.mxu1 %v21038_v47 }
 0x188   :  { %18012 = vmatprep.subr.bf16.mxu0 %v24148_v8  ;;  %18153 = vmatprep.subr.bf16.mxu1 %v24148_v8 }
 0x18b   :  { %18014 = vmatpush3.bf16.msra.mxu0 %v21176_v42  ;;  %18155 = vmatpush3.bf16.msra.mxu1 %v21077_v48  ;;  %v24298_v48 = vld [vmem:[#allocation51_spill] sm:$0xff] }
 0x18c   :  { %18015 = vmatprep.subr.bf16.mxu0 %v24148_v8  ;;  %18156 = vmatprep.subr.bf16.mxu1 %v24148_v8 }
 0x18f   :  { %18017 = vmatpush3.bf16.msra.mxu0 %v21189_v15  ;;  %18158 = vmatpush3.bf16.msra.mxu1 %v21115_v3  ;;  %v24296_v3 = vld [vmem:[#allocation49_spill] sm:$0xff] }
 0x190   :  { %18018 = vmatprep.subr.bf16.mxu0 %v24148_v8  ;;  %18159 = vmatprep.subr.bf16.mxu1 %v24148_v8 }
 0x192   :  { %14390 = vmatmul.mubr.msk.f32.vlgmr.msra.gmra.mrb[2].mxu0 %vm1391_vm3, %v24285_v44 }
 0x193   :  { %18020 = vmatpush3.bf16.msra.mxu0 %v21158_v35  ;;  %18161 = vmatpush3.bf16.msra.mxu1 %v21160_v31  ;;  %v24294_v31 = vld [vmem:[#allocation46_spill] sm:$0xff] }
 0x194   :  { %18021 = vmatprep.subr.bf16.mxu0 %v24148_v8  ;;  %18162 = vmatprep.subr.bf16.mxu1 %v24148_v8 }
 0x195   :  { %14424 = vmatprep.mubr.msk.f32.mxu0 %vm20508_vm0, %v24209_v25 }
 0x196   :  { %14600 = vmatmul.mubr.msk.f32.vlgmr.msra.gmra.mrb[2].mxu1 %vm2058_vm4, %v24285_v44 }
 0x197   :  { %18023 = vmatpush3.bf16.msra.mxu0 %v21174_v55  ;;  %18164 = vmatpush3.bf16.msra.mxu1 %v24286_v6  ;;  %v24292_v6 = vld [vmem:[#allocation43_spill] sm:$0xff] }
 0x198   :  { %18024 = vmatprep.subr.bf16.mxu0 %v24148_v8  ;;  %18165 = vmatprep.subr.bf16.mxu1 %v24148_v8 }
 0x199   :  { %14634 = vmatprep.mubr.msk.f32.mxu1 %vm20508_vm0, %v24209_v25 }
 0x19b   :  { %18026 = vmatpush3.bf16.msra.mxu0 %v24287_v12  ;;  %18167 = vmatpush3.bf16.msra.mxu1 %v24288_v53  ;;  %v24293_v53 = vld [vmem:[#allocation52_spill] sm:$0xff] }
 0x19c   :  { %18027 = vmatprep.subr.bf16.mxu0 %v24148_v8  ;;  %18168 = vmatprep.subr.bf16.mxu1 %v24148_v8 }
 0x19f   :  { %18029 = vmatpush3.bf16.msra.mxu0 %v24289_v4  ;;  %18170 = vmatpush3.bf16.msra.mxu1 %v24290_v22  ;;  %v24295_v22 = vld [vmem:[#allocation54_spill] sm:$0xff] }
 0x1a0   :  { %18030 = vmatprep.subr.bf16.mxu0 %v24148_v8  ;;  %18171 = vmatprep.subr.bf16.mxu1 %v24148_v8 }
 0x1a3   :  { %18032 = vmatpush3.bf16.msra.mxu0 %v24291_v57  ;;  %18173 = vmatpush3.bf16.msra.mxu1 %v24292_v6  ;;  %v24297_v6 = vld [vmem:[#allocation55_spill] sm:$0xff] }
 0x1a4   :  { %18033 = vmatprep.subr.bf16.mxu0 %v24148_v8  ;;  %18174 = vmatprep.subr.bf16.mxu1 %v24148_v8 }
 0x1a7   :  { %18035 = vmatpush3.bf16.msra.mxu0 %v24293_v53  ;;  %18176 = vmatpush3.bf16.msra.mxu1 %v24294_v31  ;;  %v24299_v31 = vld [vmem:[#allocation53_spill] sm:$0xff] }
 0x1a8   :  { %18036 = vmatprep.subr.bf16.mxu0 %v24148_v8  ;;  %18177 = vmatprep.subr.bf16.mxu1 %v24148_v8 }
 0x1ab   :  { %18038 = vmatpush3.bf16.msra.mxu0 %v24295_v22  ;;  %18179 = vmatpush3.bf16.msra.mxu1 %v24296_v3 }
 0x1ac   :  { %18039 = vmatprep.subr.bf16.mxu0 %v24148_v8  ;;  %18180 = vmatprep.subr.bf16.mxu1 %v24148_v8 }
 0x1af   :  { %18041 = vmatpush3.bf16.msra.mxu0 %v24297_v6  ;;  %18182 = vmatpush3.bf16.msra.mxu1 %v24298_v48  ;;  %v24301_v48 = vand.u32 4294901760, %v21618_v18 }
 0x1b0   :  { %18042 = vmatprep.subr.bf16.mxu0 %v24148_v8  ;;  %18183 = vmatprep.subr.bf16.mxu1 %v24148_v8 }
 0x1b2   :  { %14425 = vmatmul.mubr.f32.vlgmr.msra.gmra.mrb[2].mxu0 %v21603_v21 }
 0x1b3   :  { %18044 = vmatpush3.bf16.msra.mxu0 %v20661_v28  ;;  %18185 = vmatpush3.bf16.msra.mxu1 %v24299_v31  ;;  %v24300_v31 = vand.u32 4294901760, %v21603_v21  ;;  %v24302_v21 = vld [vmem:[#allocation45_spill] sm:$0xff] }
 0x1b4   :  { %18045 = vmatprep.subr.bf16.mxu0 %v24148_v8  ;;  %18186 = vmatprep.subr.bf16.mxu1 %v24148_v8 }
 0x1b5   :  { %14459 = vmatprep.mubr.msk.f32.mxu0 %vm20508_vm0, %v24209_v25 }
 0x1b6   :  { %14635 = vmatmul.mubr.f32.vlgmr.msra.gmra.mrb[2].mxu1 %v21618_v18  ;;  %v24303_v18 = vld [vmem:[#allocation48_spill] sm:$0xff] }
 0x1b7   :  { %18047 = vmatpush3.bf16.msra.mxu0 %v24210_v49  ;;  %18188 = vmatpush3.bf16.msra.mxu1 %v20640_v20 }
 0x1b8   :  { %18048 = vmatprep.subr.bf16.mxu0 %v24148_v8  ;;  %18189 = vmatprep.subr.bf16.mxu1 %v24148_v8 }
 0x1b9   :  { %14669 = vmatprep.mubr.msk.f32.mxu1 %vm20508_vm0, %v24209_v25 }
 0x1bb   :  { %18050 = vmatpush3.bf16.msra.mxu0 %v24212_v52  ;;  %18191 = vmatpush3.bf16.msra.mxu1 %v20655_v27 }
 0x1bc   :  { %18051 = vmatprep.subr.bf16.mxu0 %v24148_v8  ;;  %18192 = vmatprep.subr.bf16.mxu1 %v24148_v8 }
 0x1bf   :  { %18053 = vmatpush3.bf16.msra.mxu0 %v24214_v37  ;;  %18194 = vmatpush3.bf16.msra.mxu1 %v20676_v34 }
 0x1c0   :  { %18054 = vmatprep.subr.bf16.mxu0 %v24148_v8  ;;  %18195 = vmatprep.subr.bf16.mxu1 %v24148_v8 }
 0x1c3   :  { %18056 = vmatpush3.bf16.msra.mxu0 %v24216_v32  ;;  %18197 = vmatpush3.bf16.msra.mxu1 %v24211_v54 }
 0x1c4   :  { %18057 = vmatprep.subr.bf16.mxu0 %v24148_v8  ;;  %18198 = vmatprep.subr.bf16.mxu1 %v24148_v8 }
 0x1c7   :  { %18059 = vmatpush3.bf16.msra.mxu0 %v24218_v46  ;;  %18200 = vmatpush3.bf16.msra.mxu1 %v24213_v24 }
 0x1c8   :  { %18060 = vmatprep.subr.bf16.mxu0 %v24148_v8  ;;  %18201 = vmatprep.subr.bf16.mxu1 %v24148_v8 }
 0x1cb   :  { %18062 = vmatpush3.bf16.msra.mxu0 %v24220_v26  ;;  %18203 = vmatpush3.bf16.msra.mxu1 %v24215_v45 }
 0x1cc   :  { %18063 = vmatprep.subr.bf16.mxu0 %v24148_v8  ;;  %18204 = vmatprep.subr.bf16.mxu1 %v24148_v8 }
 0x1cf   :  { %18065 = vmatpush3.bf16.msra.mxu0 %v24227_v36  ;;  %18206 = vmatpush3.bf16.msra.mxu1 %v24217_v61 }
 0x1d0   :  { %18066 = vmatprep.subr.bf16.mxu0 %v24148_v8  ;;  %18207 = vmatprep.subr.bf16.mxu1 %v24148_v8 }
 0x1d2   :  { %14460 = vmatmul.mubr.f32.vlgmr.msra.gmra.mrb[2].mxu0 %v24300_v31  ;;  %v21786_v31 = vld [vmem:[%s23947_s5] sm:$0xff] }
 0x1d3   :  { %18068 = vmatpush3.bf16.msra.mxu0 %v21405_v29  ;;  %18209 = vmatpush3.bf16.msra.mxu1 %v24219_v60 }
 0x1d4   :  { %18069 = vmatprep.subr.bf16.mxu0 %v24148_v8  ;;  %18210 = vmatprep.subr.bf16.mxu1 %v24148_v8 }
 0x1d5   :  { %14494 = vmatprep.mubr.msk.f32.mxu0 %vm20508_vm0, %v24209_v25 }
 0x1d6   :  { %14670 = vmatmul.mubr.f32.vlgmr.msra.gmra.mrb[2].mxu1 %v24301_v48  ;;  %v20511_v48 = vmov 1  }
 0x1d7   :  { %18071 = vmatpush3.bf16.msra.mxu0 %v21425_v0  ;;  %18212 = vmatpush3.bf16.msra.mxu1 %v21387_v19 }
 0x1d8   :  { %18072 = vmatprep.subr.bf16.mxu0 %v24148_v8  ;;  %18213 = vmatprep.subr.bf16.mxu1 %v24148_v8 }
 0x1d9   :  { %14704 = vmatprep.mubr.msk.f32.mxu1 %vm20508_vm0, %v24209_v25  ;;  %20437 = vset.pattern.permute.xlu1 %v20511_v48 }
 0x1da   :  { %20436 = vset.pattern.permute.xlu0 %v20511_v48  ;;  %4664 = vperm.xlu1 %20437, %v21786_v31   ;;  %v12010_v48 = vsel %vm2706_vm5, 1.0, %v24209_v25 }
 0x1db   :  { %18074 = vmatpush3.bf16.msra.mxu0 %v21443_v39  ;;  %18215 = vmatpush3.bf16.msra.mxu1 %v21399_v63 }
 0x1dc   :  { %18075 = vmatprep.subr.bf16.mxu0 %v24148_v8  ;;  %18216 = vmatprep.subr.bf16.mxu1 %v24148_v8 }
 0x1dd   :  { %4017 = vperm.xlu0 %20436, %v24302_v21   ;;  %v21889_v21 = vsub.f32 %v12010_v48, %v12010_v48 }
 0x1de   :  { %5311 = vperm.xlu1 %20437, %v24303_v18   ;;  %v12014_v18 = vsel %vm3354_vm6, 1.0, %v24209_v25 }
 0x1df   :  { %18077 = vmatpush3.bf16.msra.mxu0 %v21459_v58  ;;  %18218 = vmatpush3.bf16.msra.mxu1 %v21419_v9  ;;  %v21902_v48 = vsub.f32 %v12014_v18, %v12014_v18 }
 0x1e0   :  { %18078 = vmatprep.subr.bf16.mxu0 %v24148_v8  ;;  %18219 = vmatprep.subr.bf16.mxu1 %v24148_v8 }
 0x1e3   :  { %18080 = vmatpush3.bf16.msra.mxu0 %v21475_v16  ;;  %18221 = vmatpush3.bf16.msra.mxu1 %v21437_v7 }
 0x1e4   :  { %18081 = vmatprep.subr.bf16.mxu0 %v24148_v8  ;;  %18222 = vmatprep.subr.bf16.mxu1 %v24148_v8 }
 0x1e7   :  { %18083 = vmatpush3.bf16.msra.mxu0 %v21491_v2  ;;  %18224 = vmatpush3.bf16.msra.mxu1 %v21453_v50 }
 0x1e8   :  { %18084 = vmatprep.subr.bf16.mxu0 %v24148_v8  ;;  %18225 = vmatprep.subr.bf16.mxu1 %v24148_v8 }
 0x1eb   :  { %18086 = vmatpush3.bf16.msra.mxu0 %v21507_v51  ;;  %18227 = vmatpush3.bf16.msra.mxu1 %v21469_v43  ;;  %v24103_v43 = vand.u32 4294901760, %v21889_v21 }
 0x1ec   :  { %18087 = vmatprep.subr.bf16.mxu0 %v24148_v8  ;;  %18228 = vmatprep.subr.bf16.mxu1 %v24148_v8 }
 0x1ed   :  { %v2793_v18 = vsub.f32 %v21889_v21, %v24103_v43 }
 0x1ef   :  { %18089 = vmatpush3.bf16.msra.mxu0 %v21517_v62  ;;  %18230 = vmatpush3.bf16.msra.mxu1 %v21485_v1 }
 0x1f0   :  { %18090 = vmatprep.subr.bf16.mxu0 %v24148_v8  ;;  %18231 = vmatprep.subr.bf16.mxu1 %v24148_v8 }
 0x1f2   :  { %14495 = vmatmul.mubr.msk.f32.vlgmr.msra.gmra.mrb[2].mxu0 %vm1391_vm3, %v24285_v44 }
 0x1f3   :  { %18092 = vmatpush3.bf16.msra.mxu0 %v20661_v28  ;;  %18233 = vmatpush3.bf16.msra.mxu1 %v21501_v41 }
 0x1f4   :  { %18093 = vmatprep.subr.bf16.mxu0 %v24148_v8  ;;  %18234 = vmatprep.subr.bf16.mxu1 %v24148_v8 }
 0x1f5   :  { %14529 = vmatprep.mubr.msk.f32.mxu0 %vm20508_vm0, %v24209_v25 }
 0x1f6   :  { %14705 = vmatmul.mubr.msk.f32.vlgmr.msra.gmra.mrb[2].mxu1 %vm2058_vm4, %v24285_v44 }
 0x1f7   :  { %18095 = vmatpush3.bf16.msra.mxu0 %v24210_v49  ;;  %18236 = vmatpush3.bf16.msra.mxu1 %v20640_v20 }
 0x1f8   :  { %18096 = vmatprep.subr.bf16.mxu0 %v24148_v8  ;;  %18237 = vmatprep.subr.bf16.mxu1 %v24148_v8 }
 0x1f9   :  { %14739 = vmatprep.mubr.msk.f32.mxu1 %vm20508_vm0, %v24209_v25 }
 0x1fb   :  { %18098 = vmatpush3.bf16.msra.mxu0 %v24212_v52  ;;  %18239 = vmatpush3.bf16.msra.mxu1 %v20655_v27 }
 0x1fc   :  { %18099 = vmatprep.subr.bf16.mxu0 %v24148_v8  ;;  %18240 = vmatprep.subr.bf16.mxu1 %v24148_v8 }
 0x1ff   :  { %18101 = vmatpush3.bf16.msra.mxu0 %v24214_v37  ;;  %18242 = vmatpush3.bf16.msra.mxu1 %v20676_v34 }
 0x200   :  { %18102 = vmatprep.subr.bf16.mxu0 %v24148_v8  ;;  %18243 = vmatprep.subr.bf16.mxu1 %v24148_v8 }
 0x203   :  { %18104 = vmatpush3.bf16.msra.mxu0 %v24216_v32  ;;  %18245 = vmatpush3.bf16.msra.mxu1 %v24211_v54 }
 0x204   :  { %18105 = vmatprep.subr.bf16.mxu0 %v24148_v8  ;;  %18246 = vmatprep.subr.bf16.mxu1 %v24148_v8 }
 0x207   :  { %18107 = vmatpush3.bf16.msra.mxu0 %v24218_v46  ;;  %18248 = vmatpush3.bf16.msra.mxu1 %v24213_v24 }
 0x208   :  { %18108 = vmatprep.subr.bf16.mxu0 %v24148_v8  ;;  %18249 = vmatprep.subr.bf16.mxu1 %v24148_v8 }
 0x20b   :  { %18110 = vmatpush3.bf16.msra.mxu0 %v24220_v26  ;;  %18251 = vmatpush3.bf16.msra.mxu1 %v24215_v45 }
 0x20c   :  { %18111 = vmatprep.subr.bf16.mxu0 %v24148_v8  ;;  %18252 = vmatprep.subr.bf16.mxu1 %v24148_v8 }
 0x20f   :  { %18113 = vmatpush3.bf16.msra.mxu0 %v24227_v36  ;;  %18254 = vmatpush3.bf16.msra.mxu1 %v24217_v61 }
 0x210   :  { %18255 = vmatprep.subr.bf16.mxu1 %v24148_v8  ;;  %18258 = vmatprep.subr.bf16.mxu0 %v24148_v8 }
 0x212   :  { %14530 = vmatmul.mubr.msk.f32.vlgmr.msra.gmra.mrb[2].mxu0 %vm1391_vm3, %v24285_v44 }
 0x213   :  { %18257 = vmatpush3.bf16.msra.mxu1 %v24219_v60  ;;  %18260 = vmatpush3.bf16.msra.mxu0 %v20661_v28 }
 0x214   :  { %18261 = vmatprep.subr.bf16.mxu0 %v24148_v8  ;;  %18402 = vmatprep.subr.bf16.mxu1 %v24148_v8 }
 0x215   :  { %14774 = vmatprep.mubr.msk.f32.mxu0 %vm20508_vm0, %v24209_v25 }
 0x216   :  { %14740 = vmatmul.mubr.msk.f32.vlgmr.msra.gmra.mrb[2].mxu1 %vm2058_vm4, %v24285_v44  ;;  %vm11916_vm4 = vcmask 7168  }
 0x217   :  { %18263 = vmatpush3.bf16.msra.mxu0 %v24210_v49  ;;  %18404 = vmatpush3.bf16.msra.mxu1 %v20661_v28 }
 0x218   :  { %18264 = vmatprep.subr.bf16.mxu0 %v24148_v8  ;;  %18405 = vmatprep.subr.bf16.mxu1 %v24148_v8 }
 0x219   :  { %14984 = vmatprep.mubr.msk.f32.mxu1 %vm20508_vm0, %v24209_v25 }
 0x21b   :  { %18266 = vmatpush3.bf16.msra.mxu0 %v24212_v52  ;;  %18407 = vmatpush3.bf16.msra.mxu1 %v24210_v49 }
 0x21c   :  { %18267 = vmatprep.subr.bf16.mxu0 %v24148_v8  ;;  %18408 = vmatprep.subr.bf16.mxu1 %v24148_v8 }
 0x21f   :  { %18269 = vmatpush3.bf16.msra.mxu0 %v24214_v37  ;;  %18410 = vmatpush3.bf16.msra.mxu1 %v24212_v52 }
 0x220   :  { %18270 = vmatprep.subr.bf16.mxu0 %v24148_v8  ;;  %18411 = vmatprep.subr.bf16.mxu1 %v24148_v8 }
 0x223   :  { %18272 = vmatpush3.bf16.msra.mxu0 %v24216_v32  ;;  %18413 = vmatpush3.bf16.msra.mxu1 %v24214_v37 }
 0x224   :  { %18273 = vmatprep.subr.bf16.mxu0 %v24148_v8  ;;  %18414 = vmatprep.subr.bf16.mxu1 %v24148_v8 }
 0x225   :  { %v21897_v41 = vpop.f32.mrb[0].mxu0 }
 0x226   :  { %24304 = vst [vmem:[#allocation18_spill] sm:$0xff] %v21897_v41  ;;  %v14111_v1 = vpop.f32.mrb[1].mxu0 }
 0x227   :  { %18275 = vmatpush3.bf16.msra.mxu0 %v24218_v46  ;;  %18416 = vmatpush3.bf16.msra.mxu1 %v24216_v32  ;;  %v3440_v1 = vand.u32 4294901760, %v21902_v48 }
 0x228   :  { %18276 = vmatprep.subr.bf16.mxu0 %v24148_v8  ;;  %18417 = vmatprep.subr.bf16.mxu1 %v24148_v8 }
 0x229   :  { %v21906_v50 = vpop.f32.mrb[0].mxu1  ;;  %v3441_v63 = vsub.f32 %v21902_v48, %v3440_v1 }
 0x22a   :  { %v14321_v7 = vpop.f32.mrb[1].mxu1  ;;  %v21910_v9 = vadd.f32 %v21906_v50, %v21897_v41 }
 0x22b   :  { %18278 = vmatpush3.bf16.msra.mxu0 %v24220_v26  ;;  %18419 = vmatpush3.bf16.msra.mxu1 %v24218_v46  ;;  %v2794_v7 = vand.u32 4294901760, %v2793_v18  ;;  %v3442_v43 = vand.u32 4294901760, %v3441_v63  ;;  %v24305_v63 = vand.u32 4294901760, %v21889_v21 }
 0x22c   :  { %18279 = vmatprep.subr.bf16.mxu0 %v24148_v8  ;;  %18420 = vmatprep.subr.bf16.mxu1 %v24148_v8 }
 0x22f   :  { %18281 = vmatpush3.bf16.msra.mxu0 %v24227_v36  ;;  %18422 = vmatpush3.bf16.msra.mxu1 %v24220_v26 }
 0x230   :  { %18282 = vmatprep.subr.bf16.mxu0 %v24148_v8  ;;  %18423 = vmatprep.subr.bf16.mxu1 %v24148_v8 }
 0x232   :  { %14775 = vmatmul.mubr.f32.vlgmr.msra.gmra.mrb[4].mxu0 %v2794_v7 }
 0x233   :  { %18284 = vmatpush3.bf16.msra.mxu0 %v20920_v10  ;;  %18425 = vmatpush3.bf16.msra.mxu1 %v24227_v36 }
 0x234   :  { %18285 = vmatprep.subr.bf16.mxu0 %v24148_v8  ;;  %18426 = vmatprep.subr.bf16.mxu1 %v24148_v8 }
 0x235   :  { %14809 = vmatprep.mubr.msk.f32.mxu0 %vm20508_vm0, %v24209_v25 }
 0x236   :  { %14985 = vmatmul.mubr.f32.vlgmr.msra.gmra.mrb[4].mxu1 %v3442_v43 }
 0x237   :  { %18287 = vmatpush3.bf16.msra.mxu0 %v20989_v14  ;;  %18428 = vmatpush3.bf16.msra.mxu1 %v20920_v10 }
 0x238   :  { %18288 = vmatprep.subr.bf16.mxu0 %v24148_v8  ;;  %18429 = vmatprep.subr.bf16.mxu1 %v24148_v8 }
 0x239   :  { %15019 = vmatprep.mubr.msk.f32.mxu1 %vm20508_vm0, %v24209_v25 }
 0x23b   :  { %18290 = vmatpush3.bf16.msra.mxu0 %v21018_v23  ;;  %18431 = vmatpush3.bf16.msra.mxu1 %v20989_v14 }
 0x23c   :  { %18291 = vmatprep.subr.bf16.mxu0 %v24148_v8  ;;  %18432 = vmatprep.subr.bf16.mxu1 %v24148_v8 }
 0x23f   :  { %18293 = vmatpush3.bf16.msra.mxu0 %v21070_v38  ;;  %18434 = vmatpush3.bf16.msra.mxu1 %v21018_v23 }
 0x240   :  { %18294 = vmatprep.subr.bf16.mxu0 %v24148_v8  ;;  %18435 = vmatprep.subr.bf16.mxu1 %v24148_v8 }
 0x243   :  { %18296 = vmatpush3.bf16.msra.mxu0 %v21092_v30  ;;  %18437 = vmatpush3.bf16.msra.mxu1 %v21070_v38 }
 0x244   :  { %18297 = vmatprep.subr.bf16.mxu0 %v24148_v8  ;;  %18438 = vmatprep.subr.bf16.mxu1 %v24148_v8 }
 0x247   :  { %18299 = vmatpush3.bf16.msra.mxu0 %v21153_v59  ;;  %18440 = vmatpush3.bf16.msra.mxu1 %v21092_v30 }
 0x248   :  { %18300 = vmatprep.subr.bf16.mxu0 %v24148_v8  ;;  %18441 = vmatprep.subr.bf16.mxu1 %v24148_v8 }
 0x24b   :  { %18302 = vmatpush3.bf16.msra.mxu0 %v21176_v42  ;;  %18443 = vmatpush3.bf16.msra.mxu1 %v21153_v59 }
 0x24c   :  { %18303 = vmatprep.subr.bf16.mxu0 %v24148_v8  ;;  %18444 = vmatprep.subr.bf16.mxu1 %v24148_v8 }
 0x24f   :  { %18305 = vmatpush3.bf16.msra.mxu0 %v21189_v15  ;;  %18446 = vmatpush3.bf16.msra.mxu1 %v21176_v42 }
 0x250   :  { %18306 = vmatprep.subr.bf16.mxu0 %v24148_v8  ;;  %18447 = vmatprep.subr.bf16.mxu1 %v24148_v8 }
 0x252   :  { %14810 = vmatmul.mubr.msk.f32.vlgmr.msra.gmra.mrb[4].mxu0 %vm2706_vm5, %v24285_v44 }
 0x253   :  { %18308 = vmatpush3.bf16.msra.mxu0 %v21158_v35  ;;  %18449 = vmatpush3.bf16.msra.mxu1 %v21189_v15 }
 0x254   :  { %18309 = vmatprep.subr.bf16.mxu0 %v24148_v8  ;;  %18450 = vmatprep.subr.bf16.mxu1 %v24148_v8 }
 0x255   :  { %14844 = vmatprep.mubr.msk.f32.mxu0 %vm20508_vm0, %v24209_v25 }
 0x256   :  { %15020 = vmatmul.mubr.msk.f32.vlgmr.msra.gmra.mrb[6].mxu1 %vm3354_vm6, %v24285_v44 }
 0x257   :  { %18311 = vmatpush3.bf16.msra.mxu0 %v21174_v55  ;;  %18452 = vmatpush3.bf16.msra.mxu1 %v21158_v35 }
 0x258   :  { %18312 = vmatprep.subr.bf16.mxu0 %v24148_v8  ;;  %18453 = vmatprep.subr.bf16.mxu1 %v24148_v8 }
 0x259   :  { %15054 = vmatprep.mubr.msk.f32.mxu1 %vm20508_vm0, %v24209_v25  ;;  %v22157_v56 = vpop.permute.xlu1 %4664 }
 0x25a   :  { %vm4666_vm8 = vcmp.eq.s32.totalorder %v22157_v56, %v21239_v33 }
 0x25b   :  { %18314 = vmatpush3.bf16.msra.mxu0 %v24287_v12  ;;  %18455 = vmatpush3.bf16.msra.mxu1 %v21174_v55 }
 0x25c   :  { %18315 = vmatprep.subr.bf16.mxu0 %v24148_v8  ;;  %18456 = vmatprep.subr.bf16.mxu1 %v24148_v8  ;;  %v22147_v43 = vpop.permute.xlu0 %4017 }
 0x25d   :  { %vm4019_vm7 = vcmp.eq.s32.totalorder %v22147_v43, %v21239_v33  ;;  %v22458_v43 = vpop.permute.xlu1 %5311 }
 0x25e   :  { %v12018_v40 = vsel %vm4019_vm7, 1.0, %v24209_v25  ;;  %vm5313_vm9 = vcmp.eq.s32.totalorder %v22458_v43, %v21239_v33 }
 0x25f   :  { %18317 = vmatpush3.bf16.msra.mxu0 %v24289_v4  ;;  %18458 = vmatpush3.bf16.msra.mxu1 %v24287_v12  ;;  %v12026_v56 = vsel %vm5313_vm9, 1.0, %v24209_v25 }
 0x260   :  { %18318 = vmatprep.subr.bf16.mxu0 %v24148_v8  ;;  %18459 = vmatprep.subr.bf16.mxu1 %v24148_v8 }
 0x263   :  { %18320 = vmatpush3.bf16.msra.mxu0 %v24291_v57  ;;  %18461 = vmatpush3.bf16.msra.mxu1 %v24289_v4 }
 0x264   :  { %18321 = vmatprep.subr.bf16.mxu0 %v24148_v8  ;;  %18462 = vmatprep.subr.bf16.mxu1 %v24148_v8 }
 0x267   :  { %18323 = vmatpush3.bf16.msra.mxu0 %v24293_v53  ;;  %18464 = vmatpush3.bf16.msra.mxu1 %v24291_v57 }
 0x268   :  { %18324 = vmatprep.subr.bf16.mxu0 %v24148_v8  ;;  %18465 = vmatprep.subr.bf16.mxu1 %v24148_v8 }
 0x26b   :  { %18326 = vmatpush3.bf16.msra.mxu0 %v24295_v22  ;;  %18467 = vmatpush3.bf16.msra.mxu1 %v24293_v53 }
 0x26c   :  { %18327 = vmatprep.subr.bf16.mxu0 %v24148_v8  ;;  %18468 = vmatprep.subr.bf16.mxu1 %v24148_v8 }
 0x26f   :  { %18329 = vmatpush3.bf16.msra.mxu0 %v24297_v6  ;;  %18470 = vmatpush3.bf16.msra.mxu1 %v24295_v22 }
 0x270   :  { %18330 = vmatprep.subr.bf16.mxu0 %v24148_v8  ;;  %18471 = vmatprep.subr.bf16.mxu1 %v24148_v8 }
 0x272   :  { %14845 = vmatmul.mubr.f32.vlgmr.msra.gmra.mrb[4].mxu0 %v21889_v21  ;;  %v12022_v21 = vsel %vm4666_vm8, 1.0, %v24209_v25 }
 0x273   :  { %18332 = vmatpush3.bf16.msra.mxu0 %v20661_v28  ;;  %18473 = vmatpush3.bf16.msra.mxu1 %v24297_v6  ;;  %v22181_v18 = vsub.f32 %v12022_v21, %v12022_v21 }
 0x274   :  { %18333 = vmatprep.subr.bf16.mxu0 %v24148_v8  ;;  %18474 = vmatprep.subr.bf16.mxu1 %v24148_v8 }
 0x275   :  { %14879 = vmatprep.mubr.msk.f32.mxu0 %vm20508_vm0, %v24209_v25 }
 0x276   :  { %15055 = vmatmul.mubr.f32.vlgmr.msra.gmra.mrb[8].mxu1 %v21902_v48  ;;  %v22173_v48 = vsub.f32 %v12018_v40, %v12018_v40 }
 0x277   :  { %18335 = vmatpush3.bf16.msra.mxu0 %v24210_v49  ;;  %18476 = vmatpush3.bf16.msra.mxu1 %v20661_v28 }
 0x278   :  { %18336 = vmatprep.subr.bf16.mxu0 %v24148_v8  ;;  %18477 = vmatprep.subr.bf16.mxu1 %v24148_v8 }
 0x279   :  { %15089 = vmatprep.mubr.msk.f32.mxu1 %vm20508_vm0, %v24209_v25 }
 0x27b   :  { %18338 = vmatpush3.bf16.msra.mxu0 %v24212_v52  ;;  %18479 = vmatpush3.bf16.msra.mxu1 %v24210_v49 }
 0x27c   :  { %18339 = vmatprep.subr.bf16.mxu0 %v24148_v8  ;;  %18480 = vmatprep.subr.bf16.mxu1 %v24148_v8 }
 0x27f   :  { %18341 = vmatpush3.bf16.msra.mxu0 %v24214_v37  ;;  %18482 = vmatpush3.bf16.msra.mxu1 %v24212_v52 }
 0x280   :  { %18342 = vmatprep.subr.bf16.mxu0 %v24148_v8  ;;  %18483 = vmatprep.subr.bf16.mxu1 %v24148_v8 }
 0x283   :  { %18344 = vmatpush3.bf16.msra.mxu0 %v24216_v32  ;;  %18485 = vmatpush3.bf16.msra.mxu1 %v24214_v37 }
 0x284   :  { %18345 = vmatprep.subr.bf16.mxu0 %v24148_v8  ;;  %18486 = vmatprep.subr.bf16.mxu1 %v24148_v8 }
 0x287   :  { %18347 = vmatpush3.bf16.msra.mxu0 %v24218_v46  ;;  %18488 = vmatpush3.bf16.msra.mxu1 %v24216_v32 }
 0x288   :  { %18348 = vmatprep.subr.bf16.mxu0 %v24148_v8  ;;  %18489 = vmatprep.subr.bf16.mxu1 %v24148_v8 }
 0x28b   :  { %18350 = vmatpush3.bf16.msra.mxu0 %v24220_v26  ;;  %18491 = vmatpush3.bf16.msra.mxu1 %v24218_v46 }
 0x28c   :  { %18351 = vmatprep.subr.bf16.mxu0 %v24148_v8  ;;  %18492 = vmatprep.subr.bf16.mxu1 %v24148_v8 }
 0x28f   :  { %18353 = vmatpush3.bf16.msra.mxu0 %v24227_v36  ;;  %18494 = vmatpush3.bf16.msra.mxu1 %v24220_v26 }
 0x290   :  { %18354 = vmatprep.subr.bf16.mxu0 %v24148_v8  ;;  %18495 = vmatprep.subr.bf16.mxu1 %v24148_v8 }
 0x292   :  { %14880 = vmatmul.mubr.f32.vlgmr.msra.gmra.mrb[4].mxu0 %v24305_v63 }
 0x293   :  { %18356 = vmatpush3.bf16.msra.mxu0 %v21405_v29  ;;  %18497 = vmatpush3.bf16.msra.mxu1 %v24227_v36 }
 0x294   :  { %18357 = vmatprep.subr.bf16.mxu0 %v24148_v8  ;;  %18498 = vmatprep.subr.bf16.mxu1 %v24148_v8 }
 0x295   :  { %14914 = vmatprep.mubr.msk.f32.mxu0 %vm20508_vm0, %v24209_v25 }
 0x296   :  { %15090 = vmatmul.mubr.f32.vlgmr.msra.gmra.mrb[10].mxu1 %v3440_v1 }
 0x297   :  { %18359 = vmatpush3.bf16.msra.mxu0 %v21425_v0  ;;  %18500 = vmatpush3.bf16.msra.mxu1 %v21405_v29 }
 0x298   :  { %18360 = vmatprep.subr.bf16.mxu0 %v24148_v8  ;;  %18501 = vmatprep.subr.bf16.mxu1 %v24148_v8 }
 0x299   :  { %15124 = vmatprep.mubr.msk.f32.mxu1 %vm20508_vm0, %v24209_v25 }
 0x29b   :  { %18362 = vmatpush3.bf16.msra.mxu0 %v21443_v39  ;;  %18503 = vmatpush3.bf16.msra.mxu1 %v21425_v0 }
 0x29c   :  { %18363 = vmatprep.subr.bf16.mxu0 %v24148_v8  ;;  %18504 = vmatprep.subr.bf16.mxu1 %v24148_v8 }
 0x29f   :  { %18365 = vmatpush3.bf16.msra.mxu0 %v21459_v58  ;;  %18506 = vmatpush3.bf16.msra.mxu1 %v21443_v39 }
 0x2a0   :  { %18366 = vmatprep.subr.bf16.mxu0 %v24148_v8  ;;  %18507 = vmatprep.subr.bf16.mxu1 %v24148_v8 }
 0x2a3   :  { %18368 = vmatpush3.bf16.msra.mxu0 %v21475_v16  ;;  %18509 = vmatpush3.bf16.msra.mxu1 %v21459_v58 }
 0x2a4   :  { %18369 = vmatprep.subr.bf16.mxu0 %v24148_v8  ;;  %18510 = vmatprep.subr.bf16.mxu1 %v24148_v8 }
 0x2a7   :  { %18371 = vmatpush3.bf16.msra.mxu0 %v21491_v2  ;;  %18512 = vmatpush3.bf16.msra.mxu1 %v21475_v16 }
 0x2a8   :  { %18372 = vmatprep.subr.bf16.mxu0 %v24148_v8  ;;  %18513 = vmatprep.subr.bf16.mxu1 %v24148_v8 }
 0x2ab   :  { %18374 = vmatpush3.bf16.msra.mxu0 %v21507_v51  ;;  %18515 = vmatpush3.bf16.msra.mxu1 %v21491_v2  ;;  %v24114_v2 = vand.u32 4294901760, %v22181_v18 }
 0x2ac   :  { %18375 = vmatprep.subr.bf16.mxu0 %v24148_v8  ;;  %18516 = vmatprep.subr.bf16.mxu1 %v24148_v8 }
 0x2af   :  { %18377 = vmatpush3.bf16.msra.mxu0 %v21517_v62  ;;  %18518 = vmatpush3.bf16.msra.mxu1 %v21507_v51 }
 0x2b0   :  { %18378 = vmatprep.subr.bf16.mxu0 %v24148_v8  ;;  %18519 = vmatprep.subr.bf16.mxu1 %v24148_v8 }
 0x2b2   :  { %14915 = vmatmul.mubr.msk.f32.vlgmr.msra.gmra.mrb[4].mxu0 %vm2706_vm5, %v24285_v44 }
 0x2b3   :  { %18380 = vmatpush3.bf16.msra.mxu0 %v20661_v28  ;;  %18521 = vmatpush3.bf16.msra.mxu1 %v21517_v62 }
 0x2b4   :  { %18381 = vmatprep.subr.bf16.mxu0 %v24148_v8  ;;  %18522 = vmatprep.subr.bf16.mxu1 %v24148_v8 }
 0x2b5   :  { %14949 = vmatprep.mubr.msk.f32.mxu0 %vm20508_vm0, %v24209_v25 }
 0x2b6   :  { %15125 = vmatmul.mubr.msk.f32.vlgmr.msra.gmra.mrb[12].mxu1 %vm3354_vm6, %v24285_v44 }
 0x2b7   :  { %18383 = vmatpush3.bf16.msra.mxu0 %v24210_v49  ;;  %18524 = vmatpush3.bf16.msra.mxu1 %v20661_v28 }
 0x2b8   :  { %18384 = vmatprep.subr.bf16.mxu0 %v24148_v8  ;;  %18525 = vmatprep.subr.bf16.mxu1 %v24148_v8 }
 0x2b9   :  { %15159 = vmatprep.mubr.msk.f32.mxu1 %vm20508_vm0, %v24209_v25 }
 0x2bb   :  { %18386 = vmatpush3.bf16.msra.mxu0 %v24212_v52  ;;  %18527 = vmatpush3.bf16.msra.mxu1 %v24210_v49 }
 0x2bc   :  { %18387 = vmatprep.subr.bf16.mxu0 %v24148_v8  ;;  %18528 = vmatprep.subr.bf16.mxu1 %v24148_v8 }
 0x2bf   :  { %18389 = vmatpush3.bf16.msra.mxu0 %v24214_v37  ;;  %18530 = vmatpush3.bf16.msra.mxu1 %v24212_v52 }
 0x2c0   :  { %18390 = vmatprep.subr.bf16.mxu0 %v24148_v8  ;;  %18531 = vmatprep.subr.bf16.mxu1 %v24148_v8 }
 0x2c3   :  { %18392 = vmatpush3.bf16.msra.mxu0 %v24216_v32  ;;  %18533 = vmatpush3.bf16.msra.mxu1 %v24214_v37 }
 0x2c4   :  { %18393 = vmatprep.subr.bf16.mxu0 %v24148_v8  ;;  %18534 = vmatprep.subr.bf16.mxu1 %v24148_v8 }
 0x2c7   :  { %18395 = vmatpush3.bf16.msra.mxu0 %v24218_v46  ;;  %18536 = vmatpush3.bf16.msra.mxu1 %v24216_v32 }
 0x2c8   :  { %18396 = vmatprep.subr.bf16.mxu0 %v24148_v8  ;;  %18537 = vmatprep.subr.bf16.mxu1 %v24148_v8 }
 0x2cb   :  { %18398 = vmatpush3.bf16.msra.mxu0 %v24220_v26  ;;  %18539 = vmatpush3.bf16.msra.mxu1 %v24218_v46 }
 0x2cc   :  { %18399 = vmatprep.subr.bf16.mxu0 %v24148_v8  ;;  %18540 = vmatprep.subr.bf16.mxu1 %v24148_v8 }
 0x2cf   :  { %18401 = vmatpush3.bf16.msra.mxu0 %v24227_v36  ;;  %18542 = vmatpush3.bf16.msra.mxu1 %v24220_v26 }
 0x2d0   :  { %18543 = vmatprep.subr.bf16.mxu1 %v24148_v8  ;;  %18546 = vmatprep.subr.bf16.mxu0 %v24148_v8 }
 0x2d2   :  { %14950 = vmatmul.mubr.msk.f32.vlgmr.msra.gmra.mrb[4].mxu0 %vm2706_vm5, %v24285_v44  ;;  %vm11918_vm5 = vcmask 15360  }
 0x2d3   :  { %18545 = vmatpush3.bf16.msra.mxu1 %v24227_v36  ;;  %18548 = vmatpush3.bf16.msra.mxu0 %v20640_v20 }
 0x2d4   :  { %18549 = vmatprep.subr.bf16.mxu0 %v24148_v8  ;;  %18690 = vmatprep.subr.bf16.mxu1 %v24148_v8 }
 0x2d5   :  { %15194 = vmatprep.mubr.msk.f32.mxu0 %vm20508_vm0, %v24209_v25 }
 0x2d6   :  { %15160 = vmatmul.mubr.msk.f32.vlgmr.msra.gmra.mrb[14].mxu1 %vm3354_vm6, %v24285_v44  ;;  %vm11920_vm6 = vcmask 23552  }
 0x2d7   :  { %18551 = vmatpush3.bf16.msra.mxu0 %v20655_v27  ;;  %18692 = vmatpush3.bf16.msra.mxu1 %v20661_v28 }
 0x2d8   :  { %18552 = vmatprep.subr.bf16.mxu0 %v24148_v8  ;;  %18693 = vmatprep.subr.bf16.mxu1 %v24148_v8 }
 0x2d9   :  { %15404 = vmatprep.mubr.msk.f32.mxu1 %vm20508_vm0, %v24209_v25 }
 0x2db   :  { %18554 = vmatpush3.bf16.msra.mxu0 %v20676_v34  ;;  %18695 = vmatpush3.bf16.msra.mxu1 %v24210_v49 }
 0x2dc   :  { %18555 = vmatprep.subr.bf16.mxu0 %v24148_v8  ;;  %18696 = vmatprep.subr.bf16.mxu1 %v24148_v8 }
 0x2df   :  { %18557 = vmatpush3.bf16.msra.mxu0 %v24211_v54  ;;  %18698 = vmatpush3.bf16.msra.mxu1 %v24212_v52 }
 0x2e0   :  { %18558 = vmatprep.subr.bf16.mxu0 %v24148_v8  ;;  %18699 = vmatprep.subr.bf16.mxu1 %v24148_v8 }
 0x2e3   :  { %18560 = vmatpush3.bf16.msra.mxu0 %v24213_v24  ;;  %18701 = vmatpush3.bf16.msra.mxu1 %v24214_v37 }
 0x2e4   :  { %18561 = vmatprep.subr.bf16.mxu0 %v24148_v8  ;;  %18702 = vmatprep.subr.bf16.mxu1 %v24148_v8 }
 0x2e5   :  { %v22179_v1 = vpop.f32.mrb[2].mxu0 }
 0x2e6   :  { %24306 = vst [vmem:[#allocation21_spill] sm:$0xff] %v22179_v1  ;;  %v14531_v7 = vpop.f32.mrb[3].mxu0  ;;  %v2035_v62 = vadd.f32 %v22179_v1, %v21906_v50  ;;  %v2042_v40 = vadd.f32 %v22179_v1, %v21897_v41  ;;  %v22190_v51 = vmul.f32 %v21910_v9, %v22179_v1  ;;  %v24312_v1 = vand.u32 4294901760, %v22173_v48 }
 0x2e7   :  { %18563 = vmatpush3.bf16.msra.mxu0 %v24215_v45  ;;  %18704 = vmatpush3.bf16.msra.mxu1 %v24216_v32 }
 0x2e8   :  { %24307 = vst [vmem:[#allocation22_spill] sm:$0xff] %v22190_v51  ;;  %18564 = vmatprep.subr.bf16.mxu0 %v24148_v8  ;;  %18705 = vmatprep.subr.bf16.mxu1 %v24148_v8  ;;  %v22197_v21 = vmul.f32 %v2035_v62, %v21897_v41  ;;  %v22200_v7 = vmul.f32 %v2042_v40, %v21906_v50 }
 0x2e9   :  { %v22202_v63 = vpop.f32.mrb[2].mxu1  ;;  %v4106_v16 = vsub.f32 %v22173_v48, %v24312_v1  ;;  %v4753_v40 = vsub.f32 %v22181_v18, %v24114_v2  ;;  %v22251_v1 = vld [vmem:[%s23945_s3] sm:$0xff]  ;;  %v24316_v2 = vld [vmem:[#allocation41_spill] sm:$0xff] }
 0x2ea   :  { %24308 = vst [vmem:[#allocation23_spill] sm:$0xff] %v22197_v21  ;;  %24309 = vst [vmem:[#allocation24_spill] sm:$0xff] %v22200_v7  ;;  %v22207_v9 = vmul.f32 %v22202_v63, %v21897_v41  ;;  %v14741_v51 = vpop.f32.mrb[3].mxu1  ;;  %v24319_v7 = vld [vmem:[#allocation42_spill] sm:$0xff]  ;;  %v24320_v21 = vld [vmem:[#allocation43_spill] sm:$0xff] }
 0x2eb   :  { %24310 = vst [vmem:[#allocation25_spill] sm:$0xff] %v22202_v63  ;;  %18566 = vmatpush3.bf16.msra.mxu0 %v24217_v61  ;;  %18707 = vmatpush3.bf16.msra.mxu1 %v24218_v46  ;;  %v4107_v62 = vand.u32 4294901760, %v4106_v16  ;;  %v4754_v51 = vand.u32 4294901760, %v4753_v40  ;;  %v20512_v16 = vmov 2   ;;  %v24318_v63 = vld [vmem:[#allocation40_spill] sm:$0xff] }
 0x2ec   :  { %24311 = vst [vmem:[#allocation26_spill] sm:$0xff] %v22207_v9  ;;  %18567 = vmatprep.subr.bf16.mxu0 %v24148_v8  ;;  %18708 = vmatprep.subr.bf16.mxu1 %v24148_v8  ;;  %v24321_v9 = vld [vmem:[#allocation46_spill] sm:$0xff] }
 0x2ed   :  { %20439 = vset.pattern.permute.xlu1 %v20512_v16  ;;  %20438 = vset.pattern.permute.xlu0 %v20512_v16  ;;  %v24315_v16 = vld [vmem:[#allocation36_spill] sm:$0xff] }
 0x2ee   :  { %6623 = vperm.xlu1 %20439, %v21786_v31   ;;  %5976 = vperm.xlu0 %20438, %v22251_v1   ;;  %v22261_v31 = vld [vmem:[%s23946_s4] sm:$0xff] }
 0x2ef   :  { %18569 = vmatpush3.bf16.msra.mxu0 %v24219_v60  ;;  %18710 = vmatpush3.bf16.msra.mxu1 %v24220_v26  ;;  %24314 = vst [vmem:[#allocation27_spill] sm:$0xff] %v22261_v31 }
 0x2f0   :  { %18570 = vmatprep.subr.bf16.mxu0 %v24148_v8  ;;  %18711 = vmatprep.subr.bf16.mxu1 %v24148_v8 }
 0x2f2   :  { %15195 = vmatmul.mubr.f32.vlgmr.msra.gmra.mrb[6].mxu0 %v4107_v62  ;;  %v24313_v62 = vld [vmem:[#allocation30_spill] sm:$0xff]  ;;  %7270 = vperm.xlu1 %20439, %v22261_v31  }
 0x2f3   :  { %18572 = vmatpush3.bf16.msra.mxu0 %v20890_v13  ;;  %18713 = vmatpush3.bf16.msra.mxu1 %v24227_v36 }
 0x2f4   :  { %18573 = vmatprep.subr.bf16.mxu0 %v24148_v8  ;;  %18714 = vmatprep.subr.bf16.mxu1 %v24148_v8 }
 0x2f5   :  { %15229 = vmatprep.mubr.msk.f32.mxu0 %vm20508_vm0, %v24209_v25 }
 0x2f6   :  { %15405 = vmatmul.mubr.f32.vlgmr.msra.gmra.mrb[16].mxu1 %v4754_v51 }
 0x2f7   :  { %18575 = vmatpush3.bf16.msra.mxu0 %v20906_v5  ;;  %18716 = vmatpush3.bf16.msra.mxu1 %v20920_v10 }
 0x2f8   :  { %18576 = vmatprep.subr.bf16.mxu0 %v24148_v8  ;;  %18717 = vmatprep.subr.bf16.mxu1 %v24148_v8 }
 0x2f9   :  { %15439 = vmatprep.mubr.msk.f32.mxu1 %vm20508_vm0, %v24209_v25 }
 0x2fb   :  { %18578 = vmatpush3.bf16.msra.mxu0 %v20938_v11  ;;  %18719 = vmatpush3.bf16.msra.mxu1 %v20989_v14 }
 0x2fc   :  { %18579 = vmatprep.subr.bf16.mxu0 %v24148_v8  ;;  %18720 = vmatprep.subr.bf16.mxu1 %v24148_v8 }
 0x2ff   :  { %18581 = vmatpush3.bf16.msra.mxu0 %v20998_v17  ;;  %18722 = vmatpush3.bf16.msra.mxu1 %v21018_v23 }
 0x300   :  { %18582 = vmatprep.subr.bf16.mxu0 %v24148_v8  ;;  %18723 = vmatprep.subr.bf16.mxu1 %v24148_v8 }
 0x303   :  { %18584 = vmatpush3.bf16.msra.mxu0 %v21038_v47  ;;  %18725 = vmatpush3.bf16.msra.mxu1 %v21070_v38 }
 0x304   :  { %18585 = vmatprep.subr.bf16.mxu0 %v24148_v8  ;;  %18726 = vmatprep.subr.bf16.mxu1 %v24148_v8 }
 0x307   :  { %18587 = vmatpush3.bf16.msra.mxu0 %v24313_v62  ;;  %18728 = vmatpush3.bf16.msra.mxu1 %v21092_v30 }
 0x308   :  { %18588 = vmatprep.subr.bf16.mxu0 %v24148_v8  ;;  %18729 = vmatprep.subr.bf16.mxu1 %v24148_v8 }
 0x309   :  { %v3444_v40 = vpop.f32.mrb[4].mxu1 }
 0x30a   :  { %v14986_v51 = vpop.f32.mrb[5].mxu1 }
 0x30b   :  { %18590 = vmatpush3.bf16.msra.mxu0 %v24315_v16  ;;  %18731 = vmatpush3.bf16.msra.mxu1 %v21153_v59  ;;  %v24317_v51 = vld [vmem:[#allocation37_spill] sm:$0xff] }
 0x30c   :  { %18591 = vmatprep.subr.bf16.mxu0 %v24148_v8  ;;  %18732 = vmatprep.subr.bf16.mxu1 %v24148_v8 }
 0x30f   :  { %18593 = vmatpush3.bf16.msra.mxu0 %v24316_v2  ;;  %18734 = vmatpush3.bf16.msra.mxu1 %v21176_v42 }
 0x310   :  { %18594 = vmatprep.subr.bf16.mxu0 %v24148_v8  ;;  %18735 = vmatprep.subr.bf16.mxu1 %v24148_v8 }
 0x312   :  { %15230 = vmatmul.mubr.msk.f32.vlgmr.msra.gmra.mrb[6].mxu0 %vm4019_vm7, %v24285_v44 }
 0x313   :  { %18596 = vmatpush3.bf16.msra.mxu0 %v24317_v51  ;;  %18737 = vmatpush3.bf16.msra.mxu1 %v21189_v15 }
 0x314   :  { %18597 = vmatprep.subr.bf16.mxu0 %v24148_v8  ;;  %18738 = vmatprep.subr.bf16.mxu1 %v24148_v8 }
 0x315   :  { %15264 = vmatprep.mubr.msk.f32.mxu0 %vm20508_vm0, %v24209_v25 }
 0x316   :  { %15440 = vmatmul.mubr.msk.f32.vlgmr.msra.gmra.mrb[16].mxu1 %vm4666_vm8, %v24285_v44 }
 0x317   :  { %18599 = vmatpush3.bf16.msra.mxu0 %v24318_v63  ;;  %18740 = vmatpush3.bf16.msra.mxu1 %v21158_v35  ;;  %v24322_v63 = vld [vmem:[#allocation51_spill] sm:$0xff] }
 0x318   :  { %18600 = vmatprep.subr.bf16.mxu0 %v24148_v8  ;;  %18741 = vmatprep.subr.bf16.mxu1 %v24148_v8 }
 0x319   :  { %15474 = vmatprep.mubr.msk.f32.mxu1 %vm20508_vm0, %v24209_v25 }
 0x31b   :  { %18602 = vmatpush3.bf16.msra.mxu0 %v24319_v7  ;;  %18743 = vmatpush3.bf16.msra.mxu1 %v21174_v55 }
 0x31c   :  { %18603 = vmatprep.subr.bf16.mxu0 %v24148_v8  ;;  %18744 = vmatprep.subr.bf16.mxu1 %v24148_v8 }
 0x31f   :  { %18605 = vmatpush3.bf16.msra.mxu0 %v24320_v21  ;;  %18746 = vmatpush3.bf16.msra.mxu1 %v24287_v12 }
 0x320   :  { %18606 = vmatprep.subr.bf16.mxu0 %v24148_v8  ;;  %18747 = vmatprep.subr.bf16.mxu1 %v24148_v8 }
 0x323   :  { %18608 = vmatpush3.bf16.msra.mxu0 %v24321_v9  ;;  %18749 = vmatpush3.bf16.msra.mxu1 %v24289_v4  ;;  %v24323_v9 = vld [vmem:[#allocation53_spill] sm:$0xff] }
 0x324   :  { %18609 = vmatprep.subr.bf16.mxu0 %v24148_v8  ;;  %18750 = vmatprep.subr.bf16.mxu1 %v24148_v8 }
 0x327   :  { %18611 = vmatpush3.bf16.msra.mxu0 %v24296_v3  ;;  %18752 = vmatpush3.bf16.msra.mxu1 %v24291_v57  ;;  %v24339_v3 = vld [vmem:[#allocation21_spill] sm:$0xff] }
 0x328   :  { %18612 = vmatprep.subr.bf16.mxu0 %v24148_v8  ;;  %18753 = vmatprep.subr.bf16.mxu1 %v24148_v8 }
 0x329   :  { %v3595_v41 = vpop.f32.mrb[6].mxu1 }
 0x32a   :  { %v3596_v21 = vadd.f32 %v3595_v41, %v3444_v40  ;;  %v15021_v7 = vpop.f32.mrb[7].mxu1 }
 0x32b   :  { %18614 = vmatpush3.bf16.msra.mxu0 %v24322_v63  ;;  %18755 = vmatpush3.bf16.msra.mxu1 %v24293_v53  ;;  %v24334_v63 = vld [vmem:[#allocation19_spill] sm:$0xff] }
 0x32c   :  { %18615 = vmatprep.subr.bf16.mxu0 %v24148_v8  ;;  %18756 = vmatprep.subr.bf16.mxu1 %v24148_v8 }
 0x32f   :  { %18617 = vmatpush3.bf16.msra.mxu0 %v24323_v9  ;;  %18758 = vmatpush3.bf16.msra.mxu1 %v24295_v22  ;;  %v24324_v9 = vand.u32 4294901760, %v22173_v48 }
 0x330   :  { %18618 = vmatprep.subr.bf16.mxu0 %v24148_v8  ;;  %18759 = vmatprep.subr.bf16.mxu1 %v24148_v8 }
 0x332   :  { %15265 = vmatmul.mubr.f32.vlgmr.msra.gmra.mrb[6].mxu0 %v22173_v48  ;;  %v24327_v48 = vld [vmem:[#allocation10_spill] sm:$0xff] }
 0x333   :  { %18620 = vmatpush3.bf16.msra.mxu0 %v20640_v20  ;;  %18761 = vmatpush3.bf16.msra.mxu1 %v24297_v6 }
 0x334   :  { %18621 = vmatprep.subr.bf16.mxu0 %v24148_v8  ;;  %18762 = vmatprep.subr.bf16.mxu1 %v24148_v8 }
 0x335   :  { %15299 = vmatprep.mubr.msk.f32.mxu0 %vm20508_vm0, %v24209_v25 }
 0x336   :  { %15475 = vmatmul.mubr.f32.vlgmr.msra.gmra.mrb[16].mxu1 %v22181_v18 }
 0x337   :  { %18623 = vmatpush3.bf16.msra.mxu0 %v20655_v27  ;;  %18764 = vmatpush3.bf16.msra.mxu1 %v20661_v28 }
 0x338   :  { %18624 = vmatprep.subr.bf16.mxu0 %v24148_v8  ;;  %18765 = vmatprep.subr.bf16.mxu1 %v24148_v8 }
 0x339   :  { %15509 = vmatprep.mubr.msk.f32.mxu1 %vm20508_vm0, %v24209_v25 }
 0x33b   :  { %18626 = vmatpush3.bf16.msra.mxu0 %v20676_v34  ;;  %18767 = vmatpush3.bf16.msra.mxu1 %v24210_v49 }
 0x33c   :  { %18627 = vmatprep.subr.bf16.mxu0 %v24148_v8  ;;  %18768 = vmatprep.subr.bf16.mxu1 %v24148_v8 }
 0x33f   :  { %18629 = vmatpush3.bf16.msra.mxu0 %v24211_v54  ;;  %18770 = vmatpush3.bf16.msra.mxu1 %v24212_v52 }
 0x340   :  { %18630 = vmatprep.subr.bf16.mxu0 %v24148_v8  ;;  %18771 = vmatprep.subr.bf16.mxu1 %v24148_v8 }
 0x343   :  { %18632 = vmatpush3.bf16.msra.mxu0 %v24213_v24  ;;  %18773 = vmatpush3.bf16.msra.mxu1 %v24214_v37 }
 0x344   :  { %18633 = vmatprep.subr.bf16.mxu0 %v24148_v8  ;;  %18774 = vmatprep.subr.bf16.mxu1 %v24148_v8 }
 0x347   :  { %18635 = vmatpush3.bf16.msra.mxu0 %v24215_v45  ;;  %18776 = vmatpush3.bf16.msra.mxu1 %v24216_v32 }
 0x348   :  { %18636 = vmatprep.subr.bf16.mxu0 %v24148_v8  ;;  %18777 = vmatprep.subr.bf16.mxu1 %v24148_v8 }
 0x349   :  { %v3699_v41 = vpop.f32.mrb[8].mxu1 }
 0x34a   :  { %v3700_v7 = vadd.f32 %v3699_v41, %v3596_v21  ;;  %v15056_v40 = vpop.f32.mrb[9].mxu1  ;;  %v24325_v21 = vand.u32 4294901760, %v22181_v18  ;;  %v24326_v41 = vld [vmem:[#allocation9_spill] sm:$0xff]  ;;  %v24328_v18 = vld [vmem:[#allocation11_spill] sm:$0xff] }
 0x34b   :  { %18638 = vmatpush3.bf16.msra.mxu0 %v24217_v61  ;;  %18779 = vmatpush3.bf16.msra.mxu1 %v24218_v46  ;;  %v24330_v40 = vld [vmem:[#allocation13_spill] sm:$0xff] }
 0x34c   :  { %18639 = vmatprep.subr.bf16.mxu0 %v24148_v8  ;;  %18780 = vmatprep.subr.bf16.mxu1 %v24148_v8 }
 0x34f   :  { %18641 = vmatpush3.bf16.msra.mxu0 %v24219_v60  ;;  %18782 = vmatpush3.bf16.msra.mxu1 %v24220_v26 }
 0x350   :  { %18642 = vmatprep.subr.bf16.mxu0 %v24148_v8  ;;  %18783 = vmatprep.subr.bf16.mxu1 %v24148_v8 }
 0x352   :  { %15300 = vmatmul.mubr.f32.vlgmr.msra.gmra.mrb[6].mxu0 %v24324_v9  ;;  %v24329_v9 = vld [vmem:[#allocation12_spill] sm:$0xff] }
 0x353   :  { %18644 = vmatpush3.bf16.msra.mxu0 %v21387_v19  ;;  %18785 = vmatpush3.bf16.msra.mxu1 %v24227_v36  ;;  %v24332_v19 = vld [vmem:[#allocation15_spill] sm:$0xff] }
 0x354   :  { %18645 = vmatprep.subr.bf16.mxu0 %v24148_v8  ;;  %18786 = vmatprep.subr.bf16.mxu1 %v24148_v8 }
 0x355   :  { %15334 = vmatprep.mubr.msk.f32.mxu0 %vm20508_vm0, %v24209_v25 }
 0x356   :  { %15510 = vmatmul.mubr.f32.vlgmr.msra.gmra.mrb[16].mxu1 %v24325_v21  ;;  %v24331_v21 = vld [vmem:[#allocation14_spill] sm:$0xff] }
 0x357   :  { %18647 = vmatpush3.bf16.msra.mxu0 %v24326_v41  ;;  %18788 = vmatpush3.bf16.msra.mxu1 %v21405_v29 }
 0x358   :  { %18648 = vmatprep.subr.bf16.mxu0 %v24148_v8  ;;  %18789 = vmatprep.subr.bf16.mxu1 %v24148_v8 }
 0x359   :  { %15544 = vmatprep.mubr.msk.f32.mxu1 %vm20508_vm0, %v24209_v25 }
 0x35b   :  { %18650 = vmatpush3.bf16.msra.mxu0 %v24327_v48  ;;  %18791 = vmatpush3.bf16.msra.mxu1 %v21425_v0 }
 0x35c   :  { %18651 = vmatprep.subr.bf16.mxu0 %v24148_v8  ;;  %18792 = vmatprep.subr.bf16.mxu1 %v24148_v8 }
 0x35f   :  { %18653 = vmatpush3.bf16.msra.mxu0 %v24328_v18  ;;  %18794 = vmatpush3.bf16.msra.mxu1 %v21443_v39 }
 0x360   :  { %18654 = vmatprep.subr.bf16.mxu0 %v24148_v8  ;;  %18795 = vmatprep.subr.bf16.mxu1 %v24148_v8 }
 0x363   :  { %18656 = vmatpush3.bf16.msra.mxu0 %v24329_v9  ;;  %18797 = vmatpush3.bf16.msra.mxu1 %v21459_v58  ;;  %v24333_v9 = vld [vmem:[#allocation16_spill] sm:$0xff] }
 0x364   :  { %18657 = vmatprep.subr.bf16.mxu0 %v24148_v8  ;;  %18798 = vmatprep.subr.bf16.mxu1 %v24148_v8 }
 0x367   :  { %18659 = vmatpush3.bf16.msra.mxu0 %v24330_v40  ;;  %18800 = vmatpush3.bf16.msra.mxu1 %v24331_v21  ;;  %v24335_v40 = vld [vmem:[#allocation20_spill] sm:$0xff] }
 0x368   :  { %18660 = vmatprep.subr.bf16.mxu0 %v24148_v8  ;;  %18801 = vmatprep.subr.bf16.mxu1 %v24148_v8 }
 0x369   :  { %v3788_v18 = vpop.f32.mrb[10].mxu1 }
 0x36a   :  { %v3789_v48 = vadd.f32 %v3788_v18, %v3700_v7  ;;  %v15091_v41 = vpop.f32.mrb[11].mxu1  ;;  %v24336_v7 = vld [vmem:[#allocation17_spill] sm:$0xff] }
 0x36b   :  { %18662 = vmatpush3.bf16.msra.mxu0 %v24332_v19  ;;  %18803 = vmatpush3.bf16.msra.mxu1 %v24333_v9 }
 0x36c   :  { %18663 = vmatprep.subr.bf16.mxu0 %v24148_v8  ;;  %18804 = vmatprep.subr.bf16.mxu1 %v24148_v8 }
 0x36f   :  { %18665 = vmatpush3.bf16.msra.mxu0 %v24334_v63  ;;  %18806 = vmatpush3.bf16.msra.mxu1 %v24335_v40 }
 0x370   :  { %18666 = vmatprep.subr.bf16.mxu0 %v24148_v8  ;;  %18807 = vmatprep.subr.bf16.mxu1 %v24148_v8 }
 0x372   :  { %15335 = vmatmul.mubr.msk.f32.vlgmr.msra.gmra.mrb[6].mxu0 %vm4019_vm7, %v24285_v44 }
 0x373   :  { %18668 = vmatpush3.bf16.msra.mxu0 %v20640_v20  ;;  %18809 = vmatpush3.bf16.msra.mxu1 %v24336_v7 }
 0x374   :  { %18669 = vmatprep.subr.bf16.mxu0 %v24148_v8  ;;  %18810 = vmatprep.subr.bf16.mxu1 %v24148_v8 }
 0x375   :  { %15369 = vmatprep.mubr.msk.f32.mxu0 %vm20508_vm0, %v24209_v25 }
 0x376   :  { %15545 = vmatmul.mubr.msk.f32.vlgmr.msra.gmra.mrb[16].mxu1 %vm4666_vm8, %v24285_v44 }
 0x377   :  { %18671 = vmatpush3.bf16.msra.mxu0 %v20655_v27  ;;  %18812 = vmatpush3.bf16.msra.mxu1 %v20661_v28 }
 0x378   :  { %18672 = vmatprep.subr.bf16.mxu0 %v24148_v8  ;;  %18813 = vmatprep.subr.bf16.mxu1 %v24148_v8 }
 0x379   :  { %15579 = vmatprep.mubr.msk.f32.mxu1 %vm20508_vm0, %v24209_v25 }
 0x37b   :  { %18674 = vmatpush3.bf16.msra.mxu0 %v20676_v34  ;;  %18815 = vmatpush3.bf16.msra.mxu1 %v24210_v49 }
 0x37c   :  { %18675 = vmatprep.subr.bf16.mxu0 %v24148_v8  ;;  %18816 = vmatprep.subr.bf16.mxu1 %v24148_v8 }
 0x37f   :  { %18677 = vmatpush3.bf16.msra.mxu0 %v24211_v54  ;;  %18818 = vmatpush3.bf16.msra.mxu1 %v24212_v52 }
 0x380   :  { %18678 = vmatprep.subr.bf16.mxu0 %v24148_v8  ;;  %18819 = vmatprep.subr.bf16.mxu1 %v24148_v8 }
 0x383   :  { %18680 = vmatpush3.bf16.msra.mxu0 %v24213_v24  ;;  %18821 = vmatpush3.bf16.msra.mxu1 %v24214_v37 }
 0x384   :  { %18681 = vmatprep.subr.bf16.mxu0 %v24148_v8  ;;  %18822 = vmatprep.subr.bf16.mxu1 %v24148_v8 }
 0x387   :  { %18683 = vmatpush3.bf16.msra.mxu0 %v24215_v45  ;;  %18824 = vmatpush3.bf16.msra.mxu1 %v24216_v32 }
 0x388   :  { %18684 = vmatprep.subr.bf16.mxu0 %v24148_v8  ;;  %18825 = vmatprep.subr.bf16.mxu1 %v24148_v8 }
 0x389   :  { %v3907_v41 = vpop.f32.mrb[12].mxu1 }
 0x38a   :  { %v3908_v18 = vadd.f32 %v3907_v41, %v3789_v48  ;;  %v15126_v63 = vpop.f32.mrb[13].mxu1 }
 0x38b   :  { %18686 = vmatpush3.bf16.msra.mxu0 %v24217_v61  ;;  %18827 = vmatpush3.bf16.msra.mxu1 %v24218_v46  ;;  %v22476_v63 = vsub.f32 %v12026_v56, %v12026_v56 }
 0x38c   :  { %18687 = vmatprep.subr.bf16.mxu0 %v24148_v8  ;;  %18828 = vmatprep.subr.bf16.mxu1 %v24148_v8 }
 0x38d   :  { %v5399_v56 = vand.u32 4294901760, %v22476_v63 }
 0x38f   :  { %18689 = vmatpush3.bf16.msra.mxu0 %v24219_v60  ;;  %18830 = vmatpush3.bf16.msra.mxu1 %v24220_v26 }
 0x390   :  { %18831 = vmatprep.subr.bf16.mxu1 %v24148_v8  ;;  %18834 = vmatprep.subr.bf16.mxu0 %v24148_v8 }
 0x392   :  { %15370 = vmatmul.mubr.msk.f32.vlgmr.msra.gmra.mrb[6].mxu0 %vm4019_vm7, %v24285_v44  ;;  %vm11922_vm7 = vcmask 31744  }
 0x393   :  { %18833 = vmatpush3.bf16.msra.mxu1 %v24227_v36  ;;  %18836 = vmatpush3.bf16.msra.mxu0 %v20661_v28 }
 0x394   :  { %18837 = vmatprep.subr.bf16.mxu0 %v24148_v8  ;;  %18858 = vmatprep.subr.bf16.mxu1 %v24148_v8 }
 0x395   :  { %15614 = vmatprep.mubr.msk.f32.mxu0 %vm20508_vm0, %v24209_v25 }
 0x396   :  { %15580 = vmatmul.mubr.msk.f32.vlgmr.msra.gmra.mrb[16].mxu1 %vm4666_vm8, %v24285_v44  ;;  %vm11924_vm8 = vcmask 39936  }
 0x397   :  { %18839 = vmatpush3.bf16.msra.mxu0 %v24210_v49  ;;  %18860 = vmatpush3.bf16.msra.mxu1 %v20920_v10 }
 0x398   :  { %18840 = vmatprep.subr.bf16.mxu0 %v24148_v8  ;;  %18861 = vmatprep.subr.bf16.mxu1 %v24148_v8 }
 0x399   :  { %15649 = vmatprep.mubr.msk.f32.mxu1 %vm20508_vm0, %v24209_v25 }
 0x39b   :  { %18842 = vmatpush3.bf16.msra.mxu0 %v24212_v52  ;;  %18863 = vmatpush3.bf16.msra.mxu1 %v20989_v14 }
 0x39c   :  { %18843 = vmatprep.subr.bf16.mxu0 %v24148_v8  ;;  %18864 = vmatprep.subr.bf16.mxu1 %v24148_v8 }
 0x39f   :  { %18845 = vmatpush3.bf16.msra.mxu0 %v24214_v37  ;;  %18866 = vmatpush3.bf16.msra.mxu1 %v21018_v23 }
 0x3a0   :  { %18846 = vmatprep.subr.bf16.mxu0 %v24148_v8  ;;  %18867 = vmatprep.subr.bf16.mxu1 %v24148_v8 }
 0x3a3   :  { %18848 = vmatpush3.bf16.msra.mxu0 %v24216_v32  ;;  %18869 = vmatpush3.bf16.msra.mxu1 %v21070_v38 }
 0x3a4   :  { %18849 = vmatprep.subr.bf16.mxu0 %v24148_v8  ;;  %18870 = vmatprep.subr.bf16.mxu1 %v24148_v8 }
 0x3a5   :  { %v22480_v48 = vpop.f32.mrb[4].mxu0 }
 0x3a6   :  { %24337 = vst [vmem:[#allocation28_spill] sm:$0xff] %v22480_v48  ;;  %v14951_v41 = vpop.f32.mrb[5].mxu0  ;;  %v22484_v19 = vmul.f32 %v22480_v48, %v21906_v50  ;;  %v22488_v51 = vmul.f32 %v22480_v48, %v24339_v3  ;;  %v5400_v48 = vsub.f32 %v22476_v63, %v5399_v56 }
 0x3a7   :  { %18851 = vmatpush3.bf16.msra.mxu0 %v24218_v46  ;;  %18872 = vmatpush3.bf16.msra.mxu1 %v21092_v30 }
 0x3a8   :  { %24338 = vst [vmem:[#allocation29_spill] sm:$0xff] %v22484_v19  ;;  %24340 = vst [vmem:[#allocation31_spill] sm:$0xff] %v22488_v51  ;;  %18852 = vmatprep.subr.bf16.mxu0 %v24148_v8  ;;  %18873 = vmatprep.subr.bf16.mxu1 %v24148_v8  ;;  %v5401_v51 = vand.u32 4294901760, %v5400_v48  ;;  %v24348_v19 = vld [vmem:[#allocation46_spill] sm:$0xff] }
 0x3a9   :  { %v3994_v2 = vpop.f32.mrb[14].mxu1 }
 0x3aa   :  { %v22495_v41 = vadd.f32 %v3994_v2, %v3908_v18  ;;  %v15161_v31 = vpop.f32.mrb[15].mxu1  ;;  %v22601_v2 = vpop.permute.xlu0 %5976 }
 0x3ab   :  { %18854 = vmatpush3.bf16.msra.mxu0 %v24220_v26  ;;  %18875 = vmatpush3.bf16.msra.mxu1 %v21153_v59  ;;  %vm5978_vm10 = vcmp.eq.s32.totalorder %v22601_v2, %v21239_v33  ;;  %v22613_v31 = vpop.permute.xlu1 %6623 }
 0x3ac   :  { %24341 = vst [vmem:[#allocation32_spill] sm:$0xff] %v22495_v41  ;;  %18855 = vmatprep.subr.bf16.mxu0 %v24148_v8  ;;  %18876 = vmatprep.subr.bf16.mxu1 %v24148_v8  ;;  %vm6625_vm11 = vcmp.eq.s32.totalorder %v22613_v31, %v21239_v33 }
 0x3ad   :  { %v12034_v43 = vsel %vm6625_vm11, 1.0, %v24209_v25 }
 0x3af   :  { %18857 = vmatpush3.bf16.msra.mxu0 %v24227_v36  ;;  %18878 = vmatpush3.bf16.msra.mxu1 %v21176_v42  ;;  %v22901_v2 = vpop.permute.xlu1 %7270 }
 0x3b0   :  { %18879 = vmatprep.subr.bf16.mxu1 %v24148_v8  ;;  %18882 = vmatprep.subr.bf16.mxu0 %v24148_v8  ;;  %vm7272_vm12 = vcmp.eq.s32.totalorder %v22901_v2, %v21239_v33 }
 0x3b1   :  { %v12038_v31 = vsel %vm7272_vm12, 1.0, %v24209_v25 }
 0x3b2   :  { %15615 = vmatmul.mubr.f32.vlgmr.msra.gmra.mrb[8].mxu0 %v5401_v51  ;;  %v12030_v51 = vsel %vm5978_vm10, 1.0, %v24209_v25 }
 0x3b3   :  { %18881 = vmatpush3.bf16.msra.mxu1 %v21189_v15  ;;  %18884 = vmatpush3.bf16.msra.mxu0 %v21158_v35  ;;  %v22623_v18 = vsub.f32 %v12030_v51, %v12030_v51 }
 0x3b4   :  { %18885 = vmatprep.subr.bf16.mxu0 %v24148_v8  ;;  %18906 = vmatprep.subr.bf16.mxu1 %v24148_v8 }
 0x3b5   :  { %15684 = vmatprep.mubr.msk.f32.mxu0 %vm20508_vm0, %v24209_v25  ;;  %v24123_v48 = vand.u32 4294901760, %v22623_v18 }
 0x3b6   :  { %15650 = vmatmul.mubr.msk.f32.vlgmr.msra.gmra.mrb[18].mxu1 %vm5313_vm9, %v24285_v44 }
 0x3b7   :  { %18887 = vmatpush3.bf16.msra.mxu0 %v21174_v55  ;;  %18908 = vmatpush3.bf16.msra.mxu1 %v20661_v28  ;;  %v6065_v51 = vsub.f32 %v22623_v18, %v24123_v48 }
 0x3b8   :  { %18888 = vmatprep.subr.bf16.mxu0 %v24148_v8  ;;  %18909 = vmatprep.subr.bf16.mxu1 %v24148_v8 }
 0x3b9   :  { %15719 = vmatprep.mubr.msk.f32.mxu1 %vm20508_vm0, %v24209_v25 }
 0x3bb   :  { %18890 = vmatpush3.bf16.msra.mxu0 %v24287_v12  ;;  %18911 = vmatpush3.bf16.msra.mxu1 %v24210_v49 }
 0x3bc   :  { %18891 = vmatprep.subr.bf16.mxu0 %v24148_v8  ;;  %18912 = vmatprep.subr.bf16.mxu1 %v24148_v8 }
 0x3bf   :  { %18893 = vmatpush3.bf16.msra.mxu0 %v24289_v4  ;;  %18914 = vmatpush3.bf16.msra.mxu1 %v24212_v52 }
 0x3c0   :  { %18894 = vmatprep.subr.bf16.mxu0 %v24148_v8  ;;  %18915 = vmatprep.subr.bf16.mxu1 %v24148_v8 }
 0x3c3   :  { %18896 = vmatpush3.bf16.msra.mxu0 %v24291_v57  ;;  %18917 = vmatpush3.bf16.msra.mxu1 %v24214_v37 }
 0x3c4   :  { %18897 = vmatprep.subr.bf16.mxu0 %v24148_v8  ;;  %18918 = vmatprep.subr.bf16.mxu1 %v24148_v8 }
 0x3c7   :  { %18899 = vmatpush3.bf16.msra.mxu0 %v24293_v53  ;;  %18920 = vmatpush3.bf16.msra.mxu1 %v24216_v32 }
 0x3c8   :  { %18900 = vmatprep.subr.bf16.mxu0 %v24148_v8  ;;  %18921 = vmatprep.subr.bf16.mxu1 %v24148_v8 }
 0x3cb   :  { %18902 = vmatpush3.bf16.msra.mxu0 %v24295_v22  ;;  %18923 = vmatpush3.bf16.msra.mxu1 %v24218_v46 }
 0x3cc   :  { %18903 = vmatprep.subr.bf16.mxu0 %v24148_v8  ;;  %18924 = vmatprep.subr.bf16.mxu1 %v24148_v8 }
 0x3cf   :  { %18905 = vmatpush3.bf16.msra.mxu0 %v24297_v6  ;;  %18926 = vmatpush3.bf16.msra.mxu1 %v24220_v26 }
 0x3d0   :  { %18927 = vmatprep.subr.bf16.mxu1 %v24148_v8  ;;  %18930 = vmatprep.subr.bf16.mxu0 %v24148_v8 }
 0x3d2   :  { %15685 = vmatmul.mubr.f32.vlgmr.msra.gmra.mrb[10].mxu0 %v22476_v63  ;;  %v22633_v63 = vsub.f32 %v12034_v43, %v12034_v43  ;;  %v6066_v43 = vand.u32 4294901760, %v6065_v51  ;;  %v24342_v51 = vld [vmem:[#allocation27_spill] sm:$0xff] }
 0x3d3   :  { %18929 = vmatpush3.bf16.msra.mxu1 %v24227_v36  ;;  %18932 = vmatpush3.bf16.msra.mxu0 %v21405_v29 }
 0x3d4   :  { %18933 = vmatprep.subr.bf16.mxu0 %v24148_v8  ;;  %18954 = vmatprep.subr.bf16.mxu1 %v24148_v8 }
 0x3d5   :  { %15754 = vmatprep.mubr.msk.f32.mxu0 %vm20508_vm0, %v24209_v25 }
 0x3d6   :  { %15720 = vmatmul.mubr.f32.vlgmr.msra.gmra.mrb[20].mxu1 %v5399_v56  ;;  %v24124_v56 = vand.u32 4294901760, %v22633_v63 }
 0x3d7   :  { %18935 = vmatpush3.bf16.msra.mxu0 %v21425_v0  ;;  %18956 = vmatpush3.bf16.msra.mxu1 %v20661_v28 }
 0x3d8   :  { %18936 = vmatprep.subr.bf16.mxu0 %v24148_v8  ;;  %18957 = vmatprep.subr.bf16.mxu1 %v24148_v8  ;;  %v6712_v41 = vsub.f32 %v22633_v63, %v24124_v56  ;;  %v24347_v56 = vld [vmem:[#allocation43_spill] sm:$0xff] }
 0x3d9   :  { %15789 = vmatprep.mubr.msk.f32.mxu1 %vm20508_vm0, %v24209_v25 }
 0x3da   :  { %v6713_v48 = vand.u32 4294901760, %v6712_v41  ;;  %v20513_v41 = vmov 3  }
 0x3db   :  { %18938 = vmatpush3.bf16.msra.mxu0 %v21443_v39  ;;  %18959 = vmatpush3.bf16.msra.mxu1 %v24210_v49 }
 0x3dc   :  { %18939 = vmatprep.subr.bf16.mxu0 %v24148_v8  ;;  %18960 = vmatprep.subr.bf16.mxu1 %v24148_v8 }
 0x3dd   :  { %20441 = vset.pattern.permute.xlu1 %v20513_v41  ;;  %20440 = vset.pattern.permute.xlu0 %v20513_v41  ;;  %v24345_v41 = vld [vmem:[#allocation40_spill] sm:$0xff] }
 0x3de   :  { %7935 = vperm.xlu0 %20440, %v22251_v1   ;;  %v24344_v1 = vld [vmem:[#allocation37_spill] sm:$0xff] }
 0x3df   :  { %18941 = vmatpush3.bf16.msra.mxu0 %v21459_v58  ;;  %18962 = vmatpush3.bf16.msra.mxu1 %v24212_v52 }
 0x3e0   :  { %18942 = vmatprep.subr.bf16.mxu0 %v24148_v8  ;;  %18963 = vmatprep.subr.bf16.mxu1 %v24148_v8 }
 0x3e3   :  { %18944 = vmatpush3.bf16.msra.mxu0 %v24331_v21  ;;  %18965 = vmatpush3.bf16.msra.mxu1 %v24214_v37 }
 0x3e4   :  { %18945 = vmatprep.subr.bf16.mxu0 %v24148_v8  ;;  %18966 = vmatprep.subr.bf16.mxu1 %v24148_v8 }
 0x3e7   :  { %18947 = vmatpush3.bf16.msra.mxu0 %v24333_v9  ;;  %18968 = vmatpush3.bf16.msra.mxu1 %v24216_v32 }
 0x3e8   :  { %18948 = vmatprep.subr.bf16.mxu0 %v24148_v8  ;;  %18969 = vmatprep.subr.bf16.mxu1 %v24148_v8 }
 0x3eb   :  { %18950 = vmatpush3.bf16.msra.mxu0 %v24335_v40  ;;  %18971 = vmatpush3.bf16.msra.mxu1 %v24218_v46 }
 0x3ec   :  { %18951 = vmatprep.subr.bf16.mxu0 %v24148_v8  ;;  %18972 = vmatprep.subr.bf16.mxu1 %v24148_v8 }
 0x3ef   :  { %18953 = vmatpush3.bf16.msra.mxu0 %v24336_v7  ;;  %18974 = vmatpush3.bf16.msra.mxu1 %v24220_v26 }
 0x3f0   :  { %18975 = vmatprep.subr.bf16.mxu1 %v24148_v8  ;;  %18978 = vmatprep.subr.bf16.mxu0 %v24148_v8 }
 0x3f2   :  { %15755 = vmatmul.mubr.msk.f32.vlgmr.msra.gmra.mrb[12].mxu0 %vm5313_vm9, %v24285_v44 }
 0x3f3   :  { %18977 = vmatpush3.bf16.msra.mxu1 %v24227_v36  ;;  %18980 = vmatpush3.bf16.msra.mxu0 %v20640_v20 }
 0x3f4   :  { %18981 = vmatprep.subr.bf16.mxu0 %v24148_v8  ;;  %19122 = vmatprep.subr.bf16.mxu1 %v24148_v8 }
 0x3f5   :  { %15824 = vmatprep.mubr.msk.f32.mxu0 %vm20508_vm0, %v24209_v25 }
 0x3f6   :  { %15790 = vmatmul.mubr.msk.f32.vlgmr.msra.gmra.mrb[22].mxu1 %vm5313_vm9, %v24285_v44  ;;  %vm11926_vm9 = vcmask 48128  }
 0x3f7   :  { %18983 = vmatpush3.bf16.msra.mxu0 %v20655_v27  ;;  %19124 = vmatpush3.bf16.msra.mxu1 %v20661_v28 }
 0x3f8   :  { %18984 = vmatprep.subr.bf16.mxu0 %v24148_v8  ;;  %19125 = vmatprep.subr.bf16.mxu1 %v24148_v8 }
 0x3f9   :  { %16034 = vmatprep.mubr.msk.f32.mxu1 %vm20508_vm0, %v24209_v25 }
 0x3fb   :  { %18986 = vmatpush3.bf16.msra.mxu0 %v20676_v34  ;;  %19127 = vmatpush3.bf16.msra.mxu1 %v24210_v49 }
 0x3fc   :  { %18987 = vmatprep.subr.bf16.mxu0 %v24148_v8  ;;  %19128 = vmatprep.subr.bf16.mxu1 %v24148_v8 }
 0x3ff   :  { %18989 = vmatpush3.bf16.msra.mxu0 %v24211_v54  ;;  %19130 = vmatpush3.bf16.msra.mxu1 %v24212_v52 }
 0x400   :  { %18990 = vmatprep.subr.bf16.mxu0 %v24148_v8  ;;  %19131 = vmatprep.subr.bf16.mxu1 %v24148_v8 }
 0x403   :  { %18992 = vmatpush3.bf16.msra.mxu0 %v24213_v24  ;;  %19133 = vmatpush3.bf16.msra.mxu1 %v24214_v37 }
 0x404   :  { %18993 = vmatprep.subr.bf16.mxu0 %v24148_v8  ;;  %19134 = vmatprep.subr.bf16.mxu1 %v24148_v8 }
 0x407   :  { %18995 = vmatpush3.bf16.msra.mxu0 %v24215_v45  ;;  %19136 = vmatpush3.bf16.msra.mxu1 %v24216_v32 }
 0x408   :  { %18996 = vmatprep.subr.bf16.mxu0 %v24148_v8  ;;  %19137 = vmatprep.subr.bf16.mxu1 %v24148_v8 }
 0x40b   :  { %18998 = vmatpush3.bf16.msra.mxu0 %v24217_v61  ;;  %19139 = vmatpush3.bf16.msra.mxu1 %v24218_v46 }
 0x40c   :  { %18999 = vmatprep.subr.bf16.mxu0 %v24148_v8  ;;  %19140 = vmatprep.subr.bf16.mxu1 %v24148_v8 }
 0x40f   :  { %19001 = vmatpush3.bf16.msra.mxu0 %v24219_v60  ;;  %19142 = vmatpush3.bf16.msra.mxu1 %v24220_v26 }
 0x410   :  { %19002 = vmatprep.subr.bf16.mxu0 %v24148_v8  ;;  %19143 = vmatprep.subr.bf16.mxu1 %v24148_v8 }
 0x412   :  { %15825 = vmatmul.mubr.f32.vlgmr.msra.gmra.mrb[14].mxu0 %v6066_v43  ;;  %v24343_v43 = vld [vmem:[#allocation41_spill] sm:$0xff] }
 0x413   :  { %19004 = vmatpush3.bf16.msra.mxu0 %v20890_v13  ;;  %19145 = vmatpush3.bf16.msra.mxu1 %v24227_v36 }
 0x414   :  { %19005 = vmatprep.subr.bf16.mxu0 %v24148_v8  ;;  %19146 = vmatprep.subr.bf16.mxu1 %v24148_v8 }
 0x415   :  { %15859 = vmatprep.mubr.msk.f32.mxu0 %vm20508_vm0, %v24209_v25 }
 0x416   :  { %16035 = vmatmul.mubr.f32.vlgmr.msra.gmra.mrb[24].mxu1 %v6713_v48  ;;  %v22686_v48 = vld [vmem:[%s23947_s5] sm:$0xff] }
 0x417   :  { %19007 = vmatpush3.bf16.msra.mxu0 %v20906_v5  ;;  %19148 = vmatpush3.bf16.msra.mxu1 %v20920_v10 }
 0x418   :  { %19008 = vmatprep.subr.bf16.mxu0 %v24148_v8  ;;  %19149 = vmatprep.subr.bf16.mxu1 %v24148_v8 }
 0x419   :  { %16069 = vmatprep.mubr.msk.f32.mxu1 %vm20508_vm0, %v24209_v25  ;;  %8582 = vperm.xlu1 %20441, %v22686_v48  }
 0x41b   :  { %19010 = vmatpush3.bf16.msra.mxu0 %v20938_v11  ;;  %19151 = vmatpush3.bf16.msra.mxu1 %v20989_v14 }
 0x41c   :  { %19011 = vmatprep.subr.bf16.mxu0 %v24148_v8  ;;  %19152 = vmatprep.subr.bf16.mxu1 %v24148_v8 }
 0x41d   :  { %9229 = vperm.xlu1 %20441, %v24342_v51   ;;  %v24346_v51 = vld [vmem:[#allocation42_spill] sm:$0xff] }
 0x41f   :  { %19013 = vmatpush3.bf16.msra.mxu0 %v20998_v17  ;;  %19154 = vmatpush3.bf16.msra.mxu1 %v21018_v23 }
 0x420   :  { %19014 = vmatprep.subr.bf16.mxu0 %v24148_v8  ;;  %19155 = vmatprep.subr.bf16.mxu1 %v24148_v8 }
 0x423   :  { %19016 = vmatpush3.bf16.msra.mxu0 %v21038_v47  ;;  %19157 = vmatpush3.bf16.msra.mxu1 %v21070_v38 }
 0x424   :  { %19017 = vmatprep.subr.bf16.mxu0 %v24148_v8  ;;  %19158 = vmatprep.subr.bf16.mxu1 %v24148_v8 }
 0x427   :  { %19019 = vmatpush3.bf16.msra.mxu0 %v24313_v62  ;;  %19160 = vmatpush3.bf16.msra.mxu1 %v21092_v30 }
 0x428   :  { %19020 = vmatprep.subr.bf16.mxu0 %v24148_v8  ;;  %19161 = vmatprep.subr.bf16.mxu1 %v24148_v8 }
 0x42b   :  { %19022 = vmatpush3.bf16.msra.mxu0 %v24315_v16  ;;  %19163 = vmatpush3.bf16.msra.mxu1 %v21153_v59 }
 0x42c   :  { %19023 = vmatprep.subr.bf16.mxu0 %v24148_v8  ;;  %19164 = vmatprep.subr.bf16.mxu1 %v24148_v8 }
 0x42f   :  { %19025 = vmatpush3.bf16.msra.mxu0 %v24343_v43  ;;  %19166 = vmatpush3.bf16.msra.mxu1 %v21176_v42 }
 0x430   :  { %19026 = vmatprep.subr.bf16.mxu0 %v24148_v8  ;;  %19167 = vmatprep.subr.bf16.mxu1 %v24148_v8 }
 0x432   :  { %15860 = vmatmul.mubr.msk.f32.vlgmr.msra.gmra.mrb[14].mxu0 %vm5978_vm10, %v24285_v44 }
 0x433   :  { %19028 = vmatpush3.bf16.msra.mxu0 %v24344_v1  ;;  %19169 = vmatpush3.bf16.msra.mxu1 %v21189_v15 }
 0x434   :  { %19029 = vmatprep.subr.bf16.mxu0 %v24148_v8  ;;  %19170 = vmatprep.subr.bf16.mxu1 %v24148_v8 }
 0x435   :  { %15894 = vmatprep.mubr.msk.f32.mxu0 %vm20508_vm0, %v24209_v25 }
 0x436   :  { %16070 = vmatmul.mubr.msk.f32.vlgmr.msra.gmra.mrb[24].mxu1 %vm6625_vm11, %v24285_v44 }
 0x437   :  { %19031 = vmatpush3.bf16.msra.mxu0 %v24345_v41  ;;  %19172 = vmatpush3.bf16.msra.mxu1 %v21158_v35 }
 0x438   :  { %19032 = vmatprep.subr.bf16.mxu0 %v24148_v8  ;;  %19173 = vmatprep.subr.bf16.mxu1 %v24148_v8 }
 0x439   :  { %16104 = vmatprep.mubr.msk.f32.mxu1 %vm20508_vm0, %v24209_v25 }
 0x43b   :  { %19034 = vmatpush3.bf16.msra.mxu0 %v24346_v51  ;;  %19175 = vmatpush3.bf16.msra.mxu1 %v21174_v55  ;;  %v24349_v51 = vld [vmem:[#allocation49_spill] sm:$0xff] }
 0x43c   :  { %19035 = vmatprep.subr.bf16.mxu0 %v24148_v8  ;;  %19176 = vmatprep.subr.bf16.mxu1 %v24148_v8 }
 0x43f   :  { %19037 = vmatpush3.bf16.msra.mxu0 %v24347_v56  ;;  %19178 = vmatpush3.bf16.msra.mxu1 %v24287_v12  ;;  %v24350_v56 = vld [vmem:[#allocation51_spill] sm:$0xff] }
 0x440   :  { %19038 = vmatprep.subr.bf16.mxu0 %v24148_v8  ;;  %19179 = vmatprep.subr.bf16.mxu1 %v24148_v8 }
 0x443   :  { %19040 = vmatpush3.bf16.msra.mxu0 %v24348_v19  ;;  %19181 = vmatpush3.bf16.msra.mxu1 %v24289_v4  ;;  %v24351_v19 = vld [vmem:[#allocation53_spill] sm:$0xff] }
 0x444   :  { %19041 = vmatprep.subr.bf16.mxu0 %v24148_v8  ;;  %19182 = vmatprep.subr.bf16.mxu1 %v24148_v8 }
 0x447   :  { %19043 = vmatpush3.bf16.msra.mxu0 %v24349_v51  ;;  %19184 = vmatpush3.bf16.msra.mxu1 %v24291_v57 }
 0x448   :  { %19044 = vmatprep.subr.bf16.mxu0 %v24148_v8  ;;  %19185 = vmatprep.subr.bf16.mxu1 %v24148_v8 }
 0x44b   :  { %19046 = vmatpush3.bf16.msra.mxu0 %v24350_v56  ;;  %19187 = vmatpush3.bf16.msra.mxu1 %v24293_v53  ;;  %v24353_v56 = vld [vmem:[#allocation18_spill] sm:$0xff] }
 0x44c   :  { %19047 = vmatprep.subr.bf16.mxu0 %v24148_v8  ;;  %19188 = vmatprep.subr.bf16.mxu1 %v24148_v8 }
 0x44f   :  { %19049 = vmatpush3.bf16.msra.mxu0 %v24351_v19  ;;  %19190 = vmatpush3.bf16.msra.mxu1 %v24295_v22 }
 0x450   :  { %19050 = vmatprep.subr.bf16.mxu0 %v24148_v8  ;;  %19191 = vmatprep.subr.bf16.mxu1 %v24148_v8 }
 0x452   :  { %15895 = vmatmul.mubr.f32.vlgmr.msra.gmra.mrb[14].mxu0 %v22623_v18 }
 0x453   :  { %19052 = vmatpush3.bf16.msra.mxu0 %v20640_v20  ;;  %19193 = vmatpush3.bf16.msra.mxu1 %v24297_v6 }
 0x454   :  { %19053 = vmatprep.subr.bf16.mxu0 %v24148_v8  ;;  %19194 = vmatprep.subr.bf16.mxu1 %v24148_v8 }
 0x455   :  { %15929 = vmatprep.mubr.msk.f32.mxu0 %vm20508_vm0, %v24209_v25 }
 0x456   :  { %16105 = vmatmul.mubr.f32.vlgmr.msra.gmra.mrb[24].mxu1 %v22633_v63 }
 0x457   :  { %19055 = vmatpush3.bf16.msra.mxu0 %v20655_v27  ;;  %19196 = vmatpush3.bf16.msra.mxu1 %v20661_v28 }
 0x458   :  { %19056 = vmatprep.subr.bf16.mxu0 %v24148_v8  ;;  %19197 = vmatprep.subr.bf16.mxu1 %v24148_v8 }
 0x459   :  { %16139 = vmatprep.mubr.msk.f32.mxu1 %vm20508_vm0, %v24209_v25 }
 0x45b   :  { %19058 = vmatpush3.bf16.msra.mxu0 %v20676_v34  ;;  %19199 = vmatpush3.bf16.msra.mxu1 %v24210_v49 }
 0x45c   :  { %19059 = vmatprep.subr.bf16.mxu0 %v24148_v8  ;;  %19200 = vmatprep.subr.bf16.mxu1 %v24148_v8 }
 0x45f   :  { %19061 = vmatpush3.bf16.msra.mxu0 %v24211_v54  ;;  %19202 = vmatpush3.bf16.msra.mxu1 %v24212_v52 }
 0x460   :  { %19062 = vmatprep.subr.bf16.mxu0 %v24148_v8  ;;  %19203 = vmatprep.subr.bf16.mxu1 %v24148_v8 }
 0x463   :  { %19064 = vmatpush3.bf16.msra.mxu0 %v24213_v24  ;;  %19205 = vmatpush3.bf16.msra.mxu1 %v24214_v37 }
 0x464   :  { %19065 = vmatprep.subr.bf16.mxu0 %v24148_v8  ;;  %19206 = vmatprep.subr.bf16.mxu1 %v24148_v8 }
 0x465   :  { %v22769_v19 = vpop.f32.mrb[6].mxu0 }
 0x466   :  { %24352 = vst [vmem:[#allocation33_spill] sm:$0xff] %v22769_v19  ;;  %v22773_v51 = vmul.f32 %v22769_v19, %v24353_v56  ;;  %v15371_v41 = vpop.f32.mrb[7].mxu0 }
 0x467   :  { %19067 = vmatpush3.bf16.msra.mxu0 %v24215_v45  ;;  %19208 = vmatpush3.bf16.msra.mxu1 %v24216_v32  ;;  %v24359_v41 = vld [vmem:[#allocation8_spill] sm:$0xff] }
 0x468   :  { %24354 = vst [vmem:[#allocation34_spill] sm:$0xff] %v22773_v51  ;;  %19068 = vmatprep.subr.bf16.mxu0 %v24148_v8  ;;  %19209 = vmatprep.subr.bf16.mxu1 %v24148_v8  ;;  %v24365_v51 = vld [vmem:[#allocation13_spill] sm:$0xff] }
 0x469   :  { %v22779_v1 = vpop.f32.mrb[16].mxu1 }
 0x46a   :  { %24355 = vst [vmem:[#allocation35_spill] sm:$0xff] %v22779_v1  ;;  %v15581_v43 = vpop.f32.mrb[17].mxu1  ;;  %v22783_v16 = vmul.f32 %v22779_v1, %v24339_v3  ;;  %v22787_v19 = vmul.f32 %v22779_v1, %v21906_v50  ;;  %v24360_v1 = vand.u32 4294901760, %v22633_v63  ;;  %v24363_v63 = vld [vmem:[#allocation11_spill] sm:$0xff] }
 0x46b   :  { %19070 = vmatpush3.bf16.msra.mxu0 %v24217_v61  ;;  %19211 = vmatpush3.bf16.msra.mxu1 %v24218_v46  ;;  %v24358_v43 = vand.u32 4294901760, %v22623_v18  ;;  %v24362_v18 = vld [vmem:[#allocation10_spill] sm:$0xff] }
 0x46c   :  { %24356 = vst [vmem:[#allocation38_spill] sm:$0xff] %v22783_v16  ;;  %24357 = vst [vmem:[#allocation39_spill] sm:$0xff] %v22787_v19  ;;  %19071 = vmatprep.subr.bf16.mxu0 %v24148_v8  ;;  %19212 = vmatprep.subr.bf16.mxu1 %v24148_v8  ;;  %v24361_v19 = vld [vmem:[#allocation9_spill] sm:$0xff] }
 0x46f   :  { %19073 = vmatpush3.bf16.msra.mxu0 %v24219_v60  ;;  %19214 = vmatpush3.bf16.msra.mxu1 %v24220_v26 }
 0x470   :  { %19074 = vmatprep.subr.bf16.mxu0 %v24148_v8  ;;  %19215 = vmatprep.subr.bf16.mxu1 %v24148_v8 }
 0x472   :  { %15930 = vmatmul.mubr.f32.vlgmr.msra.gmra.mrb[14].mxu0 %v24358_v43 }
 0x473   :  { %19076 = vmatpush3.bf16.msra.mxu0 %v24359_v41  ;;  %19217 = vmatpush3.bf16.msra.mxu1 %v24227_v36 }
 0x474   :  { %19077 = vmatprep.subr.bf16.mxu0 %v24148_v8  ;;  %19218 = vmatprep.subr.bf16.mxu1 %v24148_v8 }
 0x475   :  { %15964 = vmatprep.mubr.msk.f32.mxu0 %vm20508_vm0, %v24209_v25 }
 0x476   :  { %16140 = vmatmul.mubr.f32.vlgmr.msra.gmra.mrb[24].mxu1 %v24360_v1  ;;  %v24364_v1 = vld [vmem:[#allocation12_spill] sm:$0xff] }
 0x477   :  { %19079 = vmatpush3.bf16.msra.mxu0 %v24361_v19  ;;  %19220 = vmatpush3.bf16.msra.mxu1 %v21405_v29 }
 0x478   :  { %19080 = vmatprep.subr.bf16.mxu0 %v24148_v8  ;;  %19221 = vmatprep.subr.bf16.mxu1 %v24148_v8 }
 0x479   :  { %16174 = vmatprep.mubr.msk.f32.mxu1 %vm20508_vm0, %v24209_v25 }
 0x47b   :  { %19082 = vmatpush3.bf16.msra.mxu0 %v24362_v18  ;;  %19223 = vmatpush3.bf16.msra.mxu1 %v21425_v0 }
 0x47c   :  { %19083 = vmatprep.subr.bf16.mxu0 %v24148_v8  ;;  %19224 = vmatprep.subr.bf16.mxu1 %v24148_v8 }
 0x47f   :  { %19085 = vmatpush3.bf16.msra.mxu0 %v24363_v63  ;;  %19226 = vmatpush3.bf16.msra.mxu1 %v21443_v39 }
 0x480   :  { %19086 = vmatprep.subr.bf16.mxu0 %v24148_v8  ;;  %19227 = vmatprep.subr.bf16.mxu1 %v24148_v8 }
 0x483   :  { %19088 = vmatpush3.bf16.msra.mxu0 %v24364_v1  ;;  %19229 = vmatpush3.bf16.msra.mxu1 %v21459_v58  ;;  %v24366_v1 = vld [vmem:[#allocation15_spill] sm:$0xff] }
 0x484   :  { %19089 = vmatprep.subr.bf16.mxu0 %v24148_v8  ;;  %19230 = vmatprep.subr.bf16.mxu1 %v24148_v8 }
 0x485   :  { %v5403_v43 = vpop.f32.mrb[8].mxu0 }
 0x486   :  { %v15616_v16 = vpop.f32.mrb[9].mxu0 }
 0x487   :  { %19091 = vmatpush3.bf16.msra.mxu0 %v24365_v51  ;;  %19232 = vmatpush3.bf16.msra.mxu1 %v24331_v21  ;;  %v24367_v16 = vld [vmem:[#allocation19_spill] sm:$0xff] }
 0x488   :  { %19092 = vmatprep.subr.bf16.mxu0 %v24148_v8  ;;  %19233 = vmatprep.subr.bf16.mxu1 %v24148_v8 }
 0x489   :  { %v5554_v63 = vpop.f32.mrb[18].mxu1 }
 0x48a   :  { %v5555_v18 = vadd.f32 %v5554_v63, %v5403_v43  ;;  %v15651_v19 = vpop.f32.mrb[19].mxu1 }
 0x48b   :  { %19094 = vmatpush3.bf16.msra.mxu0 %v24366_v1  ;;  %19235 = vmatpush3.bf16.msra.mxu1 %v24333_v9 }
 0x48c   :  { %19095 = vmatprep.subr.bf16.mxu0 %v24148_v8  ;;  %19236 = vmatprep.subr.bf16.mxu1 %v24148_v8 }
 0x48f   :  { %19097 = vmatpush3.bf16.msra.mxu0 %v24367_v16  ;;  %19238 = vmatpush3.bf16.msra.mxu1 %v24335_v40 }
 0x490   :  { %19098 = vmatprep.subr.bf16.mxu0 %v24148_v8  ;;  %19239 = vmatprep.subr.bf16.mxu1 %v24148_v8 }
 0x492   :  { %15965 = vmatmul.mubr.msk.f32.vlgmr.msra.gmra.mrb[14].mxu0 %vm5978_vm10, %v24285_v44 }
 0x493   :  { %19100 = vmatpush3.bf16.msra.mxu0 %v20640_v20  ;;  %19241 = vmatpush3.bf16.msra.mxu1 %v24336_v7 }
 0x494   :  { %19101 = vmatprep.subr.bf16.mxu0 %v24148_v8  ;;  %19242 = vmatprep.subr.bf16.mxu1 %v24148_v8 }
 0x495   :  { %15999 = vmatprep.mubr.msk.f32.mxu0 %vm20508_vm0, %v24209_v25 }
 0x496   :  { %16175 = vmatmul.mubr.msk.f32.vlgmr.msra.gmra.mrb[24].mxu1 %vm6625_vm11, %v24285_v44 }
 0x497   :  { %19103 = vmatpush3.bf16.msra.mxu0 %v20655_v27  ;;  %19244 = vmatpush3.bf16.msra.mxu1 %v20661_v28 }
 0x498   :  { %19104 = vmatprep.subr.bf16.mxu0 %v24148_v8  ;;  %19245 = vmatprep.subr.bf16.mxu1 %v24148_v8  ;;  %v23046_v2 = vpop.permute.xlu1 %8582 }
 0x499   :  { %16209 = vmatprep.mubr.msk.f32.mxu1 %vm20508_vm0, %v24209_v25  ;;  %vm8584_vm14 = vcmp.eq.s32.totalorder %v23046_v2, %v21239_v33 }
 0x49b   :  { %19106 = vmatpush3.bf16.msra.mxu0 %v20676_v34  ;;  %19247 = vmatpush3.bf16.msra.mxu1 %v24210_v49 }
 0x49c   :  { %19107 = vmatprep.subr.bf16.mxu0 %v24148_v8  ;;  %19248 = vmatprep.subr.bf16.mxu1 %v24148_v8 }
 0x49f   :  { %19109 = vmatpush3.bf16.msra.mxu0 %v24211_v54  ;;  %19250 = vmatpush3.bf16.msra.mxu1 %v24212_v52 }
 0x4a0   :  { %19110 = vmatprep.subr.bf16.mxu0 %v24148_v8  ;;  %19251 = vmatprep.subr.bf16.mxu1 %v24148_v8 }
 0x4a3   :  { %19112 = vmatpush3.bf16.msra.mxu0 %v24213_v24  ;;  %19253 = vmatpush3.bf16.msra.mxu1 %v24214_v37 }
 0x4a4   :  { %19113 = vmatprep.subr.bf16.mxu0 %v24148_v8  ;;  %19254 = vmatprep.subr.bf16.mxu1 %v24148_v8 }
 0x4a5   :  { %v5658_v19 = vpop.f32.mrb[10].mxu0 }
 0x4a6   :  { %v5659_v63 = vadd.f32 %v5658_v19, %v5555_v18  ;;  %v15686_v43 = vpop.f32.mrb[11].mxu0 }
 0x4a7   :  { %19115 = vmatpush3.bf16.msra.mxu0 %v24215_v45  ;;  %19256 = vmatpush3.bf16.msra.mxu1 %v24216_v32 }
 0x4a8   :  { %19116 = vmatprep.subr.bf16.mxu0 %v24148_v8  ;;  %19257 = vmatprep.subr.bf16.mxu1 %v24148_v8 }
 0x4a9   :  { %v5747_v16 = vpop.f32.mrb[20].mxu1 }
 0x4aa   :  { %v5748_v1 = vadd.f32 %v5747_v16, %v5659_v63  ;;  %v15721_v51 = vpop.f32.mrb[21].mxu1 }
 0x4ab   :  { %19118 = vmatpush3.bf16.msra.mxu0 %v24217_v61  ;;  %19259 = vmatpush3.bf16.msra.mxu1 %v24218_v46  ;;  %v22919_v51 = vsub.f32 %v12038_v31, %v12038_v31 }
 0x4ac   :  { %19119 = vmatprep.subr.bf16.mxu0 %v24148_v8  ;;  %19260 = vmatprep.subr.bf16.mxu1 %v24148_v8 }
 0x4ad   :  { %v7358_v63 = vand.u32 4294901760, %v22919_v51 }
 0x4af   :  { %19121 = vmatpush3.bf16.msra.mxu0 %v24219_v60  ;;  %19262 = vmatpush3.bf16.msra.mxu1 %v24220_v26 }
 0x4b0   :  { %19263 = vmatprep.subr.bf16.mxu1 %v24148_v8  ;;  %19266 = vmatprep.subr.bf16.mxu0 %v24148_v8 }
 0x4b2   :  { %16000 = vmatmul.mubr.msk.f32.vlgmr.msra.gmra.mrb[14].mxu0 %vm5978_vm10, %v24285_v44  ;;  %vm11928_vm10 = vcmask 56320  }
 0x4b3   :  { %19265 = vmatpush3.bf16.msra.mxu1 %v24227_v36  ;;  %19268 = vmatpush3.bf16.msra.mxu0 %v20661_v28 }
 0x4b4   :  { %19269 = vmatprep.subr.bf16.mxu0 %v24148_v8  ;;  %19290 = vmatprep.subr.bf16.mxu1 %v24148_v8 }
 0x4b5   :  { %16244 = vmatprep.mubr.msk.f32.mxu0 %vm20508_vm0, %v24209_v25 }
 0x4b6   :  { %16210 = vmatmul.mubr.msk.f32.vlgmr.msra.gmra.mrb[24].mxu1 %vm6625_vm11, %v24285_v44  ;;  %vm11930_vm11 = vcmask 64512  }
 0x4b7   :  { %19271 = vmatpush3.bf16.msra.mxu0 %v24210_v49  ;;  %19292 = vmatpush3.bf16.msra.mxu1 %v20920_v10 }
 0x4b8   :  { %19272 = vmatprep.subr.bf16.mxu0 %v24148_v8  ;;  %19293 = vmatprep.subr.bf16.mxu1 %v24148_v8 }
 0x4b9   :  { %16279 = vmatprep.mubr.msk.f32.mxu1 %vm20508_vm0, %v24209_v25 }
 0x4bb   :  { %19274 = vmatpush3.bf16.msra.mxu0 %v24212_v52  ;;  %19295 = vmatpush3.bf16.msra.mxu1 %v20989_v14 }
 0x4bc   :  { %19275 = vmatprep.subr.bf16.mxu0 %v24148_v8  ;;  %19296 = vmatprep.subr.bf16.mxu1 %v24148_v8 }
 0x4bf   :  { %19277 = vmatpush3.bf16.msra.mxu0 %v24214_v37  ;;  %19298 = vmatpush3.bf16.msra.mxu1 %v21018_v23 }
 0x4c0   :  { %19278 = vmatprep.subr.bf16.mxu0 %v24148_v8  ;;  %19299 = vmatprep.subr.bf16.mxu1 %v24148_v8 }
 0x4c3   :  { %19280 = vmatpush3.bf16.msra.mxu0 %v24216_v32  ;;  %19301 = vmatpush3.bf16.msra.mxu1 %v21070_v38 }
 0x4c4   :  { %19281 = vmatprep.subr.bf16.mxu0 %v24148_v8  ;;  %19302 = vmatprep.subr.bf16.mxu1 %v24148_v8 }
 0x4c5   :  { %v5866_v18 = vpop.f32.mrb[12].mxu0 }
 0x4c6   :  { %v5867_v16 = vadd.f32 %v5866_v18, %v5748_v1  ;;  %v15756_v19 = vpop.f32.mrb[13].mxu0  ;;  %v7359_v1 = vsub.f32 %v22919_v51, %v7358_v63 }
 0x4c7   :  { %19283 = vmatpush3.bf16.msra.mxu0 %v24218_v46  ;;  %19304 = vmatpush3.bf16.msra.mxu1 %v21092_v30  ;;  %v12046_v19 = vsel %vm8584_vm14, 1.0, %v24209_v25 }
 0x4c8   :  { %19284 = vmatprep.subr.bf16.mxu0 %v24148_v8  ;;  %19305 = vmatprep.subr.bf16.mxu1 %v24148_v8  ;;  %v7360_v18 = vand.u32 4294901760, %v7359_v1 }
 0x4c9   :  { %v5953_v43 = vpop.f32.mrb[22].mxu1 }
 0x4ca   :  { %v22928_v31 = vadd.f32 %v5953_v43, %v5867_v16  ;;  %v15791_v41 = vpop.f32.mrb[23].mxu1 }
 0x4cb   :  { %19286 = vmatpush3.bf16.msra.mxu0 %v24220_v26  ;;  %19307 = vmatpush3.bf16.msra.mxu1 %v21153_v59  ;;  %v23034_v41 = vpop.permute.xlu0 %7935 }
 0x4cc   :  { %24368 = vst [vmem:[#allocation44_spill] sm:$0xff] %v22928_v31  ;;  %19287 = vmatprep.subr.bf16.mxu0 %v24148_v8  ;;  %19308 = vmatprep.subr.bf16.mxu1 %v24148_v8  ;;  %vm7937_vm13 = vcmp.eq.s32.totalorder %v23034_v41, %v21239_v33  ;;  %v24375_v31 = vld [vmem:[#allocation46_spill] sm:$0xff]  ;;  %v23333_v41 = vpop.permute.xlu1 %9229 }
 0x4cd   :  { %vm9231_vm15 = vcmp.eq.s32.totalorder %v23333_v41, %v21239_v33 }
 0x4ce   :  { %v12050_v2 = vsel %vm9231_vm15, 1.0, %v24209_v25 }
 0x4cf   :  { %19289 = vmatpush3.bf16.msra.mxu0 %v24227_v36  ;;  %19310 = vmatpush3.bf16.msra.mxu1 %v21176_v42 }
 0x4d0   :  { %19311 = vmatprep.subr.bf16.mxu1 %v24148_v8  ;;  %19314 = vmatprep.subr.bf16.mxu0 %v24148_v8 }
 0x4d2   :  { %16245 = vmatmul.mubr.f32.vlgmr.msra.gmra.mrb[16].mxu0 %v7360_v18 }
 0x4d3   :  { %19313 = vmatpush3.bf16.msra.mxu1 %v21189_v15  ;;  %19316 = vmatpush3.bf16.msra.mxu0 %v21158_v35 }
 0x4d4   :  { %19317 = vmatprep.subr.bf16.mxu0 %v24148_v8  ;;  %19338 = vmatprep.subr.bf16.mxu1 %v24148_v8 }
 0x4d5   :  { %16314 = vmatprep.mubr.msk.f32.mxu0 %vm20508_vm0, %v24209_v25 }
 0x4d6   :  { %16280 = vmatmul.mubr.msk.f32.vlgmr.msra.gmra.mrb[26].mxu1 %vm7272_vm12, %v24285_v44 }
 0x4d7   :  { %19319 = vmatpush3.bf16.msra.mxu0 %v21174_v55  ;;  %19340 = vmatpush3.bf16.msra.mxu1 %v20661_v28 }
 0x4d8   :  { %19320 = vmatprep.subr.bf16.mxu0 %v24148_v8  ;;  %19341 = vmatprep.subr.bf16.mxu1 %v24148_v8 }
 0x4d9   :  { %16349 = vmatprep.mubr.msk.f32.mxu1 %vm20508_vm0, %v24209_v25 }
 0x4db   :  { %19322 = vmatpush3.bf16.msra.mxu0 %v24287_v12  ;;  %19343 = vmatpush3.bf16.msra.mxu1 %v24210_v49 }
 0x4dc   :  { %19323 = vmatprep.subr.bf16.mxu0 %v24148_v8  ;;  %19344 = vmatprep.subr.bf16.mxu1 %v24148_v8 }
 0x4df   :  { %19325 = vmatpush3.bf16.msra.mxu0 %v24289_v4  ;;  %19346 = vmatpush3.bf16.msra.mxu1 %v24212_v52 }
 0x4e0   :  { %19326 = vmatprep.subr.bf16.mxu0 %v24148_v8  ;;  %19347 = vmatprep.subr.bf16.mxu1 %v24148_v8 }
 0x4e3   :  { %19328 = vmatpush3.bf16.msra.mxu0 %v24291_v57  ;;  %19349 = vmatpush3.bf16.msra.mxu1 %v24214_v37 }
 0x4e4   :  { %19329 = vmatprep.subr.bf16.mxu0 %v24148_v8  ;;  %19350 = vmatprep.subr.bf16.mxu1 %v24148_v8 }
 0x4e7   :  { %19331 = vmatpush3.bf16.msra.mxu0 %v24293_v53  ;;  %19352 = vmatpush3.bf16.msra.mxu1 %v24216_v32 }
 0x4e8   :  { %19332 = vmatprep.subr.bf16.mxu0 %v24148_v8  ;;  %19353 = vmatprep.subr.bf16.mxu1 %v24148_v8 }
 0x4eb   :  { %19334 = vmatpush3.bf16.msra.mxu0 %v24295_v22  ;;  %19355 = vmatpush3.bf16.msra.mxu1 %v24218_v46 }
 0x4ec   :  { %19335 = vmatprep.subr.bf16.mxu0 %v24148_v8  ;;  %19356 = vmatprep.subr.bf16.mxu1 %v24148_v8 }
 0x4ef   :  { %19337 = vmatpush3.bf16.msra.mxu0 %v24297_v6  ;;  %19358 = vmatpush3.bf16.msra.mxu1 %v24220_v26 }
 0x4f0   :  { %19359 = vmatprep.subr.bf16.mxu1 %v24148_v8  ;;  %19362 = vmatprep.subr.bf16.mxu0 %v24148_v8 }
 0x4f2   :  { %16315 = vmatmul.mubr.f32.vlgmr.msra.gmra.mrb[18].mxu0 %v22919_v51  ;;  %v12042_v51 = vsel %vm7937_vm13, 1.0, %v24209_v25 }
 0x4f3   :  { %19361 = vmatpush3.bf16.msra.mxu1 %v24227_v36  ;;  %19364 = vmatpush3.bf16.msra.mxu0 %v21405_v29  ;;  %v23056_v16 = vsub.f32 %v12042_v51, %v12042_v51 }
 0x4f4   :  { %19365 = vmatprep.subr.bf16.mxu0 %v24148_v8  ;;  %19386 = vmatprep.subr.bf16.mxu1 %v24148_v8 }
 0x4f5   :  { %16384 = vmatprep.mubr.msk.f32.mxu0 %vm20508_vm0, %v24209_v25  ;;  %v24128_v43 = vand.u32 4294901760, %v23056_v16 }
 0x4f6   :  { %16350 = vmatmul.mubr.f32.vlgmr.msra.gmra.mrb[28].mxu1 %v7358_v63  ;;  %v23066_v63 = vsub.f32 %v12046_v19, %v12046_v19 }
 0x4f7   :  { %19367 = vmatpush3.bf16.msra.mxu0 %v21425_v0  ;;  %19388 = vmatpush3.bf16.msra.mxu1 %v20661_v28  ;;  %v8024_v18 = vsub.f32 %v23056_v16, %v24128_v43 }
 0x4f8   :  { %19368 = vmatprep.subr.bf16.mxu0 %v24148_v8  ;;  %19389 = vmatprep.subr.bf16.mxu1 %v24148_v8  ;;  %v24129_v1 = vand.u32 4294901760, %v23066_v63 }
 0x4f9   :  { %16419 = vmatprep.mubr.msk.f32.mxu1 %vm20508_vm0, %v24209_v25  ;;  %v8025_v51 = vand.u32 4294901760, %v8024_v18  ;;  %v20452_v18 = vld [vmem:[%s23945_s3] sm:$0xff]  ;;  %s20515_s3 = smov 97  }
 0x4fa   :  { %v8671_v19 = vsub.f32 %v23066_v63, %v24129_v1  ;;  %v24374_v1 = vld [vmem:[#allocation43_spill] sm:$0xff] }
 0x4fb   :  { %19370 = vmatpush3.bf16.msra.mxu0 %v21443_v39  ;;  %19391 = vmatpush3.bf16.msra.mxu1 %v24210_v49 }
 0x4fc   :  { %19371 = vmatprep.subr.bf16.mxu0 %v24148_v8  ;;  %19392 = vmatprep.subr.bf16.mxu1 %v24148_v8  ;;  %v8672_v43 = vand.u32 4294901760, %v8671_v19  ;;  %v20453_v19 = vld [vmem:[%s23946_s4] sm:$0xff]  ;;  %s20516_s4 = smov 96  }
 0x4ff   :  { %19373 = vmatpush3.bf16.msra.mxu0 %v21459_v58  ;;  %19394 = vmatpush3.bf16.msra.mxu1 %v24212_v52 }
 0x500   :  { %19374 = vmatprep.subr.bf16.mxu0 %v24148_v8  ;;  %19395 = vmatprep.subr.bf16.mxu1 %v24148_v8 }
 0x503   :  { %19376 = vmatpush3.bf16.msra.mxu0 %v24331_v21  ;;  %19397 = vmatpush3.bf16.msra.mxu1 %v24214_v37 }
 0x504   :  { %19377 = vmatprep.subr.bf16.mxu0 %v24148_v8  ;;  %19398 = vmatprep.subr.bf16.mxu1 %v24148_v8 }
 0x507   :  { %19379 = vmatpush3.bf16.msra.mxu0 %v24333_v9  ;;  %19400 = vmatpush3.bf16.msra.mxu1 %v24216_v32 }
 0x508   :  { %19380 = vmatprep.subr.bf16.mxu0 %v24148_v8  ;;  %19401 = vmatprep.subr.bf16.mxu1 %v24148_v8 }
 0x50b   :  { %19382 = vmatpush3.bf16.msra.mxu0 %v24335_v40  ;;  %19403 = vmatpush3.bf16.msra.mxu1 %v24218_v46 }
 0x50c   :  { %19383 = vmatprep.subr.bf16.mxu0 %v24148_v8  ;;  %19404 = vmatprep.subr.bf16.mxu1 %v24148_v8 }
 0x50f   :  { %19385 = vmatpush3.bf16.msra.mxu0 %v24336_v7  ;;  %19406 = vmatpush3.bf16.msra.mxu1 %v24220_v26 }
 0x510   :  { %19407 = vmatprep.subr.bf16.mxu1 %v24148_v8  ;;  %19410 = vmatprep.subr.bf16.mxu0 %v24148_v8 }
 0x512   :  { %16385 = vmatmul.mubr.msk.f32.vlgmr.msra.gmra.mrb[20].mxu0 %vm7272_vm12, %v24285_v44 }
 0x513   :  { %19409 = vmatpush3.bf16.msra.mxu1 %v24227_v36  ;;  %19412 = vmatpush3.bf16.msra.mxu0 %v20640_v20 }
 0x514   :  { %19413 = vmatprep.subr.bf16.mxu0 %v24148_v8  ;;  %19554 = vmatprep.subr.bf16.mxu1 %v24148_v8 }
 0x515   :  { %16454 = vmatprep.mubr.msk.f32.mxu0 %vm20508_vm0, %v24209_v25 }
 0x516   :  { %16420 = vmatmul.mubr.msk.f32.vlgmr.msra.gmra.mrb[30].mxu1 %vm7272_vm12, %v24285_v44  ;;  %vm11932_vm12 = vcmask 72704  }
 0x517   :  { %19415 = vmatpush3.bf16.msra.mxu0 %v20655_v27  ;;  %19556 = vmatpush3.bf16.msra.mxu1 %v20661_v28 }
 0x518   :  { %19416 = vmatprep.subr.bf16.mxu0 %v24148_v8  ;;  %19557 = vmatprep.subr.bf16.mxu1 %v24148_v8 }
 0x519   :  { %16664 = vmatprep.mubr.msk.f32.mxu1 %vm20508_vm0, %v24209_v25 }
 0x51b   :  { %19418 = vmatpush3.bf16.msra.mxu0 %v20676_v34  ;;  %19559 = vmatpush3.bf16.msra.mxu1 %v24210_v49 }
 0x51c   :  { %19419 = vmatprep.subr.bf16.mxu0 %v24148_v8  ;;  %19560 = vmatprep.subr.bf16.mxu1 %v24148_v8 }
 0x51f   :  { %19421 = vmatpush3.bf16.msra.mxu0 %v24211_v54  ;;  %19562 = vmatpush3.bf16.msra.mxu1 %v24212_v52 }
 0x520   :  { %19422 = vmatprep.subr.bf16.mxu0 %v24148_v8  ;;  %19563 = vmatprep.subr.bf16.mxu1 %v24148_v8 }
 0x523   :  { %19424 = vmatpush3.bf16.msra.mxu0 %v24213_v24  ;;  %19565 = vmatpush3.bf16.msra.mxu1 %v24214_v37 }
 0x524   :  { %19425 = vmatprep.subr.bf16.mxu0 %v24148_v8  ;;  %19566 = vmatprep.subr.bf16.mxu1 %v24148_v8 }
 0x527   :  { %19427 = vmatpush3.bf16.msra.mxu0 %v24215_v45  ;;  %19568 = vmatpush3.bf16.msra.mxu1 %v24216_v32 }
 0x528   :  { %19428 = vmatprep.subr.bf16.mxu0 %v24148_v8  ;;  %19569 = vmatprep.subr.bf16.mxu1 %v24148_v8 }
 0x52b   :  { %19430 = vmatpush3.bf16.msra.mxu0 %v24217_v61  ;;  %19571 = vmatpush3.bf16.msra.mxu1 %v24218_v46 }
 0x52c   :  { %19431 = vmatprep.subr.bf16.mxu0 %v24148_v8  ;;  %19572 = vmatprep.subr.bf16.mxu1 %v24148_v8 }
 0x52f   :  { %19433 = vmatpush3.bf16.msra.mxu0 %v24219_v60  ;;  %19574 = vmatpush3.bf16.msra.mxu1 %v24220_v26 }
 0x530   :  { %19434 = vmatprep.subr.bf16.mxu0 %v24148_v8  ;;  %19575 = vmatprep.subr.bf16.mxu1 %v24148_v8 }
 0x532   :  { %16455 = vmatmul.mubr.f32.vlgmr.msra.gmra.mrb[22].mxu0 %v8025_v51  ;;  %v24369_v51 = vld [vmem:[#allocation36_spill] sm:$0xff] }
 0x533   :  { %19436 = vmatpush3.bf16.msra.mxu0 %v20890_v13  ;;  %19577 = vmatpush3.bf16.msra.mxu1 %v24227_v36 }
 0x534   :  { %19437 = vmatprep.subr.bf16.mxu0 %v24148_v8  ;;  %19578 = vmatprep.subr.bf16.mxu1 %v24148_v8 }
 0x535   :  { %16489 = vmatprep.mubr.msk.f32.mxu0 %vm20508_vm0, %v24209_v25 }
 0x536   :  { %16665 = vmatmul.mubr.f32.vlgmr.msra.gmra.mrb[32].mxu1 %v8672_v43  ;;  %v20514_v43 = vmov 4  }
 0x537   :  { %19439 = vmatpush3.bf16.msra.mxu0 %v20906_v5  ;;  %19580 = vmatpush3.bf16.msra.mxu1 %v20920_v10 }
 0x538   :  { %19440 = vmatprep.subr.bf16.mxu0 %v24148_v8  ;;  %19581 = vmatprep.subr.bf16.mxu1 %v24148_v8 }
 0x539   :  { %16699 = vmatprep.mubr.msk.f32.mxu1 %vm20508_vm0, %v24209_v25  ;;  %20443 = vset.pattern.permute.xlu1 %v20514_v43 }
 0x53a   :  { %20442 = vset.pattern.permute.xlu0 %v20514_v43  ;;  %10541 = vperm.xlu1 %20443, %v22686_v48   ;;  %v24370_v43 = vld [vmem:[#allocation41_spill] sm:$0xff] }
 0x53b   :  { %19442 = vmatpush3.bf16.msra.mxu0 %v20938_v11  ;;  %19583 = vmatpush3.bf16.msra.mxu1 %v20989_v14  ;;  %v24371_v48 = vld [vmem:[#allocation37_spill] sm:$0xff] }
 0x53c   :  { %19443 = vmatprep.subr.bf16.mxu0 %v24148_v8  ;;  %19584 = vmatprep.subr.bf16.mxu1 %v24148_v8 }
 0x53d   :  { %9894 = vperm.xlu0 %20442, %v20452_v18   ;;  %v24372_v18 = vld [vmem:[#allocation40_spill] sm:$0xff] }
 0x53e   :  { %11188 = vperm.xlu1 %20443, %v20453_v19   ;;  %v24373_v19 = vld [vmem:[#allocation42_spill] sm:$0xff] }
 0x53f   :  { %19445 = vmatpush3.bf16.msra.mxu0 %v20998_v17  ;;  %19586 = vmatpush3.bf16.msra.mxu1 %v21018_v23 }
 0x540   :  { %19446 = vmatprep.subr.bf16.mxu0 %v24148_v8  ;;  %19587 = vmatprep.subr.bf16.mxu1 %v24148_v8 }
 0x543   :  { %19448 = vmatpush3.bf16.msra.mxu0 %v21038_v47  ;;  %19589 = vmatpush3.bf16.msra.mxu1 %v21070_v38 }
 0x544   :  { %19449 = vmatprep.subr.bf16.mxu0 %v24148_v8  ;;  %19590 = vmatprep.subr.bf16.mxu1 %v24148_v8 }
 0x547   :  { %19451 = vmatpush3.bf16.msra.mxu0 %v24313_v62  ;;  %19592 = vmatpush3.bf16.msra.mxu1 %v21092_v30 }
 0x548   :  { %19452 = vmatprep.subr.bf16.mxu0 %v24148_v8  ;;  %19593 = vmatprep.subr.bf16.mxu1 %v24148_v8 }
 0x54b   :  { %19454 = vmatpush3.bf16.msra.mxu0 %v24369_v51  ;;  %19595 = vmatpush3.bf16.msra.mxu1 %v21153_v59 }
 0x54c   :  { %19455 = vmatprep.subr.bf16.mxu0 %v24148_v8  ;;  %19596 = vmatprep.subr.bf16.mxu1 %v24148_v8 }
 0x54f   :  { %19457 = vmatpush3.bf16.msra.mxu0 %v24370_v43  ;;  %19598 = vmatpush3.bf16.msra.mxu1 %v21176_v42 }
 0x550   :  { %19458 = vmatprep.subr.bf16.mxu0 %v24148_v8  ;;  %19599 = vmatprep.subr.bf16.mxu1 %v24148_v8 }
 0x552   :  { %16490 = vmatmul.mubr.msk.f32.vlgmr.msra.gmra.mrb[22].mxu0 %vm7937_vm13, %v24285_v44 }
 0x553   :  { %19460 = vmatpush3.bf16.msra.mxu0 %v24371_v48  ;;  %19601 = vmatpush3.bf16.msra.mxu1 %v21189_v15 }
 0x554   :  { %19461 = vmatprep.subr.bf16.mxu0 %v24148_v8  ;;  %19602 = vmatprep.subr.bf16.mxu1 %v24148_v8 }
 0x555   :  { %16524 = vmatprep.mubr.msk.f32.mxu0 %vm20508_vm0, %v24209_v25 }
 0x556   :  { %16700 = vmatmul.mubr.msk.f32.vlgmr.msra.gmra.mrb[32].mxu1 %vm8584_vm14, %v24285_v44 }
 0x557   :  { %19463 = vmatpush3.bf16.msra.mxu0 %v24372_v18  ;;  %19604 = vmatpush3.bf16.msra.mxu1 %v21158_v35 }
 0x558   :  { %19464 = vmatprep.subr.bf16.mxu0 %v24148_v8  ;;  %19605 = vmatprep.subr.bf16.mxu1 %v24148_v8 }
 0x559   :  { %16734 = vmatprep.mubr.msk.f32.mxu1 %vm20508_vm0, %v24209_v25 }
 0x55b   :  { %19466 = vmatpush3.bf16.msra.mxu0 %v24373_v19  ;;  %19607 = vmatpush3.bf16.msra.mxu1 %v21174_v55  ;;  %v24376_v19 = vld [vmem:[#allocation49_spill] sm:$0xff] }
 0x55c   :  { %19467 = vmatprep.subr.bf16.mxu0 %v24148_v8  ;;  %19608 = vmatprep.subr.bf16.mxu1 %v24148_v8 }
 0x55f   :  { %19469 = vmatpush3.bf16.msra.mxu0 %v24374_v1  ;;  %19610 = vmatpush3.bf16.msra.mxu1 %v24287_v12  ;;  %v24377_v1 = vld [vmem:[#allocation51_spill] sm:$0xff] }
 0x560   :  { %19470 = vmatprep.subr.bf16.mxu0 %v24148_v8  ;;  %19611 = vmatprep.subr.bf16.mxu1 %v24148_v8 }
 0x563   :  { %19472 = vmatpush3.bf16.msra.mxu0 %v24375_v31  ;;  %19613 = vmatpush3.bf16.msra.mxu1 %v24289_v4  ;;  %v24378_v31 = vld [vmem:[#allocation53_spill] sm:$0xff] }
 0x564   :  { %19473 = vmatprep.subr.bf16.mxu0 %v24148_v8  ;;  %19614 = vmatprep.subr.bf16.mxu1 %v24148_v8 }
 0x567   :  { %19475 = vmatpush3.bf16.msra.mxu0 %v24376_v19  ;;  %19616 = vmatpush3.bf16.msra.mxu1 %v24291_v57 }
 0x568   :  { %19476 = vmatprep.subr.bf16.mxu0 %v24148_v8  ;;  %19617 = vmatprep.subr.bf16.mxu1 %v24148_v8 }
 0x56b   :  { %19478 = vmatpush3.bf16.msra.mxu0 %v24377_v1  ;;  %19619 = vmatpush3.bf16.msra.mxu1 %v24293_v53 }
 0x56c   :  { %19479 = vmatprep.subr.bf16.mxu0 %v24148_v8  ;;  %19620 = vmatprep.subr.bf16.mxu1 %v24148_v8 }
 0x56f   :  { %19481 = vmatpush3.bf16.msra.mxu0 %v24378_v31  ;;  %19622 = vmatpush3.bf16.msra.mxu1 %v24295_v22 }
 0x570   :  { %19482 = vmatprep.subr.bf16.mxu0 %v24148_v8  ;;  %19623 = vmatprep.subr.bf16.mxu1 %v24148_v8 }
 0x572   :  { %16525 = vmatmul.mubr.f32.vlgmr.msra.gmra.mrb[22].mxu0 %v23056_v16 }
 0x573   :  { %19484 = vmatpush3.bf16.msra.mxu0 %v20640_v20  ;;  %19625 = vmatpush3.bf16.msra.mxu1 %v24297_v6 }
 0x574   :  { %19485 = vmatprep.subr.bf16.mxu0 %v24148_v8  ;;  %19626 = vmatprep.subr.bf16.mxu1 %v24148_v8 }
 0x575   :  { %16559 = vmatprep.mubr.msk.f32.mxu0 %vm20508_vm0, %v24209_v25 }
 0x576   :  { %16735 = vmatmul.mubr.f32.vlgmr.msra.gmra.mrb[32].mxu1 %v23066_v63 }
 0x577   :  { %19487 = vmatpush3.bf16.msra.mxu0 %v20655_v27  ;;  %19628 = vmatpush3.bf16.msra.mxu1 %v20661_v28 }
 0x578   :  { %19488 = vmatprep.subr.bf16.mxu0 %v24148_v8  ;;  %19629 = vmatprep.subr.bf16.mxu1 %v24148_v8 }
 0x579   :  { %16769 = vmatprep.mubr.msk.f32.mxu1 %vm20508_vm0, %v24209_v25 }
 0x57b   :  { %19490 = vmatpush3.bf16.msra.mxu0 %v20676_v34  ;;  %19631 = vmatpush3.bf16.msra.mxu1 %v24210_v49 }
 0x57c   :  { %19491 = vmatprep.subr.bf16.mxu0 %v24148_v8  ;;  %19632 = vmatprep.subr.bf16.mxu1 %v24148_v8 }
 0x57f   :  { %19493 = vmatpush3.bf16.msra.mxu0 %v24211_v54  ;;  %19634 = vmatpush3.bf16.msra.mxu1 %v24212_v52 }
 0x580   :  { %19494 = vmatprep.subr.bf16.mxu0 %v24148_v8  ;;  %19635 = vmatprep.subr.bf16.mxu1 %v24148_v8 }
 0x583   :  { %19496 = vmatpush3.bf16.msra.mxu0 %v24213_v24  ;;  %19637 = vmatpush3.bf16.msra.mxu1 %v24214_v37 }
 0x584   :  { %19497 = vmatprep.subr.bf16.mxu0 %v24148_v8  ;;  %19638 = vmatprep.subr.bf16.mxu1 %v24148_v8 }
 0x585   :  { %v23201_v31 = vpop.f32.mrb[14].mxu0 }
 0x586   :  { %24379 = vst [vmem:[#allocation47_spill] sm:$0xff] %v23201_v31  ;;  %v23205_v1 = vmul.f32 %v23201_v31, %v24353_v56  ;;  %v16001_v19 = vpop.f32.mrb[15].mxu0 }
 0x587   :  { %19499 = vmatpush3.bf16.msra.mxu0 %v24215_v45  ;;  %19640 = vmatpush3.bf16.msra.mxu1 %v24216_v32  ;;  %v24385_v19 = vld [vmem:[#allocation8_spill] sm:$0xff] }
 0x588   :  { %24380 = vst [vmem:[#allocation50_spill] sm:$0xff] %v23205_v1  ;;  %19500 = vmatprep.subr.bf16.mxu0 %v24148_v8  ;;  %19641 = vmatprep.subr.bf16.mxu1 %v24148_v8 }
 0x589   :  { %v23211_v18 = vpop.f32.mrb[24].mxu1 }
 0x58a   :  { %24381 = vst [vmem:[#allocation52_spill] sm:$0xff] %v23211_v18  ;;  %v16211_v48 = vpop.f32.mrb[25].mxu1  ;;  %v23215_v43 = vmul.f32 %v23211_v18, %v21906_v50  ;;  %v23219_v31 = vmul.f32 %v23211_v18, %v24339_v3  ;;  %v24386_v18 = vand.u32 4294901760, %v23066_v63  ;;  %v24389_v63 = vld [vmem:[#allocation11_spill] sm:$0xff] }
 0x58b   :  { %19502 = vmatpush3.bf16.msra.mxu0 %v24217_v61  ;;  %19643 = vmatpush3.bf16.msra.mxu1 %v24218_v46  ;;  %v24384_v48 = vand.u32 4294901760, %v23056_v16  ;;  %v24388_v16 = vld [vmem:[#allocation10_spill] sm:$0xff] }
 0x58c   :  { %24382 = vst [vmem:[#allocation54_spill] sm:$0xff] %v23215_v43  ;;  %24383 = vst [vmem:[#allocation55_spill] sm:$0xff] %v23219_v31  ;;  %19503 = vmatprep.subr.bf16.mxu0 %v24148_v8  ;;  %19644 = vmatprep.subr.bf16.mxu1 %v24148_v8  ;;  %v24387_v31 = vld [vmem:[#allocation9_spill] sm:$0xff] }
 0x58d   :  { %v24391_v43 = vld [vmem:[#allocation13_spill] sm:$0xff] }
 0x58f   :  { %19505 = vmatpush3.bf16.msra.mxu0 %v24219_v60  ;;  %19646 = vmatpush3.bf16.msra.mxu1 %v24220_v26 }
 0x590   :  { %19506 = vmatprep.subr.bf16.mxu0 %v24148_v8  ;;  %19647 = vmatprep.subr.bf16.mxu1 %v24148_v8 }
 0x592   :  { %16560 = vmatmul.mubr.f32.vlgmr.msra.gmra.mrb[22].mxu0 %v24384_v48 }
 0x593   :  { %19508 = vmatpush3.bf16.msra.mxu0 %v24385_v19  ;;  %19649 = vmatpush3.bf16.msra.mxu1 %v24227_v36 }
 0x594   :  { %19509 = vmatprep.subr.bf16.mxu0 %v24148_v8  ;;  %19650 = vmatprep.subr.bf16.mxu1 %v24148_v8 }
 0x595   :  { %16594 = vmatprep.mubr.msk.f32.mxu0 %vm20508_vm0, %v24209_v25 }
 0x596   :  { %16770 = vmatmul.mubr.f32.vlgmr.msra.gmra.mrb[32].mxu1 %v24386_v18  ;;  %v24390_v18 = vld [vmem:[#allocation12_spill] sm:$0xff] }
 0x597   :  { %19511 = vmatpush3.bf16.msra.mxu0 %v24387_v31  ;;  %19652 = vmatpush3.bf16.msra.mxu1 %v21405_v29 }
 0x598   :  { %19512 = vmatprep.subr.bf16.mxu0 %v24148_v8  ;;  %19653 = vmatprep.subr.bf16.mxu1 %v24148_v8 }
 0x599   :  { %16804 = vmatprep.mubr.msk.f32.mxu1 %vm20508_vm0, %v24209_v25 }
 0x59b   :  { %19514 = vmatpush3.bf16.msra.mxu0 %v24388_v16  ;;  %19655 = vmatpush3.bf16.msra.mxu1 %v21425_v0 }
 0x59c   :  { %19515 = vmatprep.subr.bf16.mxu0 %v24148_v8  ;;  %19656 = vmatprep.subr.bf16.mxu1 %v24148_v8 }
 0x59f   :  { %19517 = vmatpush3.bf16.msra.mxu0 %v24389_v63  ;;  %19658 = vmatpush3.bf16.msra.mxu1 %v21443_v39 }
 0x5a0   :  { %19518 = vmatprep.subr.bf16.mxu0 %v24148_v8  ;;  %19659 = vmatprep.subr.bf16.mxu1 %v24148_v8 }
 0x5a3   :  { %19520 = vmatpush3.bf16.msra.mxu0 %v24390_v18  ;;  %19661 = vmatpush3.bf16.msra.mxu1 %v21459_v58  ;;  %v24392_v18 = vld [vmem:[#allocation15_spill] sm:$0xff] }
 0x5a4   :  { %19521 = vmatprep.subr.bf16.mxu0 %v24148_v8  ;;  %19662 = vmatprep.subr.bf16.mxu1 %v24148_v8 }
 0x5a5   :  { %v7362_v48 = vpop.f32.mrb[16].mxu0 }
 0x5a6   :  { %v16246_v1 = vpop.f32.mrb[17].mxu0 }
 0x5a7   :  { %19523 = vmatpush3.bf16.msra.mxu0 %v24391_v43  ;;  %19664 = vmatpush3.bf16.msra.mxu1 %v24331_v21  ;;  %v24393_v1 = vld [vmem:[#allocation19_spill] sm:$0xff] }
 0x5a8   :  { %19524 = vmatprep.subr.bf16.mxu0 %v24148_v8  ;;  %19665 = vmatprep.subr.bf16.mxu1 %v24148_v8 }
 0x5a9   :  { %v7513_v63 = vpop.f32.mrb[26].mxu1 }
 0x5aa   :  { %v7514_v16 = vadd.f32 %v7513_v63, %v7362_v48  ;;  %v16281_v31 = vpop.f32.mrb[27].mxu1 }
 0x5ab   :  { %19526 = vmatpush3.bf16.msra.mxu0 %v24392_v18  ;;  %19667 = vmatpush3.bf16.msra.mxu1 %v24333_v9 }
 0x5ac   :  { %19527 = vmatprep.subr.bf16.mxu0 %v24148_v8  ;;  %19668 = vmatprep.subr.bf16.mxu1 %v24148_v8 }
 0x5af   :  { %19529 = vmatpush3.bf16.msra.mxu0 %v24393_v1  ;;  %19670 = vmatpush3.bf16.msra.mxu1 %v24335_v40 }
 0x5b0   :  { %19530 = vmatprep.subr.bf16.mxu0 %v24148_v8  ;;  %19671 = vmatprep.subr.bf16.mxu1 %v24148_v8 }
 0x5b2   :  { %16595 = vmatmul.mubr.msk.f32.vlgmr.msra.gmra.mrb[22].mxu0 %vm7937_vm13, %v24285_v44 }
 0x5b3   :  { %19532 = vmatpush3.bf16.msra.mxu0 %v20640_v20  ;;  %19673 = vmatpush3.bf16.msra.mxu1 %v24336_v7 }
 0x5b4   :  { %19533 = vmatprep.subr.bf16.mxu0 %v24148_v8  ;;  %19674 = vmatprep.subr.bf16.mxu1 %v24148_v8 }
 0x5b5   :  { %16629 = vmatprep.mubr.msk.f32.mxu0 %vm20508_vm0, %v24209_v25 }
 0x5b6   :  { %16805 = vmatmul.mubr.msk.f32.vlgmr.msra.gmra.mrb[32].mxu1 %vm8584_vm14, %v24285_v44 }
 0x5b7   :  { %19535 = vmatpush3.bf16.msra.mxu0 %v20655_v27  ;;  %19676 = vmatpush3.bf16.msra.mxu1 %v20661_v28 }
 0x5b8   :  { %19536 = vmatprep.subr.bf16.mxu0 %v24148_v8  ;;  %19677 = vmatprep.subr.bf16.mxu1 %v24148_v8 }
 0x5b9   :  { %16839 = vmatprep.mubr.msk.f32.mxu1 %vm20508_vm0, %v24209_v25  ;;  %v23478_v41 = vpop.permute.xlu1 %10541 }
 0x5ba   :  { %vm10543_vm2 = vcmp.eq.s32.totalorder %v23478_v41, %v21239_v33 }
 0x5bb   :  { %19538 = vmatpush3.bf16.msra.mxu0 %v20676_v34  ;;  %19679 = vmatpush3.bf16.msra.mxu1 %v24210_v49 }
 0x5bc   :  { %19539 = vmatprep.subr.bf16.mxu0 %v24148_v8  ;;  %19680 = vmatprep.subr.bf16.mxu1 %v24148_v8 }
 0x5bf   :  { %19541 = vmatpush3.bf16.msra.mxu0 %v24211_v54  ;;  %19682 = vmatpush3.bf16.msra.mxu1 %v24212_v52 }
 0x5c0   :  { %19542 = vmatprep.subr.bf16.mxu0 %v24148_v8  ;;  %19683 = vmatprep.subr.bf16.mxu1 %v24148_v8 }
 0x5c3   :  { %19544 = vmatpush3.bf16.msra.mxu0 %v24213_v24  ;;  %19685 = vmatpush3.bf16.msra.mxu1 %v24214_v37 }
 0x5c4   :  { %19545 = vmatprep.subr.bf16.mxu0 %v24148_v8  ;;  %19686 = vmatprep.subr.bf16.mxu1 %v24148_v8 }
 0x5c5   :  { %v7617_v31 = vpop.f32.mrb[18].mxu0 }
 0x5c6   :  { %v7618_v63 = vadd.f32 %v7617_v31, %v7514_v16  ;;  %v16316_v48 = vpop.f32.mrb[19].mxu0 }
 0x5c7   :  { %19547 = vmatpush3.bf16.msra.mxu0 %v24215_v45  ;;  %19688 = vmatpush3.bf16.msra.mxu1 %v24216_v32 }
 0x5c8   :  { %19548 = vmatprep.subr.bf16.mxu0 %v24148_v8  ;;  %19689 = vmatprep.subr.bf16.mxu1 %v24148_v8 }
 0x5c9   :  { %v7706_v1 = vpop.f32.mrb[28].mxu1 }
 0x5ca   :  { %v7707_v18 = vadd.f32 %v7706_v1, %v7618_v63  ;;  %v16351_v43 = vpop.f32.mrb[29].mxu1 }
 0x5cb   :  { %19550 = vmatpush3.bf16.msra.mxu0 %v24217_v61  ;;  %19691 = vmatpush3.bf16.msra.mxu1 %v24218_v46  ;;  %v23351_v43 = vsub.f32 %v12050_v2, %v12050_v2 }
 0x5cc   :  { %19551 = vmatprep.subr.bf16.mxu0 %v24148_v8  ;;  %19692 = vmatprep.subr.bf16.mxu1 %v24148_v8 }
 0x5cd   :  { %v9317_v63 = vand.u32 4294901760, %v23351_v43 }
 0x5cf   :  { %19553 = vmatpush3.bf16.msra.mxu0 %v24219_v60  ;;  %19694 = vmatpush3.bf16.msra.mxu1 %v24220_v26 }
 0x5d0   :  { %19695 = vmatprep.subr.bf16.mxu1 %v24148_v8  ;;  %19698 = vmatprep.subr.bf16.mxu0 %v24148_v8 }
 0x5d2   :  { %16630 = vmatmul.mubr.msk.f32.vlgmr.msra.gmra.mrb[22].mxu0 %vm7937_vm13, %v24285_v44  ;;  %vm11934_vm13 = vcmask 80896  }
 0x5d3   :  { %19697 = vmatpush3.bf16.msra.mxu1 %v24227_v36  ;;  %19700 = vmatpush3.bf16.msra.mxu0 %v20661_v28 }
 0x5d4   :  { %19701 = vmatprep.subr.bf16.mxu0 %v24148_v8  ;;  %19722 = vmatprep.subr.bf16.mxu1 %v24148_v8 }
 0x5d5   :  { %16874 = vmatprep.mubr.msk.f32.mxu0 %vm20508_vm0, %v24209_v25 }
 0x5d6   :  { %16840 = vmatmul.mubr.msk.f32.vlgmr.msra.gmra.mrb[32].mxu1 %vm8584_vm14, %v24285_v44  ;;  %vm11936_vm14 = vcmask 89088  }
 0x5d7   :  { %19703 = vmatpush3.bf16.msra.mxu0 %v24210_v49  ;;  %19724 = vmatpush3.bf16.msra.mxu1 %v20920_v10 }
 0x5d8   :  { %19704 = vmatprep.subr.bf16.mxu0 %v24148_v8  ;;  %19725 = vmatprep.subr.bf16.mxu1 %v24148_v8 }
 0x5d9   :  { %16909 = vmatprep.mubr.msk.f32.mxu1 %vm20508_vm0, %v24209_v25 }
 0x5db   :  { %19706 = vmatpush3.bf16.msra.mxu0 %v24212_v52  ;;  %19727 = vmatpush3.bf16.msra.mxu1 %v20989_v14 }
 0x5dc   :  { %19707 = vmatprep.subr.bf16.mxu0 %v24148_v8  ;;  %19728 = vmatprep.subr.bf16.mxu1 %v24148_v8 }
 0x5df   :  { %19709 = vmatpush3.bf16.msra.mxu0 %v24214_v37  ;;  %19730 = vmatpush3.bf16.msra.mxu1 %v21018_v23 }
 0x5e0   :  { %19710 = vmatprep.subr.bf16.mxu0 %v24148_v8  ;;  %19731 = vmatprep.subr.bf16.mxu1 %v24148_v8 }
 0x5e3   :  { %19712 = vmatpush3.bf16.msra.mxu0 %v24216_v32  ;;  %19733 = vmatpush3.bf16.msra.mxu1 %v21070_v38 }
 0x5e4   :  { %19713 = vmatprep.subr.bf16.mxu0 %v24148_v8  ;;  %19734 = vmatprep.subr.bf16.mxu1 %v24148_v8 }
 0x5e5   :  { %v7825_v16 = vpop.f32.mrb[20].mxu0 }
 0x5e6   :  { %v7826_v1 = vadd.f32 %v7825_v16, %v7707_v18  ;;  %v16386_v31 = vpop.f32.mrb[21].mxu0  ;;  %v9318_v18 = vsub.f32 %v23351_v43, %v9317_v63 }
 0x5e7   :  { %19715 = vmatpush3.bf16.msra.mxu0 %v24218_v46  ;;  %19736 = vmatpush3.bf16.msra.mxu1 %v21092_v30  ;;  %v12058_v31 = vsel %vm10543_vm2, 1.0, %v24209_v25 }
 0x5e8   :  { %19716 = vmatprep.subr.bf16.mxu0 %v24148_v8  ;;  %19737 = vmatprep.subr.bf16.mxu1 %v24148_v8  ;;  %v9319_v16 = vand.u32 4294901760, %v9318_v18 }
 0x5e9   :  { %v7912_v48 = vpop.f32.mrb[30].mxu1 }
 0x5ea   :  { %v23360_v2 = vadd.f32 %v7912_v48, %v7826_v1  ;;  %v16421_v19 = vpop.f32.mrb[31].mxu1 }
 0x5eb   :  { %19718 = vmatpush3.bf16.msra.mxu0 %v24220_v26  ;;  %19739 = vmatpush3.bf16.msra.mxu1 %v21153_v59  ;;  %v23466_v19 = vpop.permute.xlu0 %9894 }
 0x5ec   :  { %19719 = vmatprep.subr.bf16.mxu0 %v24148_v8  ;;  %19740 = vmatprep.subr.bf16.mxu1 %v24148_v8  ;;  %vm9896_vm1 = vcmp.eq.s32.totalorder %v23466_v19, %v21239_v33 }
 0x5ef   :  { %19721 = vmatpush3.bf16.msra.mxu0 %v24227_v36  ;;  %19742 = vmatpush3.bf16.msra.mxu1 %v21176_v42 }
 0x5f0   :  { %19743 = vmatprep.subr.bf16.mxu1 %v24148_v8  ;;  %19746 = vmatprep.subr.bf16.mxu0 %v24148_v8 }
 0x5f2   :  { %16875 = vmatmul.mubr.f32.vlgmr.msra.gmra.mrb[24].mxu0 %v9319_v16 }
 0x5f3   :  { %19745 = vmatpush3.bf16.msra.mxu1 %v21189_v15  ;;  %19748 = vmatpush3.bf16.msra.mxu0 %v21158_v35 }
 0x5f4   :  { %19749 = vmatprep.subr.bf16.mxu0 %v24148_v8  ;;  %19770 = vmatprep.subr.bf16.mxu1 %v24148_v8 }
 0x5f5   :  { %16944 = vmatprep.mubr.msk.f32.mxu0 %vm20508_vm0, %v24209_v25 }
 0x5f6   :  { %16910 = vmatmul.mubr.msk.f32.vlgmr.msra.gmra.mrb[34].mxu1 %vm9231_vm15, %v24285_v44 }
 0x5f7   :  { %19751 = vmatpush3.bf16.msra.mxu0 %v21174_v55  ;;  %19772 = vmatpush3.bf16.msra.mxu1 %v20661_v28 }
 0x5f8   :  { %19752 = vmatprep.subr.bf16.mxu0 %v24148_v8  ;;  %19773 = vmatprep.subr.bf16.mxu1 %v24148_v8 }
 0x5f9   :  { %16979 = vmatprep.mubr.msk.f32.mxu1 %vm20508_vm0, %v24209_v25 }
 0x5fb   :  { %19754 = vmatpush3.bf16.msra.mxu0 %v24287_v12  ;;  %19775 = vmatpush3.bf16.msra.mxu1 %v24210_v49 }
 0x5fc   :  { %19755 = vmatprep.subr.bf16.mxu0 %v24148_v8  ;;  %19776 = vmatprep.subr.bf16.mxu1 %v24148_v8 }
 0x5ff   :  { %19757 = vmatpush3.bf16.msra.mxu0 %v24289_v4  ;;  %19778 = vmatpush3.bf16.msra.mxu1 %v24212_v52 }
 0x600   :  { %19758 = vmatprep.subr.bf16.mxu0 %v24148_v8  ;;  %19779 = vmatprep.subr.bf16.mxu1 %v24148_v8 }
 0x603   :  { %19760 = vmatpush3.bf16.msra.mxu0 %v24291_v57  ;;  %19781 = vmatpush3.bf16.msra.mxu1 %v24214_v37 }
 0x604   :  { %19761 = vmatprep.subr.bf16.mxu0 %v24148_v8  ;;  %19782 = vmatprep.subr.bf16.mxu1 %v24148_v8 }
 0x607   :  { %19763 = vmatpush3.bf16.msra.mxu0 %v24293_v53  ;;  %19784 = vmatpush3.bf16.msra.mxu1 %v24216_v32 }
 0x608   :  { %19764 = vmatprep.subr.bf16.mxu0 %v24148_v8  ;;  %19785 = vmatprep.subr.bf16.mxu1 %v24148_v8 }
 0x60b   :  { %19766 = vmatpush3.bf16.msra.mxu0 %v24295_v22  ;;  %19787 = vmatpush3.bf16.msra.mxu1 %v24218_v46 }
 0x60c   :  { %19767 = vmatprep.subr.bf16.mxu0 %v24148_v8  ;;  %19788 = vmatprep.subr.bf16.mxu1 %v24148_v8 }
 0x60f   :  { %19769 = vmatpush3.bf16.msra.mxu0 %v24297_v6  ;;  %19790 = vmatpush3.bf16.msra.mxu1 %v24220_v26 }
 0x610   :  { %19791 = vmatprep.subr.bf16.mxu1 %v24148_v8  ;;  %19794 = vmatprep.subr.bf16.mxu0 %v24148_v8 }
 0x612   :  { %16945 = vmatmul.mubr.f32.vlgmr.msra.gmra.mrb[26].mxu0 %v23351_v43  ;;  %v12054_v43 = vsel %vm9896_vm1, 1.0, %v24209_v25 }
 0x613   :  { %19793 = vmatpush3.bf16.msra.mxu1 %v24227_v36  ;;  %19796 = vmatpush3.bf16.msra.mxu0 %v21405_v29  ;;  %v23488_v1 = vsub.f32 %v12054_v43, %v12054_v43 }
 0x614   :  { %19797 = vmatprep.subr.bf16.mxu0 %v24148_v8  ;;  %19818 = vmatprep.subr.bf16.mxu1 %v24148_v8 }
 0x615   :  { %17014 = vmatprep.mubr.msk.f32.mxu0 %vm20508_vm0, %v24209_v25  ;;  %v24132_v48 = vand.u32 4294901760, %v23488_v1 }
 0x616   :  { %16980 = vmatmul.mubr.f32.vlgmr.msra.gmra.mrb[36].mxu1 %v9317_v63  ;;  %v23498_v63 = vsub.f32 %v12058_v31, %v12058_v31 }
 0x617   :  { %19799 = vmatpush3.bf16.msra.mxu0 %v21425_v0  ;;  %19820 = vmatpush3.bf16.msra.mxu1 %v20661_v28  ;;  %v9983_v16 = vsub.f32 %v23488_v1, %v24132_v48 }
 0x618   :  { %19800 = vmatprep.subr.bf16.mxu0 %v24148_v8  ;;  %19821 = vmatprep.subr.bf16.mxu1 %v24148_v8  ;;  %v10629_v18 = vand.u32 4294901760, %v23498_v63 }
 0x619   :  { %17049 = vmatprep.mubr.msk.f32.mxu1 %vm20508_vm0, %v24209_v25  ;;  %v9984_v43 = vand.u32 4294901760, %v9983_v16  ;;  %v24402_v16 = vld [vmem:[#allocation53_spill] sm:$0xff] }
 0x61a   :  { %v10630_v31 = vsub.f32 %v23498_v63, %v10629_v18 }
 0x61b   :  { %19802 = vmatpush3.bf16.msra.mxu0 %v21443_v39  ;;  %19823 = vmatpush3.bf16.msra.mxu1 %v24210_v49 }
 0x61c   :  { %19803 = vmatprep.subr.bf16.mxu0 %v24148_v8  ;;  %19824 = vmatprep.subr.bf16.mxu1 %v24148_v8  ;;  %v10631_v48 = vand.u32 4294901760, %v10630_v31 }
 0x61f   :  { %19805 = vmatpush3.bf16.msra.mxu0 %v21459_v58  ;;  %19826 = vmatpush3.bf16.msra.mxu1 %v24212_v52 }
 0x620   :  { %19806 = vmatprep.subr.bf16.mxu0 %v24148_v8  ;;  %19827 = vmatprep.subr.bf16.mxu1 %v24148_v8 }
 0x623   :  { %19808 = vmatpush3.bf16.msra.mxu0 %v24331_v21  ;;  %19829 = vmatpush3.bf16.msra.mxu1 %v24214_v37 }
 0x624   :  { %19809 = vmatprep.subr.bf16.mxu0 %v24148_v8  ;;  %19830 = vmatprep.subr.bf16.mxu1 %v24148_v8 }
 0x627   :  { %19811 = vmatpush3.bf16.msra.mxu0 %v24333_v9  ;;  %19832 = vmatpush3.bf16.msra.mxu1 %v24216_v32 }
 0x628   :  { %19812 = vmatprep.subr.bf16.mxu0 %v24148_v8  ;;  %19833 = vmatprep.subr.bf16.mxu1 %v24148_v8 }
 0x62b   :  { %19814 = vmatpush3.bf16.msra.mxu0 %v24335_v40  ;;  %19835 = vmatpush3.bf16.msra.mxu1 %v24218_v46 }
 0x62c   :  { %19815 = vmatprep.subr.bf16.mxu0 %v24148_v8  ;;  %19836 = vmatprep.subr.bf16.mxu1 %v24148_v8 }
 0x62f   :  { %19817 = vmatpush3.bf16.msra.mxu0 %v24336_v7  ;;  %19838 = vmatpush3.bf16.msra.mxu1 %v24220_v26 }
 0x630   :  { %19839 = vmatprep.subr.bf16.mxu1 %v24148_v8  ;;  %19842 = vmatprep.subr.bf16.mxu0 %v24148_v8 }
 0x632   :  { %17015 = vmatmul.mubr.msk.f32.vlgmr.msra.gmra.mrb[28].mxu0 %vm9231_vm15, %v24285_v44 }
 0x633   :  { %19841 = vmatpush3.bf16.msra.mxu1 %v24227_v36  ;;  %19844 = vmatpush3.bf16.msra.mxu0 %v20640_v20 }
 0x634   :  { %19845 = vmatprep.subr.bf16.mxu0 %v24148_v8  ;;  %19986 = vmatprep.subr.bf16.mxu1 %v24148_v8 }
 0x635   :  { %17084 = vmatprep.mubr.msk.f32.mxu0 %vm20508_vm0, %v24209_v25 }
 0x636   :  { %17050 = vmatmul.mubr.msk.f32.vlgmr.msra.gmra.mrb[38].mxu1 %vm9231_vm15, %v24285_v44  ;;  %vm11938_vm15 = vcmask 97280  }
 0x637   :  { %19847 = vmatpush3.bf16.msra.mxu0 %v20655_v27  ;;  %19988 = vmatpush3.bf16.msra.mxu1 %v20661_v28 }
 0x638   :  { %19848 = vmatprep.subr.bf16.mxu0 %v24148_v8  ;;  %19989 = vmatprep.subr.bf16.mxu1 %v24148_v8 }
 0x639   :  { %17294 = vmatprep.mubr.msk.f32.mxu1 %vm20508_vm0, %v24209_v25 }
 0x63b   :  { %19850 = vmatpush3.bf16.msra.mxu0 %v20676_v34  ;;  %19991 = vmatpush3.bf16.msra.mxu1 %v24210_v49 }
 0x63c   :  { %19851 = vmatprep.subr.bf16.mxu0 %v24148_v8  ;;  %19992 = vmatprep.subr.bf16.mxu1 %v24148_v8 }
 0x63f   :  { %19853 = vmatpush3.bf16.msra.mxu0 %v24211_v54  ;;  %19994 = vmatpush3.bf16.msra.mxu1 %v24212_v52 }
 0x640   :  { %19854 = vmatprep.subr.bf16.mxu0 %v24148_v8  ;;  %19995 = vmatprep.subr.bf16.mxu1 %v24148_v8 }
 0x643   :  { %19856 = vmatpush3.bf16.msra.mxu0 %v24213_v24  ;;  %19997 = vmatpush3.bf16.msra.mxu1 %v24214_v37 }
 0x644   :  { %19857 = vmatprep.subr.bf16.mxu0 %v24148_v8  ;;  %19998 = vmatprep.subr.bf16.mxu1 %v24148_v8 }
 0x647   :  { %19859 = vmatpush3.bf16.msra.mxu0 %v24215_v45  ;;  %20000 = vmatpush3.bf16.msra.mxu1 %v24216_v32 }
 0x648   :  { %19860 = vmatprep.subr.bf16.mxu0 %v24148_v8  ;;  %20001 = vmatprep.subr.bf16.mxu1 %v24148_v8 }
 0x64b   :  { %19862 = vmatpush3.bf16.msra.mxu0 %v24217_v61  ;;  %20003 = vmatpush3.bf16.msra.mxu1 %v24218_v46 }
 0x64c   :  { %19863 = vmatprep.subr.bf16.mxu0 %v24148_v8  ;;  %20004 = vmatprep.subr.bf16.mxu1 %v24148_v8 }
 0x64f   :  { %19865 = vmatpush3.bf16.msra.mxu0 %v24219_v60  ;;  %20006 = vmatpush3.bf16.msra.mxu1 %v24220_v26 }
 0x650   :  { %19866 = vmatprep.subr.bf16.mxu0 %v24148_v8  ;;  %20007 = vmatprep.subr.bf16.mxu1 %v24148_v8 }
 0x652   :  { %17085 = vmatmul.mubr.f32.vlgmr.msra.gmra.mrb[30].mxu0 %v9984_v43 }
 0x653   :  { %19868 = vmatpush3.bf16.msra.mxu0 %v20890_v13  ;;  %20009 = vmatpush3.bf16.msra.mxu1 %v24227_v36  ;;  %v24394_v13 = vld [vmem:[#allocation41_spill] sm:$0xff] }
 0x654   :  { %19869 = vmatprep.subr.bf16.mxu0 %v24148_v8  ;;  %20010 = vmatprep.subr.bf16.mxu1 %v24148_v8 }
 0x655   :  { %17119 = vmatprep.mubr.msk.f32.mxu0 %vm20508_vm0, %v24209_v25 }
 0x656   :  { %17295 = vmatmul.mubr.f32.vlgmr.msra.gmra.mrb[40].mxu1 %v10631_v48  ;;  %v24401_v48 = vld [vmem:[#allocation51_spill] sm:$0xff] }
 0x657   :  { %19871 = vmatpush3.bf16.msra.mxu0 %v20906_v5  ;;  %20012 = vmatpush3.bf16.msra.mxu1 %v20920_v10  ;;  %v24395_v5 = vld [vmem:[#allocation37_spill] sm:$0xff] }
 0x658   :  { %19872 = vmatprep.subr.bf16.mxu0 %v24148_v8  ;;  %20013 = vmatprep.subr.bf16.mxu1 %v24148_v8 }
 0x659   :  { %17329 = vmatprep.mubr.msk.f32.mxu1 %vm20508_vm0, %v24209_v25 }
 0x65b   :  { %19874 = vmatpush3.bf16.msra.mxu0 %v20938_v11  ;;  %20015 = vmatpush3.bf16.msra.mxu1 %v20989_v14  ;;  %v24396_v11 = vld [vmem:[#allocation40_spill] sm:$0xff] }
 0x65c   :  { %19875 = vmatprep.subr.bf16.mxu0 %v24148_v8  ;;  %20016 = vmatprep.subr.bf16.mxu1 %v24148_v8 }
 0x65f   :  { %19877 = vmatpush3.bf16.msra.mxu0 %v20998_v17  ;;  %20018 = vmatpush3.bf16.msra.mxu1 %v21018_v23  ;;  %v24397_v17 = vld [vmem:[#allocation42_spill] sm:$0xff] }
 0x660   :  { %19878 = vmatprep.subr.bf16.mxu0 %v24148_v8  ;;  %20019 = vmatprep.subr.bf16.mxu1 %v24148_v8 }
 0x663   :  { %19880 = vmatpush3.bf16.msra.mxu0 %v21038_v47  ;;  %20021 = vmatpush3.bf16.msra.mxu1 %v21070_v38  ;;  %v24398_v47 = vld [vmem:[#allocation43_spill] sm:$0xff] }
 0x664   :  { %19881 = vmatprep.subr.bf16.mxu0 %v24148_v8  ;;  %20022 = vmatprep.subr.bf16.mxu1 %v24148_v8 }
 0x667   :  { %19883 = vmatpush3.bf16.msra.mxu0 %v24313_v62  ;;  %20024 = vmatpush3.bf16.msra.mxu1 %v21092_v30  ;;  %v24399_v62 = vld [vmem:[#allocation46_spill] sm:$0xff] }
 0x668   :  { %19884 = vmatprep.subr.bf16.mxu0 %v24148_v8  ;;  %20025 = vmatprep.subr.bf16.mxu1 %v24148_v8 }
 0x66b   :  { %19886 = vmatpush3.bf16.msra.mxu0 %v24369_v51  ;;  %20027 = vmatpush3.bf16.msra.mxu1 %v21153_v59  ;;  %v24400_v51 = vld [vmem:[#allocation49_spill] sm:$0xff] }
 0x66c   :  { %19887 = vmatprep.subr.bf16.mxu0 %v24148_v8  ;;  %20028 = vmatprep.subr.bf16.mxu1 %v24148_v8 }
 0x66f   :  { %19889 = vmatpush3.bf16.msra.mxu0 %v24394_v13  ;;  %20030 = vmatpush3.bf16.msra.mxu1 %v21176_v42 }
 0x670   :  { %19890 = vmatprep.subr.bf16.mxu0 %v24148_v8  ;;  %20031 = vmatprep.subr.bf16.mxu1 %v24148_v8 }
 0x672   :  { %17120 = vmatmul.mubr.msk.f32.vlgmr.msra.gmra.mrb[30].mxu0 %vm9896_vm1, %v24285_v44 }
 0x673   :  { %19892 = vmatpush3.bf16.msra.mxu0 %v24395_v5  ;;  %20033 = vmatpush3.bf16.msra.mxu1 %v21189_v15 }
 0x674   :  { %19893 = vmatprep.subr.bf16.mxu0 %v24148_v8  ;;  %20034 = vmatprep.subr.bf16.mxu1 %v24148_v8 }
 0x675   :  { %17154 = vmatprep.mubr.msk.f32.mxu0 %vm20508_vm0, %v24209_v25 }
 0x676   :  { %17330 = vmatmul.mubr.msk.f32.vlgmr.msra.gmra.mrb[40].mxu1 %vm10543_vm2, %v24285_v44 }
 0x677   :  { %19895 = vmatpush3.bf16.msra.mxu0 %v24396_v11  ;;  %20036 = vmatpush3.bf16.msra.mxu1 %v21158_v35 }
 0x678   :  { %19896 = vmatprep.subr.bf16.mxu0 %v24148_v8  ;;  %20037 = vmatprep.subr.bf16.mxu1 %v24148_v8 }
 0x679   :  { %17364 = vmatprep.mubr.msk.f32.mxu1 %vm20508_vm0, %v24209_v25 }
 0x67b   :  { %19898 = vmatpush3.bf16.msra.mxu0 %v24397_v17  ;;  %20039 = vmatpush3.bf16.msra.mxu1 %v21174_v55 }
 0x67c   :  { %19899 = vmatprep.subr.bf16.mxu0 %v24148_v8  ;;  %20040 = vmatprep.subr.bf16.mxu1 %v24148_v8 }
 0x67f   :  { %19901 = vmatpush3.bf16.msra.mxu0 %v24398_v47  ;;  %20042 = vmatpush3.bf16.msra.mxu1 %v24287_v12 }
 0x680   :  { %19902 = vmatprep.subr.bf16.mxu0 %v24148_v8  ;;  %20043 = vmatprep.subr.bf16.mxu1 %v24148_v8 }
 0x683   :  { %19904 = vmatpush3.bf16.msra.mxu0 %v24399_v62  ;;  %20045 = vmatpush3.bf16.msra.mxu1 %v24289_v4  ;;  %v24403_v62 = vand.u32 4294901760, %v23488_v1 }
 0x684   :  { %19905 = vmatprep.subr.bf16.mxu0 %v24148_v8  ;;  %20046 = vmatprep.subr.bf16.mxu1 %v24148_v8 }
 0x687   :  { %19907 = vmatpush3.bf16.msra.mxu0 %v24400_v51  ;;  %20048 = vmatpush3.bf16.msra.mxu1 %v24291_v57  ;;  %v24404_v51 = vld [vmem:[#allocation8_spill] sm:$0xff] }
 0x688   :  { %19908 = vmatprep.subr.bf16.mxu0 %v24148_v8  ;;  %20049 = vmatprep.subr.bf16.mxu1 %v24148_v8 }
 0x68b   :  { %19910 = vmatpush3.bf16.msra.mxu0 %v24401_v48  ;;  %20051 = vmatpush3.bf16.msra.mxu1 %v24293_v53  ;;  %v24405_v48 = vld [vmem:[#allocation9_spill] sm:$0xff] }
 0x68c   :  { %19911 = vmatprep.subr.bf16.mxu0 %v24148_v8  ;;  %20052 = vmatprep.subr.bf16.mxu1 %v24148_v8 }
 0x68f   :  { %19913 = vmatpush3.bf16.msra.mxu0 %v24402_v16  ;;  %20054 = vmatpush3.bf16.msra.mxu1 %v24295_v22 }
 0x690   :  { %19914 = vmatprep.subr.bf16.mxu0 %v24148_v8  ;;  %20055 = vmatprep.subr.bf16.mxu1 %v24148_v8 }
 0x692   :  { %17155 = vmatmul.mubr.f32.vlgmr.msra.gmra.mrb[30].mxu0 %v23488_v1  ;;  %v24406_v1 = vld [vmem:[#allocation10_spill] sm:$0xff] }
 0x693   :  { %19916 = vmatpush3.bf16.msra.mxu0 %v20640_v20  ;;  %20057 = vmatpush3.bf16.msra.mxu1 %v24297_v6 }
 0x694   :  { %19917 = vmatprep.subr.bf16.mxu0 %v24148_v8  ;;  %20058 = vmatprep.subr.bf16.mxu1 %v24148_v8 }
 0x695   :  { %17189 = vmatprep.mubr.msk.f32.mxu0 %vm20508_vm0, %v24209_v25 }
 0x696   :  { %17365 = vmatmul.mubr.f32.vlgmr.msra.gmra.mrb[40].mxu1 %v23498_v63  ;;  %v24407_v63 = vld [vmem:[#allocation11_spill] sm:$0xff] }
 0x697   :  { %19919 = vmatpush3.bf16.msra.mxu0 %v20655_v27  ;;  %20060 = vmatpush3.bf16.msra.mxu1 %v20661_v28 }
 0x698   :  { %19920 = vmatprep.subr.bf16.mxu0 %v24148_v8  ;;  %20061 = vmatprep.subr.bf16.mxu1 %v24148_v8 }
 0x699   :  { %17399 = vmatprep.mubr.msk.f32.mxu1 %vm20508_vm0, %v24209_v25 }
 0x69b   :  { %19922 = vmatpush3.bf16.msra.mxu0 %v20676_v34  ;;  %20063 = vmatpush3.bf16.msra.mxu1 %v24210_v49 }
 0x69c   :  { %19923 = vmatprep.subr.bf16.mxu0 %v24148_v8  ;;  %20064 = vmatprep.subr.bf16.mxu1 %v24148_v8 }
 0x69f   :  { %19925 = vmatpush3.bf16.msra.mxu0 %v24211_v54  ;;  %20066 = vmatpush3.bf16.msra.mxu1 %v24212_v52 }
 0x6a0   :  { %19926 = vmatprep.subr.bf16.mxu0 %v24148_v8  ;;  %20067 = vmatprep.subr.bf16.mxu1 %v24148_v8 }
 0x6a3   :  { %19928 = vmatpush3.bf16.msra.mxu0 %v24213_v24  ;;  %20069 = vmatpush3.bf16.msra.mxu1 %v24214_v37 }
 0x6a4   :  { %19929 = vmatprep.subr.bf16.mxu0 %v24148_v8  ;;  %20070 = vmatprep.subr.bf16.mxu1 %v24148_v8 }
 0x6a5   :  { %v23626_v43 = vpop.f32.mrb[22].mxu0 }
 0x6a6   :  { %v23630_v31 = vmul.f32 %v23626_v43, %v24353_v56  ;;  %v16631_v13 = vpop.f32.mrb[23].mxu0 }
 0x6a7   :  { %19931 = vmatpush3.bf16.msra.mxu0 %v24215_v45  ;;  %20072 = vmatpush3.bf16.msra.mxu1 %v24216_v32 }
 0x6a8   :  { %19932 = vmatprep.subr.bf16.mxu0 %v24148_v8  ;;  %20073 = vmatprep.subr.bf16.mxu1 %v24148_v8 }
 0x6a9   :  { %v23636_v5 = vpop.f32.mrb[32].mxu1 }
 0x6aa   :  { %v16841_v11 = vpop.f32.mrb[33].mxu1  ;;  %v23640_v17 = vmul.f32 %v23636_v5, %v24339_v3  ;;  %v23644_v47 = vmul.f32 %v23636_v5, %v21906_v50 }
 0x6ab   :  { %19934 = vmatpush3.bf16.msra.mxu0 %v24217_v61  ;;  %20075 = vmatpush3.bf16.msra.mxu1 %v24218_v46  ;;  %v24409_v11 = vld [vmem:[#allocation13_spill] sm:$0xff] }
 0x6ac   :  { %19935 = vmatprep.subr.bf16.mxu0 %v24148_v8  ;;  %20076 = vmatprep.subr.bf16.mxu1 %v24148_v8 }
 0x6af   :  { %19937 = vmatpush3.bf16.msra.mxu0 %v24219_v60  ;;  %20078 = vmatpush3.bf16.msra.mxu1 %v24220_v26 }
 0x6b0   :  { %19938 = vmatprep.subr.bf16.mxu0 %v24148_v8  ;;  %20079 = vmatprep.subr.bf16.mxu1 %v24148_v8 }
 0x6b2   :  { %17190 = vmatmul.mubr.f32.vlgmr.msra.gmra.mrb[30].mxu0 %v24403_v62 }
 0x6b3   :  { %19940 = vmatpush3.bf16.msra.mxu0 %v24404_v51  ;;  %20081 = vmatpush3.bf16.msra.mxu1 %v24227_v36 }
 0x6b4   :  { %19941 = vmatprep.subr.bf16.mxu0 %v24148_v8  ;;  %20082 = vmatprep.subr.bf16.mxu1 %v24148_v8 }
 0x6b5   :  { %17224 = vmatprep.mubr.msk.f32.mxu0 %vm20508_vm0, %v24209_v25 }
 0x6b6   :  { %17400 = vmatmul.mubr.f32.vlgmr.msra.gmra.mrb[40].mxu1 %v10629_v18  ;;  %v24408_v18 = vld [vmem:[#allocation12_spill] sm:$0xff] }
 0x6b7   :  { %19943 = vmatpush3.bf16.msra.mxu0 %v24405_v48  ;;  %20084 = vmatpush3.bf16.msra.mxu1 %v21405_v29 }
 0x6b8   :  { %19944 = vmatprep.subr.bf16.mxu0 %v24148_v8  ;;  %20085 = vmatprep.subr.bf16.mxu1 %v24148_v8 }
 0x6b9   :  { %17434 = vmatprep.mubr.msk.f32.mxu1 %vm20508_vm0, %v24209_v25 }
 0x6bb   :  { %19946 = vmatpush3.bf16.msra.mxu0 %v24406_v1  ;;  %20087 = vmatpush3.bf16.msra.mxu1 %v21425_v0  ;;  %v24410_v1 = vld [vmem:[#allocation15_spill] sm:$0xff] }
 0x6bc   :  { %19947 = vmatprep.subr.bf16.mxu0 %v24148_v8  ;;  %20088 = vmatprep.subr.bf16.mxu1 %v24148_v8 }
 0x6bf   :  { %19949 = vmatpush3.bf16.msra.mxu0 %v24407_v63  ;;  %20090 = vmatpush3.bf16.msra.mxu1 %v21443_v39  ;;  %v24411_v63 = vld [vmem:[#allocation19_spill] sm:$0xff] }
 0x6c0   :  { %19950 = vmatprep.subr.bf16.mxu0 %v24148_v8  ;;  %20091 = vmatprep.subr.bf16.mxu1 %v24148_v8 }
 0x6c3   :  { %19952 = vmatpush3.bf16.msra.mxu0 %v24408_v18  ;;  %20093 = vmatpush3.bf16.msra.mxu1 %v21459_v58 }
 0x6c4   :  { %19953 = vmatprep.subr.bf16.mxu0 %v24148_v8  ;;  %20094 = vmatprep.subr.bf16.mxu1 %v24148_v8 }
 0x6c5   :  { %v9321_v16 = vpop.f32.mrb[24].mxu0 }
 0x6c6   :  { %v16876_v13 = vpop.f32.mrb[25].mxu0 }
 0x6c7   :  { %19955 = vmatpush3.bf16.msra.mxu0 %v24409_v11  ;;  %20096 = vmatpush3.bf16.msra.mxu1 %v24331_v21 }
 0x6c8   :  { %19956 = vmatprep.subr.bf16.mxu0 %v24148_v8  ;;  %20097 = vmatprep.subr.bf16.mxu1 %v24148_v8 }
 0x6c9   :  { %v9472_v62 = vpop.f32.mrb[34].mxu1 }
 0x6ca   :  { %v9473_v51 = vadd.f32 %v9472_v62, %v9321_v16  ;;  %v16911_v48 = vpop.f32.mrb[35].mxu1 }
 0x6cb   :  { %19958 = vmatpush3.bf16.msra.mxu0 %v24410_v1  ;;  %20099 = vmatpush3.bf16.msra.mxu1 %v24333_v9  ;;  %v24423_v48 = vld [vmem:[#allocation55_spill] sm:$0xff] }
 0x6cc   :  { %19959 = vmatprep.subr.bf16.mxu0 %v24148_v8  ;;  %20100 = vmatprep.subr.bf16.mxu1 %v24148_v8 }
 0x6cf   :  { %19961 = vmatpush3.bf16.msra.mxu0 %v24411_v63  ;;  %20102 = vmatpush3.bf16.msra.mxu1 %v24335_v40 }
 0x6d0   :  { %19962 = vmatprep.subr.bf16.mxu0 %v24148_v8  ;;  %20103 = vmatprep.subr.bf16.mxu1 %v24148_v8 }
 0x6d2   :  { %17225 = vmatmul.mubr.msk.f32.vlgmr.msra.gmra.mrb[30].mxu0 %vm9896_vm1, %v24285_v44 }
 0x6d3   :  { %19964 = vmatpush3.bf16.msra.mxu0 %v20640_v20  ;;  %20105 = vmatpush3.bf16.msra.mxu1 %v24336_v7 }
 0x6d4   :  { %19965 = vmatprep.subr.bf16.mxu0 %v24148_v8  ;;  %20106 = vmatprep.subr.bf16.mxu1 %v24148_v8 }
 0x6d5   :  { %17259 = vmatprep.mubr.msk.f32.mxu0 %vm20508_vm0, %v24209_v25 }
 0x6d6   :  { %17435 = vmatmul.mubr.msk.f32.vlgmr.msra.gmra.mrb[40].mxu1 %vm10543_vm2, %v24285_v44 }
 0x6d7   :  { %19967 = vmatpush3.bf16.msra.mxu0 %v20655_v27  ;;  %20108 = vmatpush3.bf16.msra.mxu1 %v20661_v28 }
 0x6d8   :  { %19968 = vmatprep.subr.bf16.mxu0 %v24148_v8  ;;  %20109 = vmatprep.subr.bf16.mxu1 %v24148_v8 }
 0x6d9   :  { %17469 = vmatprep.mubr.msk.f32.mxu1 %vm20508_vm0, %v24209_v25 }
 0x6db   :  { %19970 = vmatpush3.bf16.msra.mxu0 %v20676_v34  ;;  %20111 = vmatpush3.bf16.msra.mxu1 %v24210_v49 }
 0x6dc   :  { %19971 = vmatprep.subr.bf16.mxu0 %v24148_v8  ;;  %20112 = vmatprep.subr.bf16.mxu1 %v24148_v8 }
 0x6df   :  { %19973 = vmatpush3.bf16.msra.mxu0 %v24211_v54  ;;  %20114 = vmatpush3.bf16.msra.mxu1 %v24212_v52 }
 0x6e0   :  { %19974 = vmatprep.subr.bf16.mxu0 %v24148_v8  ;;  %20115 = vmatprep.subr.bf16.mxu1 %v24148_v8 }
 0x6e3   :  { %19976 = vmatpush3.bf16.msra.mxu0 %v24213_v24  ;;  %20117 = vmatpush3.bf16.msra.mxu1 %v24214_v37 }
 0x6e4   :  { %19977 = vmatprep.subr.bf16.mxu0 %v24148_v8  ;;  %20118 = vmatprep.subr.bf16.mxu1 %v24148_v8 }
 0x6e5   :  { %v9576_v20 = vpop.f32.mrb[26].mxu0 }
 0x6e6   :  { %v9577_v27 = vadd.f32 %v9576_v20, %v9473_v51  ;;  %v16946_v34 = vpop.f32.mrb[27].mxu0 }
 0x6e7   :  { %19979 = vmatpush3.bf16.msra.mxu0 %v24215_v45  ;;  %20120 = vmatpush3.bf16.msra.mxu1 %v24216_v32 }
 0x6e8   :  { %19980 = vmatprep.subr.bf16.mxu0 %v24148_v8  ;;  %20121 = vmatprep.subr.bf16.mxu1 %v24148_v8 }
 0x6e9   :  { %v9665_v54 = vpop.f32.mrb[36].mxu1 }
 0x6ea   :  { %v9666_v18 = vadd.f32 %v9665_v54, %v9577_v27  ;;  %v16981_v24 = vpop.f32.mrb[37].mxu1 }
 0x6eb   :  { %19982 = vmatpush3.bf16.msra.mxu0 %v24217_v61  ;;  %20123 = vmatpush3.bf16.msra.mxu1 %v24218_v46 }
 0x6ec   :  { %19983 = vmatprep.subr.bf16.mxu0 %v24148_v8  ;;  %20124 = vmatprep.subr.bf16.mxu1 %v24148_v8 }
 0x6ef   :  { %19985 = vmatpush3.bf16.msra.mxu0 %v24219_v60  ;;  %20126 = vmatpush3.bf16.msra.mxu1 %v24220_v26  ;;  %v23758_v60 = vpop.permute.xlu1 %11188 }
 0x6f0   :  { %20127 = vmatprep.subr.bf16.mxu1 %v24148_v8  ;;  %20130 = vmatprep.subr.bf16.mxu0 %v24148_v8  ;;  %vm11190_vm3 = vcmp.eq.s32.totalorder %v23758_v60, %v21239_v33  ;;  %v24412_v33 = vld [vmem:[#allocation26_spill] sm:$0xff] }
 0x6f2   :  { %17260 = vmatmul.mubr.msk.f32.vlgmr.msra.gmra.mrb[30].mxu0 %vm9896_vm1, %v24285_v44  ;;  %vm11940_vm1 = vcmask 105472  }
 0x6f3   :  { %20129 = vmatpush3.bf16.msra.mxu1 %v24227_v36  ;;  %20132 = vmatpush3.bf16.msra.mxu0 %v20661_v28 }
 0x6f4   :  { %20133 = vmatprep.subr.bf16.mxu0 %v24148_v8  ;;  %20154 = vmatprep.subr.bf16.mxu1 %v24148_v8 }
 0x6f5   :  { %17504 = vmatprep.mubr.msk.f32.mxu0 %vm20508_vm0, %v24209_v25 }
 0x6f6   :  { %17470 = vmatmul.mubr.msk.f32.vlgmr.msra.gmra.mrb[40].mxu1 %vm10543_vm2, %v24285_v44  ;;  %vm11942_vm2 = vcmask 113664  }
 0x6f7   :  { %20135 = vmatpush3.bf16.msra.mxu0 %v24210_v49  ;;  %20156 = vmatpush3.bf16.msra.mxu1 %v20920_v10  ;;  %v12062_v10 = vsel %vm11190_vm3, 1.0, %v24209_v25 }
 0x6f8   :  { %20136 = vmatprep.subr.bf16.mxu0 %v24148_v8  ;;  %20157 = vmatprep.subr.bf16.mxu1 %v24148_v8 }
 0x6f9   :  { %17539 = vmatprep.mubr.msk.f32.mxu1 %vm20508_vm0, %v24209_v25 }
 0x6fb   :  { %20138 = vmatpush3.bf16.msra.mxu0 %v24212_v52  ;;  %20159 = vmatpush3.bf16.msra.mxu1 %v20989_v14  ;;  %v23776_v14 = vsub.f32 %v12062_v10, %v12062_v10 }
 0x6fc   :  { %20139 = vmatprep.subr.bf16.mxu0 %v24148_v8  ;;  %20160 = vmatprep.subr.bf16.mxu1 %v24148_v8 }
 0x6fd   :  { %v11276_v19 = vand.u32 4294901760, %v23776_v14 }
 0x6ff   :  { %20141 = vmatpush3.bf16.msra.mxu0 %v24214_v37  ;;  %20162 = vmatpush3.bf16.msra.mxu1 %v21018_v23 }
 0x700   :  { %20142 = vmatprep.subr.bf16.mxu0 %v24148_v8  ;;  %20163 = vmatprep.subr.bf16.mxu1 %v24148_v8 }
 0x703   :  { %20144 = vmatpush3.bf16.msra.mxu0 %v24216_v32  ;;  %20165 = vmatpush3.bf16.msra.mxu1 %v21070_v38 }
 0x704   :  { %20145 = vmatprep.subr.bf16.mxu0 %v24148_v8  ;;  %20166 = vmatprep.subr.bf16.mxu1 %v24148_v8 }
 0x705   :  { %v9784_v23 = vpop.f32.mrb[28].mxu0 }
 0x706   :  { %v9785_v61 = vadd.f32 %v9784_v23, %v9666_v18  ;;  %v17016_v45 = vpop.f32.mrb[29].mxu0 }
 0x707   :  { %20147 = vmatpush3.bf16.msra.mxu0 %v24218_v46  ;;  %20168 = vmatpush3.bf16.msra.mxu1 %v21092_v30  ;;  %v11277_v30 = vsub.f32 %v23776_v14, %v11276_v19 }
 0x708   :  { %20148 = vmatprep.subr.bf16.mxu0 %v24148_v8  ;;  %20169 = vmatprep.subr.bf16.mxu1 %v24148_v8 }
 0x709   :  { %v9871_v38 = vpop.f32.mrb[38].mxu1  ;;  %v11278_v13 = vand.u32 4294901760, %v11277_v30 }
 0x70a   :  { %v23785_v41 = vadd.f32 %v9871_v38, %v9785_v61  ;;  %v17051_v16 = vpop.f32.mrb[39].mxu1 }
 0x70b   :  { %20150 = vmatpush3.bf16.msra.mxu0 %v24220_v26  ;;  %20171 = vmatpush3.bf16.msra.mxu1 %v21153_v59 }
 0x70c   :  { %20151 = vmatprep.subr.bf16.mxu0 %v24148_v8  ;;  %20172 = vmatprep.subr.bf16.mxu1 %v24148_v8 }
 0x70f   :  { %20153 = vmatpush3.bf16.msra.mxu0 %v24227_v36  ;;  %20174 = vmatpush3.bf16.msra.mxu1 %v21176_v42 }
 0x710   :  { %20175 = vmatprep.subr.bf16.mxu1 %v24148_v8  ;;  %20178 = vmatprep.subr.bf16.mxu0 %v24148_v8 }
 0x712   :  { %17505 = vmatmul.mubr.f32.vlgmr.msra.gmra.mrb[32].mxu0 %v11278_v13 }
 0x713   :  { %20177 = vmatpush3.bf16.msra.mxu1 %v21189_v15  ;;  %20180 = vmatpush3.bf16.msra.mxu0 %v21158_v35 }
 0x714   :  { %20181 = vmatprep.subr.bf16.mxu0 %v24148_v8  ;;  %20202 = vmatprep.subr.bf16.mxu1 %v24148_v8 }
 0x715   :  { %17574 = vmatprep.mubr.msk.f32.mxu0 %vm20508_vm0, %v24209_v25 }
 0x716   :  { %17540 = vmatmul.mubr.msk.f32.vlgmr.msra.gmra.mrb[42].mxu1 %vm11190_vm3, %v24285_v44 }
 0x717   :  { %20183 = vmatpush3.bf16.msra.mxu0 %v21174_v55  ;;  %20204 = vmatpush3.bf16.msra.mxu1 %v20661_v28  ;;  %v24413_v55 = vld [vmem:[#allocation23_spill] sm:$0xff] }
 0x718   :  { %20184 = vmatprep.subr.bf16.mxu0 %v24148_v8  ;;  %20205 = vmatprep.subr.bf16.mxu1 %v24148_v8 }
 0x719   :  { %17609 = vmatprep.mubr.msk.f32.mxu1 %vm20508_vm0, %v24209_v25 }
 0x71b   :  { %20186 = vmatpush3.bf16.msra.mxu0 %v24287_v12  ;;  %20207 = vmatpush3.bf16.msra.mxu1 %v24210_v49 }
 0x71c   :  { %20187 = vmatprep.subr.bf16.mxu0 %v24148_v8  ;;  %20208 = vmatprep.subr.bf16.mxu1 %v24148_v8 }
 0x71f   :  { %20189 = vmatpush3.bf16.msra.mxu0 %v24289_v4  ;;  %20210 = vmatpush3.bf16.msra.mxu1 %v24212_v52 }
 0x720   :  { %20190 = vmatprep.subr.bf16.mxu0 %v24148_v8  ;;  %20211 = vmatprep.subr.bf16.mxu1 %v24148_v8 }
 0x723   :  { %20192 = vmatpush3.bf16.msra.mxu0 %v24291_v57  ;;  %20213 = vmatpush3.bf16.msra.mxu1 %v24214_v37  ;;  %v24418_v57 = vld [vmem:[#allocation31_spill] sm:$0xff] }
 0x724   :  { %20193 = vmatprep.subr.bf16.mxu0 %v24148_v8  ;;  %20214 = vmatprep.subr.bf16.mxu1 %v24148_v8 }
 0x727   :  { %20195 = vmatpush3.bf16.msra.mxu0 %v24293_v53  ;;  %20216 = vmatpush3.bf16.msra.mxu1 %v24216_v32  ;;  %v24420_v53 = vld [vmem:[#allocation39_spill] sm:$0xff] }
 0x728   :  { %20196 = vmatprep.subr.bf16.mxu0 %v24148_v8  ;;  %20217 = vmatprep.subr.bf16.mxu1 %v24148_v8 }
 0x72b   :  { %20198 = vmatpush3.bf16.msra.mxu0 %v24295_v22  ;;  %20219 = vmatpush3.bf16.msra.mxu1 %v24218_v46 }
 0x72c   :  { %20199 = vmatprep.subr.bf16.mxu0 %v24148_v8  ;;  %20220 = vmatprep.subr.bf16.mxu1 %v24148_v8 }
 0x72f   :  { %20201 = vmatpush3.bf16.msra.mxu0 %v24297_v6  ;;  %20222 = vmatpush3.bf16.msra.mxu1 %v24220_v26  ;;  %v24419_v6 = vld [vmem:[#allocation38_spill] sm:$0xff] }
 0x730   :  { %20223 = vmatprep.subr.bf16.mxu1 %v24148_v8  ;;  %20226 = vmatprep.subr.bf16.mxu0 %v24148_v8 }
 0x732   :  { %17575 = vmatmul.mubr.f32.vlgmr.msra.gmra.mrb[34].mxu0 %v23776_v14 }
 0x733   :  { %20225 = vmatpush3.bf16.msra.mxu1 %v24227_v36  ;;  %20228 = vmatpush3.bf16.msra.mxu0 %v21405_v29 }
 0x734   :  { %20229 = vmatprep.subr.bf16.mxu0 %v24148_v8  ;;  %20250 = vmatprep.subr.bf16.mxu1 %v24148_v8 }
 0x735   :  { %17644 = vmatprep.mubr.msk.f32.mxu0 %vm20508_vm0, %v24209_v25 }
 0x736   :  { %17610 = vmatmul.mubr.f32.vlgmr.msra.gmra.mrb[44].mxu1 %v11276_v19 }
 0x737   :  { %20231 = vmatpush3.bf16.msra.mxu0 %v21425_v0  ;;  %20252 = vmatpush3.bf16.msra.mxu1 %v20661_v28  ;;  %v24416_v0 = vld [vmem:[#allocation22_spill] sm:$0xff] }
 0x738   :  { %20232 = vmatprep.subr.bf16.mxu0 %v24148_v8  ;;  %20253 = vmatprep.subr.bf16.mxu1 %v24148_v8 }
 0x739   :  { %17679 = vmatprep.mubr.msk.f32.mxu1 %vm20508_vm0, %v24209_v25  ;;  %vm2037_vm0 = vcmask 261120  }
 0x73a   :  { %v3999_v35 = vsel %vm2037_vm0, %v24412_v33, 0.0  ;;  %v2038_v42 = vsel %vm2037_vm0, %v24413_v55, 0.0  ;;  %v4011_v22 = vsel %vm2037_vm0, %v24418_v57, 0.0  ;;  %v5970_v12 = vsel %vm2037_vm0, %v24419_v6, 0.0 }
 0x73b   :  { %20234 = vmatpush3.bf16.msra.mxu0 %v21443_v39  ;;  %20255 = vmatpush3.bf16.msra.mxu1 %v24210_v49  ;;  %v2050_v39 = vsel %vm2037_vm0, %v24416_v0, 0.0  ;;  %v5964_v4 = vsel %vm2037_vm0, %v24420_v53, 0.0  ;;  %v9876_v11 = vsel %vm2037_vm0, %v23630_v31, 0.0  ;;  %v7929_v1 = vsel %vm2037_vm0, %v24423_v48, 0.0 }
 0x73c   :  { %20235 = vmatprep.subr.bf16.mxu0 %v24148_v8  ;;  %20256 = vmatprep.subr.bf16.mxu1 %v24148_v8  ;;  %v9888_v63 = vsel %vm2037_vm0, %v23640_v17, 0.0  ;;  %v9882_v54 = vsel %vm2037_vm0, %v23644_v47, 0.0 }
 0x73f   :  { %20237 = vmatpush3.bf16.msra.mxu0 %v21459_v58  ;;  %20258 = vmatpush3.bf16.msra.mxu1 %v24212_v52  ;;  %v24415_v52 = vld [vmem:[#allocation29_spill] sm:$0xff]  ;;  %v24417_v58 = vld [vmem:[#allocation34_spill] sm:$0xff] }
 0x740   :  { %20238 = vmatprep.subr.bf16.mxu0 %v24148_v8  ;;  %20259 = vmatprep.subr.bf16.mxu1 %v24148_v8  ;;  %v4005_v29 = vsel %vm2037_vm0, %v24415_v52, 0.0 }
 0x743   :  { %20240 = vmatpush3.bf16.msra.mxu0 %v24331_v21  ;;  %20261 = vmatpush3.bf16.msra.mxu1 %v24214_v37  ;;  %v24422_v21 = vld [vmem:[#allocation50_spill] sm:$0xff] }
 0x744   :  { %20241 = vmatprep.subr.bf16.mxu0 %v24148_v8  ;;  %20262 = vmatprep.subr.bf16.mxu1 %v24148_v8 }
 0x747   :  { %20243 = vmatpush3.bf16.msra.mxu0 %v24333_v9  ;;  %20264 = vmatpush3.bf16.msra.mxu1 %v24216_v32  ;;  %v24421_v9 = vld [vmem:[#allocation54_spill] sm:$0xff] }
 0x748   :  { %20244 = vmatprep.subr.bf16.mxu0 %v24148_v8  ;;  %20265 = vmatprep.subr.bf16.mxu1 %v24148_v8 }
 0x74b   :  { %20246 = vmatpush3.bf16.msra.mxu0 %v24335_v40  ;;  %20267 = vmatpush3.bf16.msra.mxu1 %v24218_v46  ;;  %v24414_v46 = vld [vmem:[#allocation24_spill] sm:$0xff]  ;;  %v7923_v40 = vsel %vm2037_vm0, %v24421_v9, 0.0 }
 0x74c   :  { %20247 = vmatprep.subr.bf16.mxu0 %v24148_v8  ;;  %20268 = vmatprep.subr.bf16.mxu1 %v24148_v8  ;;  %v2044_v49 = vsel %vm2037_vm0, %v24414_v46, 0.0 }
 0x74f   :  { %20249 = vmatpush3.bf16.msra.mxu0 %v24336_v7  ;;  %20270 = vmatpush3.bf16.msra.mxu1 %v24220_v26  ;;  %v7917_v7 = vsel %vm2037_vm0, %v24422_v21, 0.0 }
 0x750   :  { %20271 = vmatprep.subr.bf16.mxu1 %v24148_v8 }
 0x752   :  { %17645 = vmatmul.mubr.msk.f32.vlgmr.msra.gmra.mrb[36].mxu0 %vm11190_vm3, %v24285_v44 }
 0x753   :  { %20273 = vmatpush3.bf16.msra.mxu1 %v24227_v36 }
 0x756   :  { %17680 = vmatmul.mubr.msk.f32.vlgmr.msra.gmra.mrb[46].mxu1 %vm11190_vm3, %v24285_v44  ;;  %v5958_v44 = vsel %vm2037_vm0, %v24417_v58, 0.0  ;;  %vm11944_vm3 = vcmask 121856  }
 0x7c5   :  { %v23881_v28 = vpop.f32.mrb[30].mxu0 }
 0x7c6   :  { %v11834_v37 = vmul.f32 %v23881_v28, %v24353_v56  ;;  %v17261_v15 = vpop.f32.mrb[31].mxu0 }
 0x7c8   :  { %v11835_v31 = vsel %vm2037_vm0, %v11834_v37, 0.0 }
 0x7c9   :  { %v11183_v32 = vpop.f32.mrb[40].mxu1 }
 0x7ca   :  { %v17471_v8 = vpop.f32.mrb[41].mxu1  ;;  %v11846_v26 = vmul.f32 %v11183_v32, %v24339_v3  ;;  %v11840_v25 = vmul.f32 %v11183_v32, %v21906_v50 }
 0x7cc   :  { %v11847_v36 = vsel %vm2037_vm0, %v11846_v26, 0.0  ;;  %v11841_v59 = vsel %vm2037_vm0, %v11840_v25, 0.0  ;;  %vm11959_vm0 = vcmask 130048  }
 0x7cd   :  { %11848 = vadd.xlane.f32.xlu1 %v11847_v36  ;;  %11842 = vadd.xlane.f32.xlu0 %v11841_v59 }
 0x7d1   :  { %4000 = vadd.xlane.f32.xlu1 %v3999_v35  ;;  %2039 = vadd.xlane.f32.xlu0 %v2038_v42  ;;  %v24424_v35 = vld [vmem:[#allocation25_spill] sm:$0xff] }
 0x7d5   :  { %2045 = vadd.xlane.f32.xlu0 %v2044_v49  ;;  %4006 = vadd.xlane.f32.xlu1 %v4005_v29  ;;  %v24425_v49 = vld [vmem:[#allocation32_spill] sm:$0xff] }
 0x7d9   :  { %2051 = vadd.xlane.f32.xlu0 %v2050_v39  ;;  %5959 = vadd.xlane.f32.xlu1 %v5958_v44  ;;  %v24426_v44 = vld [vmem:[#allocation33_spill] sm:$0xff] }
 0x7dd   :  { %4012 = vadd.xlane.f32.xlu0 %v4011_v22  ;;  %5971 = vadd.xlane.f32.xlu1 %v5970_v12  ;;  %v24427_v22 = vld [vmem:[#allocation28_spill] sm:$0xff] }
 0x7e1   :  { %5965 = vadd.xlane.f32.xlu0 %v5964_v4  ;;  %7924 = vadd.xlane.f32.xlu1 %v7923_v40  ;;  %v24429_v40 = vld [vmem:[#allocation44_spill] sm:$0xff] }
 0x7e5   :  { %7918 = vadd.xlane.f32.xlu0 %v7917_v7  ;;  %9877 = vadd.xlane.f32.xlu1 %v9876_v11  ;;  %v11280_v62 = vpop.f32.mrb[32].mxu0 }
 0x7e6   :  { %v17506_v51 = vpop.f32.mrb[33].mxu0 }
 0x7e9   :  { %v11431_v20 = vpop.f32.mrb[42].mxu1  ;;  %7930 = vadd.xlane.f32.xlu0 %v7929_v1  ;;  %9889 = vadd.xlane.f32.xlu1 %v9888_v63  ;;  %v24430_v1 = vld [vmem:[#allocation47_spill] sm:$0xff] }
 0x7ea   :  { %v11432_v27 = vadd.f32 %v11431_v20, %v11280_v62  ;;  %v17541_v34 = vpop.f32.mrb[43].mxu1 }
 0x7ed   :  { %9883 = vadd.xlane.f32.xlu0 %v9882_v54 }
 0x7f1   :  { %11836 = vadd.xlane.f32.xlu0 %v11835_v31  ;;  %v24431_v31 = vld [vmem:[#allocation52_spill] sm:$0xff] }
 0x805   :  { %v11535_v18 = vpop.f32.mrb[34].mxu0 }
 0x806   :  { %v11536_v24 = vadd.f32 %v11535_v18, %v11432_v27  ;;  %v17576_v60 = vpop.f32.mrb[35].mxu0 }
 0x809   :  { %v11624_v10 = vpop.f32.mrb[44].mxu1 }
 0x80a   :  { %v11625_v14 = vadd.f32 %v11624_v10, %v11536_v24  ;;  %v17611_v23 = vpop.f32.mrb[45].mxu1 }
 0x825   :  { %v11743_v61 = vpop.f32.mrb[36].mxu0 }
 0x826   :  { %v11744_v17 = vadd.f32 %v11743_v61, %v11625_v14  ;;  %v17646_v45 = vpop.f32.mrb[37].mxu0 }
 0x829   :  { %v11830_v19 = vpop.f32.mrb[46].mxu1 }
 0x82a   :  { %v11831_v38 = vadd.f32 %v11830_v19, %v11744_v17  ;;  %v17681_v16 = vpop.f32.mrb[47].mxu1 }
 0x85a   :  { %v11849_v30 = vpop.xlane.xlu1 %11848  ;;  %v11843_v13 = vpop.xlane.xlu0 %11842 }
 0x85b   :  { %v11850_v15 = vadd.f32 %v11849_v30, %v11183_v32  ;;  %v11844_v47 = vadd.f32 %v11843_v13, %v11831_v38 }
 0x85d   :  { %v11851_v8 = vsub.f32 0.0, %v11850_v15  ;;  %v11845_v26 = vsub.f32 0.0, %v11844_v47 }
 0x85e   :  { %v4001_v37 = vpop.xlane.xlu1 %4000  ;;  %v2040_v25 = vpop.xlane.xlu0 %2039 }
 0x85f   :  { %11951 = vrot.lane.b32.xlu0 %v11851_v8, %s20515_s3  ;;  %11947 = vrot.lane.b32.xlu1 %v11845_v26, %s20516_s4  ;;  %v2041_v36 = vadd.f32 %v2040_v25, %v24353_v56  ;;  %v4002_v55 = vadd.f32 %v4001_v37, %v24424_v35 }
 0x861   :  { %v4003_v0 = vsub.f32 0.0, %v4002_v55 }
 0x862   :  { %v4007_v59 = vpop.xlane.xlu1 %4006  ;;  %v2046_v33 = vpop.xlane.xlu0 %2045 }
 0x863   :  { %11853 = vrot.lane.b32.xlu1 %v2041_v36, %s20516_s4  ;;  %v2047_v42 = vadd.f32 %v2046_v33, %v21906_v50  ;;  %v4008_v52 = vadd.f32 %v4007_v59, %v24425_v49 }
 0x865   :  { %v4009_v56 = vsub.f32 0.0, %v4008_v52 }
 0x866   :  { %v5960_v46 = vpop.xlane.xlu1 %5959  ;;  %v2052_v32 = vpop.xlane.xlu0 %2051 }
 0x867   :  { %v2053_v29 = vadd.f32 %v2052_v32, %v24339_v3  ;;  %11857 = vrot.lane.b32.xlu1 %v2047_v42, %s20515_s3  ;;  %v5961_v57 = vadd.f32 %v5960_v46, %v24426_v44  ;;  %v24428_v3 = vld [vmem:[#allocation35_spill] sm:$0xff] }
 0x869   :  { %11861 = vrot.lane.b32.xlu0 %v2053_v29, %s20517_s27  ;;  %v5962_v4 = vsub.f32 0.0, %v5961_v57 }
 0x86a   :  { %v5972_v39 = vpop.xlane.xlu1 %5971  ;;  %v4013_v58 = vpop.xlane.xlu0 %4012 }
 0x86b   :  { %v4014_v6 = vadd.f32 %v4013_v58, %v24427_v22  ;;  %11865 = vrot.lane.b32.xlu1 %v4003_v0, %s20518_s29  ;;  %v5973_v9 = vadd.f32 %v5972_v39, %v24428_v3 }
 0x86d   :  { %v4015_v50 = vsub.f32 0.0, %v4014_v6  ;;  %11869 = vrot.lane.b32.xlu0 %v4009_v56, %s20519_s6  ;;  %v5974_v51 = vsub.f32 0.0, %v5973_v9 }
 0x86e   :  { %v7925_v12 = vpop.xlane.xlu1 %7924  ;;  %v5966_v53 = vpop.xlane.xlu0 %5965 }
 0x86f   :  { %v5967_v21 = vadd.f32 %v5966_v53, %v24429_v40  ;;  %11873 = vrot.lane.b32.xlu1 %v4015_v50, %s20520_s28  ;;  %v7926_v48 = vadd.f32 %v7925_v12, %v23360_v2 }
 0x871   :  { %v5968_v7 = vsub.f32 0.0, %v5967_v21  ;;  %11877 = vrot.lane.b32.xlu0 %v5962_v4, %s20521_s30  ;;  %v7927_v34 = vsub.f32 0.0, %v7926_v48 }
 0x872   :  { %v9878_v11 = vpop.xlane.xlu1 %9877  ;;  %v7919_v62 = vpop.xlane.xlu0 %7918 }
 0x873   :  { %v7920_v63 = vadd.f32 %v7919_v62, %v24430_v1  ;;  %11881 = vrot.lane.b32.xlu1 %v5968_v7, %s20522_s9  ;;  %v9879_v54 = vadd.f32 %v9878_v11, %v23626_v43 }
 0x875   :  { %v7921_v20 = vsub.f32 0.0, %v7920_v63  ;;  %11885 = vrot.lane.b32.xlu0 %v5974_v51, %s20523_s10  ;;  %v9880_v10 = vsub.f32 0.0, %v9879_v54 }
 0x876   :  { %v7931_v27 = vpop.xlane.xlu0 %7930  ;;  %v9890_v24 = vpop.xlane.xlu1 %9889 }
 0x877   :  { %v7932_v18 = vadd.f32 %v7931_v27, %v24431_v31  ;;  %11889 = vrot.lane.b32.xlu1 %v7921_v20, %s20524_s11  ;;  %v9891_v14 = vadd.f32 %v9890_v24, %v23636_v5 }
 0x879   :  { %v7933_v60 = vsub.f32 0.0, %v7932_v18  ;;  %11893 = vrot.lane.b32.xlu0 %v7927_v34, %s20525_s0  ;;  %v9892_v17 = vsub.f32 0.0, %v9891_v14 }
 0x87a   :  { %v9884_v2 = vpop.xlane.xlu0 %9883 }
 0x87b   :  { %v9885_v23 = vadd.f32 %v9884_v2, %v23785_v41  ;;  %11897 = vrot.lane.b32.xlu1 %v7933_v60, %s20526_s1 }
 0x87d   :  { %v9886_v61 = vsub.f32 0.0, %v9885_v23  ;;  %11901 = vrot.lane.b32.xlu0 %v9880_v10, %s20527_s7 }
 0x87e   :  { %v11837_v43 = vpop.xlane.xlu0 %11836 }
 0x87f   :  { %v11838_v45 = vadd.f32 %v11837_v43, %v23881_v28  ;;  %11905 = vrot.lane.b32.xlu1 %v9886_v61, %s20528_s12 }
 0x881   :  { %v11839_v19 = vsub.f32 0.0, %v11838_v45  ;;  %11909 = vrot.lane.b32.xlu0 %v9892_v17, %s20529_s13 }
 0x883   :  { %11913 = vrot.lane.b32.xlu1 %v11839_v19, %s20530_s14 }
 0x8d1   :  { %v11948_v5 = vpop.permute.xlu1 %11947  ;;  %v11952_v38 = vpop.permute.xlu0 %11951 }
 0x8d2   :  { %v11954_v41 = vsel %vm11916_vm4, %v11948_v5, %v11952_v38 }
 0x8d3   :  { %11956 = vrot.lane.b32.xlu0 %v11954_v41, %s20531_s2 }
 0x8d5   :  { %v11854_v16 = vpop.permute.xlu1 %11853 }
 0x8d9   :  { %v11858_v30 = vpop.permute.xlu1 %11857 }
 0x8da   :  { %v11917_v13 = vsel %vm11916_vm4, %v11854_v16, %v11858_v30 }
 0x8db   :  { %v11862_v28 = vpop.permute.xlu0 %11861 }
 0x8dc   :  { %v11919_v15 = vsel %vm11918_vm5, %v11917_v13, %v11862_v28 }
 0x8dd   :  { %v11866_v47 = vpop.permute.xlu1 %11865 }
 0x8de   :  { %v11921_v8 = vsel %vm11920_vm6, %v11919_v15, %v11866_v47  ;;  %vm11976_vm6 = vcmask 146432  }
 0x8df   :  { %v11870_v26 = vpop.permute.xlu0 %11869 }
 0x8e0   :  { %v11923_v37 = vsel %vm11922_vm7, %v11921_v8, %v11870_v26 }
 0x8e1   :  { %v11874_v25 = vpop.permute.xlu1 %11873 }
 0x8e2   :  { %v11925_v36 = vsel %vm11924_vm8, %v11923_v37, %v11874_v25 }
 0x8e3   :  { %v11878_v59 = vpop.permute.xlu0 %11877 }
 0x8e4   :  { %v11927_v33 = vsel %vm11926_vm9, %v11925_v36, %v11878_v59 }
 0x8e5   :  { %v11882_v35 = vpop.permute.xlu1 %11881 }
 0x8e6   :  { %v11929_v55 = vsel %vm11928_vm10, %v11927_v33, %v11882_v35 }
 0x8e7   :  { %v11886_v42 = vpop.permute.xlu0 %11885 }
 0x8e8   :  { %v11931_v46 = vsel %vm11930_vm11, %v11929_v55, %v11886_v42 }
 0x8e9   :  { %v11890_v32 = vpop.permute.xlu1 %11889 }
 0x8ea   :  { %v11933_v49 = vsel %vm11932_vm12, %v11931_v46, %v11890_v32 }
 0x8eb   :  { %v11894_v52 = vpop.permute.xlu0 %11893 }
 0x8ec   :  { %v11935_v29 = vsel %vm11934_vm13, %v11933_v49, %v11894_v52 }
 0x8ed   :  { %v11898_v0 = vpop.permute.xlu1 %11897 }
 0x8ee   :  { %v11937_v39 = vsel %vm11936_vm14, %v11935_v29, %v11898_v0 }
 0x8ef   :  { %v11902_v58 = vpop.permute.xlu0 %11901 }
 0x8f0   :  { %v11939_v56 = vsel %vm11938_vm15, %v11937_v39, %v11902_v58 }
 0x8f1   :  { %v11906_v44 = vpop.permute.xlu1 %11905 }
 0x8f2   :  { %v11941_v57 = vsel %vm11940_vm1, %v11939_v56, %v11906_v44 }
 0x8f3   :  { %v11910_v22 = vpop.permute.xlu0 %11909 }
 0x8f4   :  { %v11943_v6 = vsel %vm11942_vm2, %v11941_v57, %v11910_v22 }
 0x8f5   :  { %v11914_v50 = vpop.permute.xlu1 %11913 }
 0x8f6   :  { %v11945_v12 = vsel %vm11944_vm3, %v11943_v6, %v11914_v50 }
 0x945   :  { %v11957_v53 = vpop.permute.xlu0 %11956 }
 0x946   :  { %v11960_v4 = vsel %vm11959_vm0, %v11945_v12, %v11957_v53 }
 0x947   :  { %v11962_v3 = vand.u32 2147483647, %v11960_v4  ;;  %v11961_v20 = vmin.f32 %v11960_v4, 0.0 }
 0x949   :  { %v11963_v9 = vsub.f32 0.0, %v11962_v3 }
 0x94b   :  { %v11964_v40 = vmul.f32 1.442695, %v11963_v9 }
 0x94d   :  { %20444 = vpow2.f32 %v11964_v40 }
 0x957   :  { %v20445_v21 = vpop.eup %20444 }
 0x958   :  { %v11966_v7 = vadd.f32 1.0, %v20445_v21  ;;  %v11969_v11 = vmul.f32 -0.5, %v20445_v21  ;;  %v11972_v51 = vand.u32 2147483647, %v20445_v21 }
 0x95a   :  { %20446 = vlog2.f32 %v11966_v7  ;;  %v11970_v62 = vadd.f32 1.0, %v11969_v11  ;;  %vm11973_vm5 = vcmp.lt.f32.partialorder %v11972_v51, 0.0004427343 }
 0x95c   :  { %v11971_v63 = vmul.f32 %v20445_v21, %v11970_v62 }
 0x964   :  { %v20447_v48 = vpop.eup %20446 }
 0x965   :  { %v11968_v1 = vmul.f32 0.6931472, %v20447_v48 }
 0x967   :  { %v11974_v27 = vsel %vm11973_vm5, %v11971_v63, %v11968_v1 }
 0x968   :  { %v11975_v34 = vsub.f32 %v11961_v20, %v11974_v27 }
 0x96a   :  { %v11977_v54 = vsel %vm11976_vm6, %v11975_v34, 0.0 }
 0x96b   :  { %11978 = vadd.xlane.f32.xlu1 %v11977_v54 }
 0x9f8   :  { %v11979_v31 = vpop.xlane.xlu1 %11978 }
 0x9f9   :  { %11987 = vst.msk [vmem:[%s23950_s8] sm:$0xff] %vm11916_vm4, %v11979_v31 }
 0x9fa   :  { %11992 = vsyncpa [#allocation3], 1 }
 0x9fb   :  { %11993 = vsyncpa [#allocation5], 1 }

</bundles_post_ra>
